<compile_context>
chip_gen: v6e
topology: v6e:2x2x1
jax: 0.10.0
libtpu: 0.0.40
codegen_flags: <defaults>
</compile_context>

<pallas_src>
import functools
import math

import jax
import jax.numpy as jnp
from jax.experimental import pallas as pl
from jax.experimental.pallas import tpu as pltpu


NEG_INF = -1e30
VMEM_LIMIT = 64 * 1024 * 1024   # scoped-VMEM cap, safe headroom on v5e/v6e/v7x


def _row_tile(m, target=512):
    """Largest row tile <= target that divides m and is sublane-friendly."""
    if m <= target:
        return m
    t = (target // 8) * 8
    while t >= 8:
        if m % t == 0:
            return t
        t -= 8
    return m


def _dot_nt(a, b):
    """a:(m,k) @ b:(n,k)^T -> (m,n), f32 accumulation, no explicit transpose."""
    return jax.lax.dot_general(
        a, b, (((1,), (1,)), ((), ())), preferred_element_type=jnp.float32)


# ------------------------- tiled linear: X @ W + b -------------------------

def _linear_kernel(x_ref, w_ref, b_ref, o_ref, *, activation):
    x = x_ref[...].astype(jnp.bfloat16)
    y = jnp.dot(x, w_ref[...], preferred_element_type=jnp.float32)
    y = y + b_ref[...]
    if activation == "relu":
        y = jnp.maximum(y, 0.0)
    o_ref[...] = y.astype(o_ref.dtype)


def pallas_linear(x2d, w_bf16, b, activation=None, out_dtype=jnp.float32):
    m, d_in = x2d.shape
    d_out = w_bf16.shape[1]
    tm = _row_tile(m)
    return pl.pallas_call(
        functools.partial(_linear_kernel, activation=activation),
        out_shape=jax.ShapeDtypeStruct((m, d_out), out_dtype),
        grid=(m // tm,),
        in_specs=[
            pl.BlockSpec((tm, d_in), lambda i: (i, 0)),
            # constant index_map -> weight/bias DMA'd once, VMEM resident
            pl.BlockSpec((d_in, d_out), lambda i: (0, 0)),
            pl.BlockSpec((1, d_out), lambda i: (0, 0)),
        ],
        out_specs=pl.BlockSpec((tm, d_out), lambda i: (i, 0)),
        compiler_params=pltpu.CompilerParams(
            dimension_semantics=("parallel",), vmem_limit_bytes=VMEM_LIMIT),
    )(x2d, w_bf16, b.reshape(1, d_out))


# ------------------------- fused FFN: relu(X@W1+b1)@W2+b2 -------------------------

def _ffn_kernel(x_ref, w1_ref, b1_ref, w2_ref, b2_ref, o_ref):
    x = x_ref[...].astype(jnp.bfloat16)
    h = jnp.dot(x, w1_ref[...], preferred_element_type=jnp.float32) + b1_ref[...]
    h = jnp.maximum(h, 0.0)
    y = jnp.dot(h.astype(jnp.bfloat16), w2_ref[...],
                preferred_element_type=jnp.float32) + b2_ref[...]
    o_ref[...] = y.astype(o_ref.dtype)


def pallas_ffn(x2d, w1, b1, w2, b2):
    m, d_model = x2d.shape
    d_ff = w1.shape[1]
    tm = _row_tile(m)
    return pl.pallas_call(
        _ffn_kernel,
        out_shape=jax.ShapeDtypeStruct((m, d_model), jnp.float32),
        grid=(m // tm,),
        in_specs=[
            pl.BlockSpec((tm, d_model), lambda i: (i, 0)),
            pl.BlockSpec((d_model, d_ff), lambda i: (0, 0)),
            pl.BlockSpec((1, d_ff), lambda i: (0, 0)),
            pl.BlockSpec((d_ff, d_model), lambda i: (0, 0)),
            pl.BlockSpec((1, d_model), lambda i: (0, 0)),
        ],
        out_specs=pl.BlockSpec((tm, d_model), lambda i: (i, 0)),
        compiler_params=pltpu.CompilerParams(
            dimension_semantics=("parallel",), vmem_limit_bytes=VMEM_LIMIT),
    )(x2d, w1, b1.reshape(1, d_ff), w2, b2.reshape(1, d_model))


# ------------------------- fused mask + residual + LayerNorm -------------------------

def _mask_add_ln_kernel(br_ref, res_ref, m_ref, g_ref, b_ref, o_ref, *, eps):
    br = jnp.where(m_ref[...] > 0.5, 0.0, br_ref[...])   # masked_fill on the branch
    x = br + res_ref[...]
    mean = jnp.mean(x, axis=-1, keepdims=True)
    var = jnp.mean(jnp.square(x - mean), axis=-1, keepdims=True)
    y = (x - mean) * jax.lax.rsqrt(var + eps)
    o_ref[...] = (y * g_ref[...] + b_ref[...]).astype(o_ref.dtype)


def pallas_mask_add_layernorm(branch2d, resid2d, row_mask, gamma, beta, eps=1e-6):
    m, d = branch2d.shape
    tm = _row_tile(m)
    return pl.pallas_call(
        functools.partial(_mask_add_ln_kernel, eps=eps),
        out_shape=jax.ShapeDtypeStruct((m, d), jnp.float32),
        grid=(m // tm,),
        in_specs=[
            pl.BlockSpec((tm, d), lambda i: (i, 0)),
            pl.BlockSpec((tm, d), lambda i: (i, 0)),
            pl.BlockSpec((tm, 1), lambda i: (i, 0)),
            pl.BlockSpec((1, d), lambda i: (0, 0)),
            pl.BlockSpec((1, d), lambda i: (0, 0)),
        ],
        out_specs=pl.BlockSpec((tm, d), lambda i: (i, 0)),
        compiler_params=pltpu.CompilerParams(
            dimension_semantics=("parallel",), vmem_limit_bytes=VMEM_LIMIT),
    )(branch2d, resid2d, row_mask, gamma.reshape(1, d), beta.reshape(1, d))


# ------------------------- self-attention with relative positions -------------------------

def _rel_self_attn_kernel(qkv_ref, bias_ref, rk_ref, rv_ref, o_ref, *,
                          num_head, head_dim, k_clip, scale):
    t = qkv_ref.shape[1]
    md = num_head * head_dim

    xall = qkv_ref[0]              # (T, 3*Md) bf16 : [Q | K | V]
    key_bias = bias_ref[0]         # (1, T) f32 additive mask (NEG_INF at padded keys)

    # only bands that can occur for |col - row| <= T-1 (min(2k+1, 2T-1) bands)
    r_lo = max(0, k_clip - (t - 1))
    r_hi = min(2 * k_clip, k_clip + (t - 1))

    rel_k = rk_ref[r_lo:r_hi + 1, :]     # (n_bands, D) bf16
    rel_v = rv_ref[r_lo:r_hi + 1, :]     # (n_bands, D) f32

    # relative-offset matrix shared by all heads; band masks recomputed per use
    row = jax.lax.broadcasted_iota(jnp.int32, (t, t), 0)
    col = jax.lax.broadcasted_iota(jnp.int32, (t, t), 1)
    diff = col - row

    def band_mask(r):
        if r == r_lo:
            return diff <= (r - k_clip)
        if r == r_hi:
            return diff >= (r - k_clip)
        return diff == (r - k_clip)

    for h in range(num_head):
        hs = h * head_dim
        # fold 1/sqrt(d) into q before both MXU matmuls
        qb = (xall[:, hs:hs + head_dim].astype(jnp.float32) * scale).astype(jnp.bfloat16)
        kb = xall[:, md + hs:md + hs + head_dim]
        vb = xall[:, 2 * md + hs:2 * md + hs + head_dim]

        # content scores and compact relative logits (both pre-scaled, MXU)
        sc = _dot_nt(qb, kb)                 # (T, T) f32
        rl = _dot_nt(qb, rel_k)              # (T, n_bands) f32

        # expand compact relative logits into the score matrix (band accumulate)
        for r in range(r_lo, r_hi + 1):
            c = r - r_lo
            sc = sc + jnp.where(band_mask(r), rl[:, c:c + 1], 0.0)
        sc = sc + key_bias                   # hoisted additive key-padding mask

        mrow = jnp.max(sc, axis=-1, keepdims=True)
        p = jnp.exp(sc - mrow)
        denom = jnp.sum(p, axis=-1, keepdims=True)
        attn = p * pl.reciprocal(denom, approx=False)

        ctx = jnp.dot(attn.astype(jnp.bfloat16), vb,
                      preferred_element_type=jnp.float32)

        # value-side relative term: band row-sums -> one small MXU matmul
        wcols = [jnp.sum(jnp.where(band_mask(r), attn, 0.0), axis=-1, keepdims=True)
                 for r in range(r_lo, r_hi + 1)]
        wmat = jnp.concatenate(wcols, axis=1)                   # (T, n_bands)
        ctx = ctx + jnp.dot(wmat, rel_v, preferred_element_type=jnp.float32)

        # direct per-head store into the lane slice of the output block
        o_ref[0, :, hs:hs + head_dim] = ctx.astype(o_ref.dtype)


def rel_self_attention(x, pad_mask, p, num_head, k_clip):
    b, t, md = x.shape
    d = md // num_head
    r_size = 2 * k_clip + 1

    # fused Q/K/V projection: one matmul, activation read once, bf16 output
    qkv = pallas_linear(x.reshape(b * t, md), p["w_qkv"], p["b_qkv"],
                        out_dtype=jnp.bfloat16)
    qkv = qkv.reshape(b, t, 3 * md)
    # additive key-padding bias, hoisted out of the kernel's head loop
    key_bias = (pad_mask.astype(jnp.float32) * NEG_INF).reshape(b, 1, t)

    ctx = pl.pallas_call(
        functools.partial(_rel_self_attn_kernel, num_head=num_head,
                          head_dim=d, k_clip=k_clip, scale=1.0 / math.sqrt(d)),
        out_shape=jax.ShapeDtypeStruct((b, t, md), jnp.bfloat16),
        grid=(b,),
        in_specs=[
            pl.BlockSpec((1, t, 3 * md), lambda i: (i, 0, 0)),
            pl.BlockSpec((1, 1, t), lambda i: (i, 0, 0)),
            pl.BlockSpec((r_size, d), lambda i: (0, 0)),
            pl.BlockSpec((r_size, d), lambda i: (0, 0)),
        ],
        out_specs=pl.BlockSpec((1, t, md), lambda i: (i, 0, 0)),
        compiler_params=pltpu.CompilerParams(
            dimension_semantics=("parallel",), vmem_limit_bytes=VMEM_LIMIT),
    )(qkv, key_bias, p["rel_k"], p["rel_v"])

    # output projection; query-row masking is fused into the following add+LN.
    # (Skipping the reference's q/k/v row zeroing is a no-op for the layer
    #  output: masked key columns get exp(NEG_INF)=0 weight, masked query rows
    #  are overwritten to 0 before the residual.)
    return pallas_linear(ctx.reshape(b * t, md), p["w_out"], p["b_out"])


# ------------------------- encoder layer -------------------------

def rel_transformer_encoder_layer(x, mask, params, num_head, k_clip=16):
    b, t, md = x.shape
    x2 = x.reshape(b * t, md)
    row_mask = mask.astype(jnp.float32).reshape(b * t, 1)

    attn_out = rel_self_attention(x, mask, params["self_attn"], num_head, k_clip)
    out = pallas_mask_add_layernorm(attn_out, x2, row_mask,
                                    params["ln1_g"], params["ln1_b"])

    ff = pallas_ffn(out, params["ff_w1"], params["ff_b1"],
                    params["ff_w2"], params["ff_b2"])
    out = pallas_mask_add_layernorm(ff, out, row_mask,
                                    params["ln2_g"], params["ln2_b"])
    return out.reshape(b, t, md)


# ------------------------- parameter init -------------------------

def init_params(key, model_dim, ff_dim, num_head, k_clip):
    d = model_dim // num_head
    r = 2 * k_clip + 1
    ks = jax.random.split(key, 6)

    def linear_init(k, din, dout):
        kw, kb = jax.random.split(k)
        w = (jax.random.normal(kw, (din, dout), jnp.float32) * 0.05).astype(jnp.bfloat16)
        bias = jax.random.normal(kb, (dout,), jnp.float32) * 0.05
        return w, bias

    w_qkv, b_qkv = linear_init(ks[0], model_dim, 3 * model_dim)
    w_out, b_out = linear_init(ks[1], model_dim, model_dim)
    rel_k = (jax.random.normal(ks[2], (r, d), jnp.float32) * 0.05).astype(jnp.bfloat16)
    rel_v = jax.random.normal(ks[3], (r, d), jnp.float32) * 0.05
    ff_w1, ff_b1 = linear_init(ks[4], model_dim, ff_dim)
    ff_w2, ff_b2 = linear_init(ks[5], ff_dim, model_dim)

    return {
        "self_attn": {"w_qkv": w_qkv, "b_qkv": b_qkv,
                      "w_out": w_out, "b_out": b_out,
                      "rel_k": rel_k, "rel_v": rel_v},
        "ff_w1": ff_w1, "ff_b1": ff_b1, "ff_w2": ff_w2, "ff_b2": ff_b2,
        "ln1_g": jnp.ones((model_dim,), jnp.float32),
        "ln1_b": jnp.zeros((model_dim,), jnp.float32),
        "ln2_g": jnp.ones((model_dim,), jnp.float32),
        "ln2_b": jnp.zeros((model_dim,), jnp.float32),
    }


# ------------------------- main -------------------------

if __name__ == "__main__":
    B, T = 2, 8
    model_dim, num_head, ff_dim, k_clip = 32, 4, 64, 16

    key = jax.random.PRNGKey(0)
    kp, kx = jax.random.split(key)
    params = init_params(kp, model_dim, ff_dim, num_head, k_clip)

    x = jax.random.normal(kx, (B, T, model_dim), jnp.float32)
    mask = jnp.zeros((B, T), dtype=bool).at[:, -2:].set(True)   # padded tail

    @jax.jit
    def fwd(x_, mask_, params_):
        return rel_transformer_encoder_layer(x_, mask_, params_, num_head, k_clip)

    out = jax.block_until_ready(fwd(x, mask, params))
    assert out.shape == (B, T, model_dim)
    assert bool(jnp.all(jnp.isfinite(out)))
    print("KERNEL_OK")
</pallas_src>

<mosaic_0001>
module attributes {stable_mosaic.version = 11 : i64} {
  func.func @_linear_kernel(%arg0: i32, %arg1: memref<16x32xf32, #tpu.memory_space<vmem>>, %arg2: memref<32x96xbf16, #tpu.memory_space<vmem>>, %arg3: memref<1x96xf32, #tpu.memory_space<vmem>>, %arg4: memref<16x96xbf16, #tpu.memory_space<vmem>>) attributes {dimension_semantics = [#tpu.dimension_semantics<parallel>], iteration_bounds = array<i64: 1>, scalar_prefetch = 0 : i64, scratch_operands = 0 : i64, tpu.core_type = #tpu.core_type<tc>, window_params = [{transform_indices = @transform_0, window_bounds = array<i64: 16, 32>}, {pipeline_mode = #tpu.pipeline_mode<synchronous>, transform_indices = @transform_1, window_bounds = array<i64: 32, 96>}, {pipeline_mode = #tpu.pipeline_mode<synchronous>, transform_indices = @transform_2, window_bounds = array<i64: 1, 96>}, {transform_indices = @transform_3, window_bounds = array<i64: 16, 96>}]} {
    %c0 = arith.constant 0 : index
    %c0_0 = arith.constant 0 : index
    %0 = vector.load %arg1[%c0, %c0_0] : memref<16x32xf32, #tpu.memory_space<vmem>>, vector<16x32xf32>
    %1 = arith.truncf %0 : vector<16x32xf32> to vector<16x32xbf16>
    %c0_1 = arith.constant 0 : index
    %c0_2 = arith.constant 0 : index
    %2 = vector.load %arg2[%c0_1, %c0_2] : memref<32x96xbf16, #tpu.memory_space<vmem>>, vector<32x96xbf16>
    %cst = arith.constant dense<0.000000e+00> : vector<16x96xf32>
    %3 = tpu.matmul %1, %2, %cst {dimension_numbers = #tpu.dot_dimension_numbers<[1], [0], [0], [1], [0, 0, 1, 1], [], []>} : vector<16x32xbf16>, vector<32x96xbf16>, vector<16x96xf32> -> vector<16x96xf32>
    %c0_3 = arith.constant 0 : index
    %c0_4 = arith.constant 0 : index
    %4 = vector.load %arg3[%c0_3, %c0_4] : memref<1x96xf32, #tpu.memory_space<vmem>>, vector<1x96xf32>
    %5 = vector.broadcast %4 : vector<1x96xf32> to vector<16x96xf32>
    %6 = arith.addf %3, %5 : vector<16x96xf32>
    %7 = arith.truncf %6 : vector<16x96xf32> to vector<16x96xbf16>
    %c0_5 = arith.constant 0 : index
    %c0_6 = arith.constant 0 : index
    %8 = vector.load %arg4[%c0_5, %c0_6] : memref<16x96xbf16, #tpu.memory_space<vmem>>, vector<16x96xbf16>
    tpu.vector_store %arg4[%c0_5, %c0_6], %7 {strides = array<i32>} : memref<16x96xbf16, #tpu.memory_space<vmem>>, vector<16x96xbf16>,
    return
  }
  func.func @transform_0(%arg0: i32) -> (i32, i32) {
    %c0_i32 = arith.constant 0 : i32
    %c0_i32_0 = arith.constant 0 : i32
    return %arg0, %c0_i32 : i32, i32
  }
  func.func @transform_1(%arg0: i32) -> (i32, i32) {
    %c0_i32 = arith.constant 0 : i32
    %c0_i32_0 = arith.constant 0 : i32
    %c0_i32_1 = arith.constant 0 : i32
    return %c0_i32, %c0_i32_0 : i32, i32
  }
  func.func @transform_2(%arg0: i32) -> (i32, i32) {
    %c0_i32 = arith.constant 0 : i32
    %c0_i32_0 = arith.constant 0 : i32
    %c0_i32_1 = arith.constant 0 : i32
    return %c0_i32, %c0_i32_0 : i32, i32
  }
  func.func @transform_3(%arg0: i32) -> (i32, i32) {
    %c0_i32 = arith.constant 0 : i32
    %c0_i32_0 = arith.constant 0 : i32
    return %arg0, %c0_i32 : i32, i32
  }
}

module attributes {stable_mosaic.version = 11 : i64} {
  func.func @_linear_kernel(%arg0: i32, %arg1: memref<16x32xbf16, #tpu.memory_space<vmem>>, %arg2: memref<32x32xbf16, #tpu.memory_space<vmem>>, %arg3: memref<1x32xf32, #tpu.memory_space<vmem>>, %arg4: memref<16x32xf32, #tpu.memory_space<vmem>>) attributes {dimension_semantics = [#tpu.dimension_semantics<parallel>], iteration_bounds = array<i64: 1>, scalar_prefetch = 0 : i64, scratch_operands = 0 : i64, tpu.core_type = #tpu.core_type<tc>, window_params = [{transform_indices = @transform_0, window_bounds = array<i64: 16, 32>}, {pipeline_mode = #tpu.pipeline_mode<synchronous>, transform_indices = @transform_1, window_bounds = array<i64: 32, 32>}, {pipeline_mode = #tpu.pipeline_mode<synchronous>, transform_indices = @transform_2, window_bounds = array<i64: 1, 32>}, {transform_indices = @transform_3, window_bounds = array<i64: 16, 32>}]} {
    %c0 = arith.constant 0 : index
    %c0_0 = arith.constant 0 : index
    %0 = vector.load %arg1[%c0, %c0_0] : memref<16x32xbf16, #tpu.memory_space<vmem>>, vector<16x32xbf16>
    %c0_1 = arith.constant 0 : index
    %c0_2 = arith.constant 0 : index
    %1 = vector.load %arg2[%c0_1, %c0_2] : memref<32x32xbf16, #tpu.memory_space<vmem>>, vector<32x32xbf16>
    %cst = arith.constant dense<0.000000e+00> : vector<16x32xf32>
    %2 = tpu.matmul %0, %1, %cst {dimension_numbers = #tpu.dot_dimension_numbers<[1], [0], [0], [1], [0, 0, 1, 1], [], []>} : vector<16x32xbf16>, vector<32x32xbf16>, vector<16x32xf32> -> vector<16x32xf32>
    %c0_3 = arith.constant 0 : index
    %c0_4 = arith.constant 0 : index
    %3 = vector.load %arg3[%c0_3, %c0_4] : memref<1x32xf32, #tpu.memory_space<vmem>>, vector<1x32xf32>
    %4 = vector.broadcast %3 : vector<1x32xf32> to vector<16x32xf32>
    %5 = arith.addf %2, %4 : vector<16x32xf32>
    %c0_5 = arith.constant 0 : index
    %c0_6 = arith.constant 0 : index
    %6 = vector.load %arg4[%c0_5, %c0_6] : memref<16x32xf32, #tpu.memory_space<vmem>>, vector<16x32xf32>
    tpu.vector_store %arg4[%c0_5, %c0_6], %5 {strides = array<i32>} : memref<16x32xf32, #tpu.memory_space<vmem>>, vector<16x32xf32>,
    return
  }
  func.func @transform_0(%arg0: i32) -> (i32, i32) {
    %c0_i32 = arith.constant 0 : i32
    %c0_i32_0 = arith.constant 0 : i32
    return %arg0, %c0_i32 : i32, i32
  }
  func.func @transform_1(%arg0: i32) -> (i32, i32) {
    %c0_i32 = arith.constant 0 : i32
    %c0_i32_0 = arith.constant 0 : i32
    %c0_i32_1 = arith.constant 0 : i32
    return %c0_i32, %c0_i32_0 : i32, i32
  }
  func.func @transform_2(%arg0: i32) -> (i32, i32) {
    %c0_i32 = arith.constant 0 : i32
    %c0_i32_0 = arith.constant 0 : i32
    %c0_i32_1 = arith.constant 0 : i32
    return %c0_i32, %c0_i32_0 : i32, i32
  }
  func.func @transform_3(%arg0: i32) -> (i32, i32) {
    %c0_i32 = arith.constant 0 : i32
    %c0_i32_0 = arith.constant 0 : i32
    return %arg0, %c0_i32 : i32, i32
  }
}

module attributes {stable_mosaic.version = 11 : i64} {
  func.func @_mask_add_ln_kernel(%arg0: i32, %arg1: memref<16x32xf32, #tpu.memory_space<vmem>>, %arg2: memref<16x32xf32, #tpu.memory_space<vmem>>, %arg3: memref<16x1xf32, #tpu.memory_space<vmem>>, %arg4: memref<1x32xf32, #tpu.memory_space<vmem>>, %arg5: memref<1x32xf32, #tpu.memory_space<vmem>>, %arg6: memref<16x32xf32, #tpu.memory_space<vmem>>) attributes {dimension_semantics = [#tpu.dimension_semantics<parallel>], iteration_bounds = array<i64: 1>, scalar_prefetch = 0 : i64, scratch_operands = 0 : i64, tpu.core_type = #tpu.core_type<tc>, window_params = [{transform_indices = @transform_0, window_bounds = array<i64: 16, 32>}, {transform_indices = @transform_1, window_bounds = array<i64: 16, 32>}, {transform_indices = @transform_2, window_bounds = array<i64: 16, 1>}, {pipeline_mode = #tpu.pipeline_mode<synchronous>, transform_indices = @transform_3, window_bounds = array<i64: 1, 32>}, {pipeline_mode = #tpu.pipeline_mode<synchronous>, transform_indices = @transform_4, window_bounds = array<i64: 1, 32>}, {transform_indices = @transform_5, window_bounds = array<i64: 16, 32>}]} {
    %c0 = arith.constant 0 : index
    %c0_0 = arith.constant 0 : index
    %0 = vector.load %arg3[%c0, %c0_0] : memref<16x1xf32, #tpu.memory_space<vmem>>, vector<16x1xf32>
    %cst = arith.constant 5.000000e-01 : f32
    %1 = vector.broadcast %cst : f32 to vector<16x1xf32>
    %2 = arith.cmpf ogt, %0, %1 : vector<16x1xf32>
    %c0_1 = arith.constant 0 : index
    %c0_2 = arith.constant 0 : index
    %3 = vector.load %arg1[%c0_1, %c0_2] : memref<16x32xf32, #tpu.memory_space<vmem>>, vector<16x32xf32>
    %cst_3 = arith.constant 0.000000e+00 : f32
    %4 = vector.shape_cast %2 : vector<16x1xi1> to vector<16x1xi1>
    %5 = vector.broadcast %4 : vector<16x1xi1> to vector<16x32xi1>
    %6 = vector.broadcast %cst_3 : f32 to vector<16x32xf32>
    %7 = arith.select %5, %6, %3 : vector<16x32xi1>, vector<16x32xf32>
    %c0_4 = arith.constant 0 : index
    %c0_5 = arith.constant 0 : index
    %8 = vector.load %arg2[%c0_4, %c0_5] : memref<16x32xf32, #tpu.memory_space<vmem>>, vector<16x32xf32>
    %9 = arith.addf %7, %8 : vector<16x32xf32>
    %cst_6 = arith.constant dense<0.000000e+00> : vector<16xf32>
    %10 = vector.multi_reduction <add>, %9, %cst_6 [1] : vector<16x32xf32> to vector<16xf32>
    %11 = vector.shape_cast %10 : vector<16xf32> to vector<16x1xf32>
    %cst_7 = arith.constant 3.200000e+01 : f32
    %12 = vector.broadcast %cst_7 : f32 to vector<16x1xf32>
    %13 = arith.divf %11, %12 : vector<16x1xf32>
    %14 = vector.broadcast %13 : vector<16x1xf32> to vector<16x32xf32>
    %15 = arith.subf %9, %14 : vector<16x32xf32>
    %16 = arith.mulf %15, %15 : vector<16x32xf32>
    %cst_8 = arith.constant dense<0.000000e+00> : vector<16xf32>
    %17 = vector.multi_reduction <add>, %16, %cst_8 [1] : vector<16x32xf32> to vector<16xf32>
    %18 = vector.shape_cast %17 : vector<16xf32> to vector<16x1xf32>
    %cst_9 = arith.constant 3.200000e+01 : f32
    %19 = vector.broadcast %cst_9 : f32 to vector<16x1xf32>
    %20 = arith.divf %18, %19 : vector<16x1xf32>
    %21 = vector.broadcast %13 : vector<16x1xf32> to vector<16x32xf32>
    %22 = arith.subf %9, %21 : vector<16x32xf32>
    %cst_10 = arith.constant 9.99999997E-7 : f32
    %23 = vector.broadcast %cst_10 : f32 to vector<16x1xf32>
    %24 = arith.addf %20, %23 : vector<16x1xf32>
    %25 = math.rsqrt %24 : vector<16x1xf32>
    %26 = vector.broadcast %25 : vector<16x1xf32> to vector<16x32xf32>
    %27 = arith.mulf %22, %26 : vector<16x32xf32>
    %c0_11 = arith.constant 0 : index
    %c0_12 = arith.constant 0 : index
    %28 = vector.load %arg4[%c0_11, %c0_12] : memref<1x32xf32, #tpu.memory_space<vmem>>, vector<1x32xf32>
    %29 = vector.broadcast %28 : vector<1x32xf32> to vector<16x32xf32>
    %30 = arith.mulf %27, %29 : vector<16x32xf32>
    %c0_13 = arith.constant 0 : index
    %c0_14 = arith.constant 0 : index
    %31 = vector.load %arg5[%c0_13, %c0_14] : memref<1x32xf32, #tpu.memory_space<vmem>>, vector<1x32xf32>
    %32 = vector.broadcast %31 : vector<1x32xf32> to vector<16x32xf32>
    %33 = arith.addf %30, %32 : vector<16x32xf32>
    %c0_15 = arith.constant 0 : index
    %c0_16 = arith.constant 0 : index
    %34 = vector.load %arg6[%c0_15, %c0_16] : memref<16x32xf32, #tpu.memory_space<vmem>>, vector<16x32xf32>
    tpu.vector_store %arg6[%c0_15, %c0_16], %33 {strides = array<i32>} : memref<16x32xf32, #tpu.memory_space<vmem>>, vector<16x32xf32>,
    return
  }
  func.func @transform_0(%arg0: i32) -> (i32, i32) {
    %c0_i32 = arith.constant 0 : i32
    %c0_i32_0 = arith.constant 0 : i32
    return %arg0, %c0_i32 : i32, i32
  }
  func.func @transform_1(%arg0: i32) -> (i32, i32) {
    %c0_i32 = arith.constant 0 : i32
    %c0_i32_0 = arith.constant 0 : i32
    return %arg0, %c0_i32 : i32, i32
  }
  func.func @transform_2(%arg0: i32) -> (i32, i32) {
    %c0_i32 = arith.constant 0 : i32
    %c0_i32_0 = arith.constant 0 : i32
    return %arg0, %c0_i32 : i32, i32
  }
  func.func @transform_3(%arg0: i32) -> (i32, i32) {
    %c0_i32 = arith.constant 0 : i32
    %c0_i32_0 = arith.constant 0 : i32
    %c0_i32_1 = arith.constant 0 : i32
    return %c0_i32, %c0_i32_0 : i32, i32
  }
  func.func @transform_4(%arg0: i32) -> (i32, i32) {
    %c0_i32 = arith.constant 0 : i32
    %c0_i32_0 = arith.constant 0 : i32
    %c0_i32_1 = arith.constant 0 : i32
    return %c0_i32, %c0_i32_0 : i32, i32
  }
  func.func @transform_5(%arg0: i32) -> (i32, i32) {
    %c0_i32 = arith.constant 0 : i32
    %c0_i32_0 = arith.constant 0 : i32
    return %arg0, %c0_i32 : i32, i32
  }
}

module attributes {stable_mosaic.version = 11 : i64} {
  func.func @_rel_self_attn_kernel(%arg0: i32, %arg1: memref<1x8x96xbf16, #tpu.memory_space<vmem>>, %arg2: memref<1x1x8xf32, #tpu.memory_space<vmem>>, %arg3: memref<33x8xbf16, #tpu.memory_space<vmem>>, %arg4: memref<33x8xf32, #tpu.memory_space<vmem>>, %arg5: memref<1x8x32xbf16, #tpu.memory_space<vmem>>) attributes {dimension_semantics = [#tpu.dimension_semantics<parallel>], iteration_bounds = array<i64: 2>, scalar_prefetch = 0 : i64, scratch_operands = 0 : i64, tpu.core_type = #tpu.core_type<tc>, window_params = [{transform_indices = @transform_0, window_bounds = array<i64: 1, 8, 96>}, {transform_indices = @transform_1, window_bounds = array<i64: 1, 1, 8>}, {pipeline_mode = #tpu.pipeline_mode<synchronous>, transform_indices = @transform_2, window_bounds = array<i64: 33, 8>}, {pipeline_mode = #tpu.pipeline_mode<synchronous>, transform_indices = @transform_3, window_bounds = array<i64: 33, 8>}, {transform_indices = @transform_4, window_bounds = array<i64: 1, 8, 32>}]} {
    %c0 = arith.constant 0 : index
    %c0_0 = arith.constant 0 : index
    %c0_1 = arith.constant 0 : index
    %0 = vector.load %arg1[%c0, %c0_0, %c0_1] : memref<1x8x96xbf16, #tpu.memory_space<vmem>>, vector<1x8x96xbf16>
    %1 = vector.shape_cast %0 : vector<1x8x96xbf16> to vector<8x96xbf16>
    %c0_2 = arith.constant 0 : index
    %c0_3 = arith.constant 0 : index
    %c0_4 = arith.constant 0 : index
    %2 = vector.load %arg2[%c0_2, %c0_3, %c0_4] : memref<1x1x8xf32, #tpu.memory_space<vmem>>, vector<1x1x8xf32>
    %3 = vector.shape_cast %2 : vector<1x1x8xf32> to vector<1x8xf32>
    %c9 = arith.constant 9 : index
    %c0_5 = arith.constant 0 : index
    %4 = vector.load %arg3[%c9, %c0_5] : memref<33x8xbf16, #tpu.memory_space<vmem>>, vector<15x8xbf16>
    %c9_6 = arith.constant 9 : index
    %c0_7 = arith.constant 0 : index
    %5 = vector.load %arg4[%c9_6, %c0_7] : memref<33x8xf32, #tpu.memory_space<vmem>>, vector<15x8xf32>
    %6 = tpu.iota {dimensions = array<i32: 0>} : vector<8x8xi32>
    %7 = tpu.iota {dimensions = array<i32: 1>} : vector<8x8xi32>
    %8 = arith.subi %7, %6 : vector<8x8xi32>
    %9 = vector.extract_strided_slice %1 {offsets = [0, 0], sizes = [8, 8], strides = [1, 1]} : vector<8x96xbf16> to vector<8x8xbf16>
    %10 = arith.extf %9 : vector<8x8xbf16> to vector<8x8xf32>
    %cst = arith.constant 0.353553385 : f32
    %11 = vector.broadcast %cst : f32 to vector<8x8xf32>
    %12 = arith.mulf %10, %11 : vector<8x8xf32>
    %13 = arith.truncf %12 : vector<8x8xf32> to vector<8x8xbf16>
    %14 = vector.extract_strided_slice %1 {offsets = [0, 32], sizes = [8, 8], strides = [1, 1]} : vector<8x96xbf16> to vector<8x8xbf16>
    %15 = vector.extract_strided_slice %1 {offsets = [0, 64], sizes = [8, 8], strides = [1, 1]} : vector<8x96xbf16> to vector<8x8xbf16>
    %cst_8 = arith.constant dense<0.000000e+00> : vector<8x8xf32>
    %16 = tpu.matmul %13, %14, %cst_8 {dimension_numbers = #tpu.dot_dimension_numbers<[1], [1], [0], [0], [0, 0, 1, 0], [], []>} : vector<8x8xbf16>, vector<8x8xbf16>, vector<8x8xf32> -> vector<8x8xf32>
    %cst_9 = arith.constant dense<0.000000e+00> : vector<8x15xf32>
    %17 = tpu.matmul %13, %4, %cst_9 {dimension_numbers = #tpu.dot_dimension_numbers<[1], [1], [0], [0], [0, 0, 1, 0], [], []>} : vector<8x8xbf16>, vector<15x8xbf16>, vector<8x15xf32> -> vector<8x15xf32>
    %c-7_i32 = arith.constant -7 : i32
    %18 = vector.broadcast %c-7_i32 : i32 to vector<8x8xi32>
    %19 = arith.cmpi sle, %8, %18 : vector<8x8xi32>
    %20 = vector.extract_strided_slice %17 {offsets = [0, 0], sizes = [8, 1], strides = [1, 1]} : vector<8x15xf32> to vector<8x1xf32>
    %cst_10 = arith.constant 0.000000e+00 : f32
    %21 = vector.shape_cast %20 : vector<8x1xf32> to vector<8x1xf32>
    %22 = vector.broadcast %21 : vector<8x1xf32> to vector<8x8xf32>
    %23 = vector.broadcast %cst_10 : f32 to vector<8x8xf32>
    %24 = arith.select %19, %22, %23 : vector<8x8xi1>, vector<8x8xf32>
    %25 = arith.addf %16, %24 : vector<8x8xf32>
    %c-6_i32 = arith.constant -6 : i32
    %26 = vector.broadcast %c-6_i32 : i32 to vector<8x8xi32>
    %27 = arith.cmpi eq, %8, %26 : vector<8x8xi32>
    %28 = vector.extract_strided_slice %17 {offsets = [0, 1], sizes = [8, 1], strides = [1, 1]} : vector<8x15xf32> to vector<8x1xf32>
    %cst_11 = arith.constant 0.000000e+00 : f32
    %29 = vector.shape_cast %28 : vector<8x1xf32> to vector<8x1xf32>
    %30 = vector.broadcast %29 : vector<8x1xf32> to vector<8x8xf32>
    %31 = vector.broadcast %cst_11 : f32 to vector<8x8xf32>
    %32 = arith.select %27, %30, %31 : vector<8x8xi1>, vector<8x8xf32>
    %33 = arith.addf %25, %32 : vector<8x8xf32>
    %c-5_i32 = arith.constant -5 : i32
    %34 = vector.broadcast %c-5_i32 : i32 to vector<8x8xi32>
    %35 = arith.cmpi eq, %8, %34 : vector<8x8xi32>
    %36 = vector.extract_strided_slice %17 {offsets = [0, 2], sizes = [8, 1], strides = [1, 1]} : vector<8x15xf32> to vector<8x1xf32>
    %cst_12 = arith.constant 0.000000e+00 : f32
    %37 = vector.shape_cast %36 : vector<8x1xf32> to vector<8x1xf32>
    %38 = vector.broadcast %37 : vector<8x1xf32> to vector<8x8xf32>
    %39 = vector.broadcast %cst_12 : f32 to vector<8x8xf32>
    %40 = arith.select %35, %38, %39 : vector<8x8xi1>, vector<8x8xf32>
    %41 = arith.addf %33, %40 : vector<8x8xf32>
    %c-4_i32 = arith.constant -4 : i32
    %42 = vector.broadcast %c-4_i32 : i32 to vector<8x8xi32>
    %43 = arith.cmpi eq, %8, %42 : vector<8x8xi32>
    %44 = vector.extract_strided_slice %17 {offsets = [0, 3], sizes = [8, 1], strides = [1, 1]} : vector<8x15xf32> to vector<8x1xf32>
    %cst_13 = arith.constant 0.000000e+00 : f32
    %45 = vector.shape_cast %44 : vector<8x1xf32> to vector<8x1xf32>
    %46 = vector.broadcast %45 : vector<8x1xf32> to vector<8x8xf32>
    %47 = vector.broadcast %cst_13 : f32 to vector<8x8xf32>
    %48 = arith.select %43, %46, %47 : vector<8x8xi1>, vector<8x8xf32>
    %49 = arith.addf %41, %48 : vector<8x8xf32>
    %c-3_i32 = arith.constant -3 : i32
    %50 = vector.broadcast %c-3_i32 : i32 to vector<8x8xi32>
    %51 = arith.cmpi eq, %8, %50 : vector<8x8xi32>
    %52 = vector.extract_strided_slice %17 {offsets = [0, 4], sizes = [8, 1], strides = [1, 1]} : vector<8x15xf32> to vector<8x1xf32>
    %cst_14 = arith.constant 0.000000e+00 : f32
    %53 = vector.shape_cast %52 : vector<8x1xf32> to vector<8x1xf32>
    %54 = vector.broadcast %53 : vector<8x1xf32> to vector<8x8xf32>
    %55 = vector.broadcast %cst_14 : f32 to vector<8x8xf32>
    %56 = arith.select %51, %54, %55 : vector<8x8xi1>, vector<8x8xf32>
    %57 = arith.addf %49, %56 : vector<8x8xf32>
    %c-2_i32 = arith.constant -2 : i32
    %58 = vector.broadcast %c-2_i32 : i32 to vector<8x8xi32>
    %59 = arith.cmpi eq, %8, %58 : vector<8x8xi32>
    %60 = vector.extract_strided_slice %17 {offsets = [0, 5], sizes = [8, 1], strides = [1, 1]} : vector<8x15xf32> to vector<8x1xf32>
    %cst_15 = arith.constant 0.000000e+00 : f32
    %61 = vector.shape_cast %60 : vector<8x1xf32> to vector<8x1xf32>
    %62 = vector.broadcast %61 : vector<8x1xf32> to vector<8x8xf32>
    %63 = vector.broadcast %cst_15 : f32 to vector<8x8xf32>
    %64 = arith.select %59, %62, %63 : vector<8x8xi1>, vector<8x8xf32>
    %65 = arith.addf %57, %64 : vector<8x8xf32>
    %c-1_i32 = arith.constant -1 : i32
    %66 = vector.broadcast %c-1_i32 : i32 to vector<8x8xi32>
    %67 = arith.cmpi eq, %8, %66 : vector<8x8xi32>
    %68 = vector.extract_strided_slice %17 {offsets = [0, 6], sizes = [8, 1], strides = [1, 1]} : vector<8x15xf32> to vector<8x1xf32>
    %cst_16 = arith.constant 0.000000e+00 : f32
    %69 = vector.shape_cast %68 : vector<8x1xf32> to vector<8x1xf32>
    %70 = vector.broadcast %69 : vector<8x1xf32> to vector<8x8xf32>
    %71 = vector.broadcast %cst_16 : f32 to vector<8x8xf32>
    %72 = arith.select %67, %70, %71 : vector<8x8xi1>, vector<8x8xf32>
    %73 = arith.addf %65, %72 : vector<8x8xf32>
    %c0_i32 = arith.constant 0 : i32
    %74 = vector.broadcast %c0_i32 : i32 to vector<8x8xi32>
    %75 = arith.cmpi eq, %8, %74 : vector<8x8xi32>
    %76 = vector.extract_strided_slice %17 {offsets = [0, 7], sizes = [8, 1], strides = [1, 1]} : vector<8x15xf32> to vector<8x1xf32>
    %cst_17 = arith.constant 0.000000e+00 : f32
    %77 = vector.shape_cast %76 : vector<8x1xf32> to vector<8x1xf32>
    %78 = vector.broadcast %77 : vector<8x1xf32> to vector<8x8xf32>
    %79 = vector.broadcast %cst_17 : f32 to vector<8x8xf32>
    %80 = arith.select %75, %78, %79 : vector<8x8xi1>, vector<8x8xf32>
    %81 = arith.addf %73, %80 : vector<8x8xf32>
    %c1_i32 = arith.constant 1 : i32
    %82 = vector.broadcast %c1_i32 : i32 to vector<8x8xi32>
    %83 = arith.cmpi eq, %8, %82 : vector<8x8xi32>
    %84 = vector.extract_strided_slice %17 {offsets = [0, 8], sizes = [8, 1], strides = [1, 1]} : vector<8x15xf32> to vector<8x1xf32>
    %cst_18 = arith.constant 0.000000e+00 : f32
    %85 = vector.shape_cast %84 : vector<8x1xf32> to vector<8x1xf32>
    %86 = vector.broadcast %85 : vector<8x1xf32> to vector<8x8xf32>
    %87 = vector.broadcast %cst_18 : f32 to vector<8x8xf32>
    %88 = arith.select %83, %86, %87 : vector<8x8xi1>, vector<8x8xf32>
    %89 = arith.addf %81, %88 : vector<8x8xf32>
    %c2_i32 = arith.constant 2 : i32
    %90 = vector.broadcast %c2_i32 : i32 to vector<8x8xi32>
    %91 = arith.cmpi eq, %8, %90 : vector<8x8xi32>
    %92 = vector.extract_strided_slice %17 {offsets = [0, 9], sizes = [8, 1], strides = [1, 1]} : vector<8x15xf32> to vector<8x1xf32>
    %cst_19 = arith.constant 0.000000e+00 : f32
    %93 = vector.shape_cast %92 : vector<8x1xf32> to vector<8x1xf32>
    %94 = vector.broadcast %93 : vector<8x1xf32> to vector<8x8xf32>
    %95 = vector.broadcast %cst_19 : f32 to vector<8x8xf32>
    %96 = arith.select %91, %94, %95 : vector<8x8xi1>, vector<8x8xf32>
    %97 = arith.addf %89, %96 : vector<8x8xf32>
    %c3_i32 = arith.constant 3 : i32
    %98 = vector.broadcast %c3_i32 : i32 to vector<8x8xi32>
    %99 = arith.cmpi eq, %8, %98 : vector<8x8xi32>
    %100 = vector.extract_strided_slice %17 {offsets = [0, 10], sizes = [8, 1], strides = [1, 1]} : vector<8x15xf32> to vector<8x1xf32>
    %cst_20 = arith.constant 0.000000e+00 : f32
    %101 = vector.shape_cast %100 : vector<8x1xf32> to vector<8x1xf32>
    %102 = vector.broadcast %101 : vector<8x1xf32> to vector<8x8xf32>
    %103 = vector.broadcast %cst_20 : f32 to vector<8x8xf32>
    %104 = arith.select %99, %102, %103 : vector<8x8xi1>, vector<8x8xf32>
    %105 = arith.addf %97, %104 : vector<8x8xf32>
    %c4_i32 = arith.constant 4 : i32
    %106 = vector.broadcast %c4_i32 : i32 to vector<8x8xi32>
    %107 = arith.cmpi eq, %8, %106 : vector<8x8xi32>
    %108 = vector.extract_strided_slice %17 {offsets = [0, 11], sizes = [8, 1], strides = [1, 1]} : vector<8x15xf32> to vector<8x1xf32>
    %cst_21 = arith.constant 0.000000e+00 : f32
    %109 = vector.shape_cast %108 : vector<8x1xf32> to vector<8x1xf32>
    %110 = vector.broadcast %109 : vector<8x1xf32> to vector<8x8xf32>
    %111 = vector.broadcast %cst_21 : f32 to vector<8x8xf32>
    %112 = arith.select %107, %110, %111 : vector<8x8xi1>, vector<8x8xf32>
    %113 = arith.addf %105, %112 : vector<8x8xf32>
    %c5_i32 = arith.constant 5 : i32
    %114 = vector.broadcast %c5_i32 : i32 to vector<8x8xi32>
    %115 = arith.cmpi eq, %8, %114 : vector<8x8xi32>
    %116 = vector.extract_strided_slice %17 {offsets = [0, 12], sizes = [8, 1], strides = [1, 1]} : vector<8x15xf32> to vector<8x1xf32>
    %cst_22 = arith.constant 0.000000e+00 : f32
    %117 = vector.shape_cast %116 : vector<8x1xf32> to vector<8x1xf32>
    %118 = vector.broadcast %117 : vector<8x1xf32> to vector<8x8xf32>
    %119 = vector.broadcast %cst_22 : f32 to vector<8x8xf32>
    %120 = arith.select %115, %118, %119 : vector<8x8xi1>, vector<8x8xf32>
    %121 = arith.addf %113, %120 : vector<8x8xf32>
    %c6_i32 = arith.constant 6 : i32
    %122 = vector.broadcast %c6_i32 : i32 to vector<8x8xi32>
    %123 = arith.cmpi eq, %8, %122 : vector<8x8xi32>
    %124 = vector.extract_strided_slice %17 {offsets = [0, 13], sizes = [8, 1], strides = [1, 1]} : vector<8x15xf32> to vector<8x1xf32>
    %cst_23 = arith.constant 0.000000e+00 : f32
    %125 = vector.shape_cast %124 : vector<8x1xf32> to vector<8x1xf32>
    %126 = vector.broadcast %125 : vector<8x1xf32> to vector<8x8xf32>
    %127 = vector.broadcast %cst_23 : f32 to vector<8x8xf32>
    %128 = arith.select %123, %126, %127 : vector<8x8xi1>, vector<8x8xf32>
    %129 = arith.addf %121, %128 : vector<8x8xf32>
    %c7_i32 = arith.constant 7 : i32
    %130 = vector.broadcast %c7_i32 : i32 to vector<8x8xi32>
    %131 = arith.cmpi sge, %8, %130 : vector<8x8xi32>
    %132 = vector.extract_strided_slice %17 {offsets = [0, 14], sizes = [8, 1], strides = [1, 1]} : vector<8x15xf32> to vector<8x1xf32>
    %cst_24 = arith.constant 0.000000e+00 : f32
    %133 = vector.shape_cast %132 : vector<8x1xf32> to vector<8x1xf32>
    %134 = vector.broadcast %133 : vector<8x1xf32> to vector<8x8xf32>
    %135 = vector.broadcast %cst_24 : f32 to vector<8x8xf32>
    %136 = arith.select %131, %134, %135 : vector<8x8xi1>, vector<8x8xf32>
    %137 = arith.addf %129, %136 : vector<8x8xf32>
    %138 = vector.broadcast %3 : vector<1x8xf32> to vector<8x8xf32>
    %139 = arith.addf %137, %138 : vector<8x8xf32>
    %cst_25 = arith.constant dense<0xFF800000> : vector<8xf32>
    %140 = vector.multi_reduction <maximumf>, %139, %cst_25 [1] : vector<8x8xf32> to vector<8xf32>
    %141 = vector.shape_cast %140 : vector<8xf32> to vector<8x1xf32>
    %142 = vector.broadcast %141 : vector<8x1xf32> to vector<8x8xf32>
    %143 = arith.subf %139, %142 : vector<8x8xf32>
    %144 = math.exp %143 : vector<8x8xf32>
    %cst_26 = arith.constant dense<0.000000e+00> : vector<8xf32>
    %145 = vector.multi_reduction <add>, %144, %cst_26 [1] : vector<8x8xf32> to vector<8xf32>
    %146 = vector.shape_cast %145 : vector<8xf32> to vector<8x1xf32>
    %147 = tpu.reciprocal %146 : vector<8x1xf32> -> vector<8x1xf32>
    %148 = vector.broadcast %147 : vector<8x1xf32> to vector<8x8xf32>
    %149 = arith.mulf %144, %148 : vector<8x8xf32>
    %150 = arith.truncf %149 : vector<8x8xf32> to vector<8x8xbf16>
    %cst_27 = arith.constant dense<0.000000e+00> : vector<8x8xf32>
    %151 = tpu.matmul %150, %15, %cst_27 {dimension_numbers = #tpu.dot_dimension_numbers<[1], [0], [0], [1], [0, 0, 1, 1], [], []>} : vector<8x8xbf16>, vector<8x8xbf16>, vector<8x8xf32> -> vector<8x8xf32>
    %c-7_i32_28 = arith.constant -7 : i32
    %152 = vector.broadcast %c-7_i32_28 : i32 to vector<8x8xi32>
    %153 = arith.cmpi sle, %8, %152 : vector<8x8xi32>
    %cst_29 = arith.constant 0.000000e+00 : f32
    %154 = vector.broadcast %cst_29 : f32 to vector<8x8xf32>
    %155 = arith.select %153, %149, %154 : vector<8x8xi1>, vector<8x8xf32>
    %cst_30 = arith.constant dense<0.000000e+00> : vector<8xf32>
    %156 = vector.multi_reduction <add>, %155, %cst_30 [1] : vector<8x8xf32> to vector<8xf32>
    %157 = vector.shape_cast %156 : vector<8xf32> to vector<8x1xf32>
    %c-6_i32_31 = arith.constant -6 : i32
    %158 = vector.broadcast %c-6_i32_31 : i32 to vector<8x8xi32>
    %159 = arith.cmpi eq, %8, %158 : vector<8x8xi32>
    %cst_32 = arith.constant 0.000000e+00 : f32
    %160 = vector.broadcast %cst_32 : f32 to vector<8x8xf32>
    %161 = arith.select %159, %149, %160 : vector<8x8xi1>, vector<8x8xf32>
    %cst_33 = arith.constant dense<0.000000e+00> : vector<8xf32>
    %162 = vector.multi_reduction <add>, %161, %cst_33 [1] : vector<8x8xf32> to vector<8xf32>
    %163 = vector.shape_cast %162 : vector<8xf32> to vector<8x1xf32>
    %c-5_i32_34 = arith.constant -5 : i32
    %164 = vector.broadcast %c-5_i32_34 : i32 to vector<8x8xi32>
    %165 = arith.cmpi eq, %8, %164 : vector<8x8xi32>
    %cst_35 = arith.constant 0.000000e+00 : f32
    %166 = vector.broadcast %cst_35 : f32 to vector<8x8xf32>
    %167 = arith.select %165, %149, %166 : vector<8x8xi1>, vector<8x8xf32>
    %cst_36 = arith.constant dense<0.000000e+00> : vector<8xf32>
    %168 = vector.multi_reduction <add>, %167, %cst_36 [1] : vector<8x8xf32> to vector<8xf32>
    %169 = vector.shape_cast %168 : vector<8xf32> to vector<8x1xf32>
    %c-4_i32_37 = arith.constant -4 : i32
    %170 = vector.broadcast %c-4_i32_37 : i32 to vector<8x8xi32>
    %171 = arith.cmpi eq, %8, %170 : vector<8x8xi32>
    %cst_38 = arith.constant 0.000000e+00 : f32
    %172 = vector.broadcast %cst_38 : f32 to vector<8x8xf32>
    %173 = arith.select %171, %149, %172 : vector<8x8xi1>, vector<8x8xf32>
    %cst_39 = arith.constant dense<0.000000e+00> : vector<8xf32>
    %174 = vector.multi_reduction <add>, %173, %cst_39 [1] : vector<8x8xf32> to vector<8xf32>
    %175 = vector.shape_cast %174 : vector<8xf32> to vector<8x1xf32>
    %c-3_i32_40 = arith.constant -3 : i32
    %176 = vector.broadcast %c-3_i32_40 : i32 to vector<8x8xi32>
    %177 = arith.cmpi eq, %8, %176 : vector<8x8xi32>
    %cst_41 = arith.constant 0.000000e+00 : f32
    %178 = vector.broadcast %cst_41 : f32 to vector<8x8xf32>
    %179 = arith.select %177, %149, %178 : vector<8x8xi1>, vector<8x8xf32>
    %cst_42 = arith.constant dense<0.000000e+00> : vector<8xf32>
    %180 = vector.multi_reduction <add>, %179, %cst_42 [1] : vector<8x8xf32> to vector<8xf32>
    %181 = vector.shape_cast %180 : vector<8xf32> to vector<8x1xf32>
    %c-2_i32_43 = arith.constant -2 : i32
    %182 = vector.broadcast %c-2_i32_43 : i32 to vector<8x8xi32>
    %183 = arith.cmpi eq, %8, %182 : vector<8x8xi32>
    %cst_44 = arith.constant 0.000000e+00 : f32
    %184 = vector.broadcast %cst_44 : f32 to vector<8x8xf32>
    %185 = arith.select %183, %149, %184 : vector<8x8xi1>, vector<8x8xf32>
    %cst_45 = arith.constant dense<0.000000e+00> : vector<8xf32>
    %186 = vector.multi_reduction <add>, %185, %cst_45 [1] : vector<8x8xf32> to vector<8xf32>
    %187 = vector.shape_cast %186 : vector<8xf32> to vector<8x1xf32>
    %c-1_i32_46 = arith.constant -1 : i32
    %188 = vector.broadcast %c-1_i32_46 : i32 to vector<8x8xi32>
    %189 = arith.cmpi eq, %8, %188 : vector<8x8xi32>
    %cst_47 = arith.constant 0.000000e+00 : f32
    %190 = vector.broadcast %cst_47 : f32 to vector<8x8xf32>
    %191 = arith.select %189, %149, %190 : vector<8x8xi1>, vector<8x8xf32>
    %cst_48 = arith.constant dense<0.000000e+00> : vector<8xf32>
    %192 = vector.multi_reduction <add>, %191, %cst_48 [1] : vector<8x8xf32> to vector<8xf32>
    %193 = vector.shape_cast %192 : vector<8xf32> to vector<8x1xf32>
    %c0_i32_49 = arith.constant 0 : i32
    %194 = vector.broadcast %c0_i32_49 : i32 to vector<8x8xi32>
    %195 = arith.cmpi eq, %8, %194 : vector<8x8xi32>
    %cst_50 = arith.constant 0.000000e+00 : f32
    %196 = vector.broadcast %cst_50 : f32 to vector<8x8xf32>
    %197 = arith.select %195, %149, %196 : vector<8x8xi1>, vector<8x8xf32>
    %cst_51 = arith.constant dense<0.000000e+00> : vector<8xf32>
    %198 = vector.multi_reduction <add>, %197, %cst_51 [1] : vector<8x8xf32> to vector<8xf32>
    %199 = vector.shape_cast %198 : vector<8xf32> to vector<8x1xf32>
    %c1_i32_52 = arith.constant 1 : i32
    %200 = vector.broadcast %c1_i32_52 : i32 to vector<8x8xi32>
    %201 = arith.cmpi eq, %8, %200 : vector<8x8xi32>
    %cst_53 = arith.constant 0.000000e+00 : f32
    %202 = vector.broadcast %cst_53 : f32 to vector<8x8xf32>
    %203 = arith.select %201, %149, %202 : vector<8x8xi1>, vector<8x8xf32>
    %cst_54 = arith.constant dense<0.000000e+00> : vector<8xf32>
    %204 = vector.multi_reduction <add>, %203, %cst_54 [1] : vector<8x8xf32> to vector<8xf32>
    %205 = vector.shape_cast %204 : vector<8xf32> to vector<8x1xf32>
    %c2_i32_55 = arith.constant 2 : i32
    %206 = vector.broadcast %c2_i32_55 : i32 to vector<8x8xi32>
    %207 = arith.cmpi eq, %8, %206 : vector<8x8xi32>
    %cst_56 = arith.constant 0.000000e+00 : f32
    %208 = vector.broadcast %cst_56 : f32 to vector<8x8xf32>
    %209 = arith.select %207, %149, %208 : vector<8x8xi1>, vector<8x8xf32>
    %cst_57 = arith.constant dense<0.000000e+00> : vector<8xf32>
    %210 = vector.multi_reduction <add>, %209, %cst_57 [1] : vector<8x8xf32> to vector<8xf32>
    %211 = vector.shape_cast %210 : vector<8xf32> to vector<8x1xf32>
    %c3_i32_58 = arith.constant 3 : i32
    %212 = vector.broadcast %c3_i32_58 : i32 to vector<8x8xi32>
    %213 = arith.cmpi eq, %8, %212 : vector<8x8xi32>
    %cst_59 = arith.constant 0.000000e+00 : f32
    %214 = vector.broadcast %cst_59 : f32 to vector<8x8xf32>
    %215 = arith.select %213, %149, %214 : vector<8x8xi1>, vector<8x8xf32>
    %cst_60 = arith.constant dense<0.000000e+00> : vector<8xf32>
    %216 = vector.multi_reduction <add>, %215, %cst_60 [1] : vector<8x8xf32> to vector<8xf32>
    %217 = vector.shape_cast %216 : vector<8xf32> to vector<8x1xf32>
    %c4_i32_61 = arith.constant 4 : i32
    %218 = vector.broadcast %c4_i32_61 : i32 to vector<8x8xi32>
    %219 = arith.cmpi eq, %8, %218 : vector<8x8xi32>
    %cst_62 = arith.constant 0.000000e+00 : f32
    %220 = vector.broadcast %cst_62 : f32 to vector<8x8xf32>
    %221 = arith.select %219, %149, %220 : vector<8x8xi1>, vector<8x8xf32>
    %cst_63 = arith.constant dense<0.000000e+00> : vector<8xf32>
    %222 = vector.multi_reduction <add>, %221, %cst_63 [1] : vector<8x8xf32> to vector<8xf32>
    %223 = vector.shape_cast %222 : vector<8xf32> to vector<8x1xf32>
    %c5_i32_64 = arith.constant 5 : i32
    %224 = vector.broadcast %c5_i32_64 : i32 to vector<8x8xi32>
    %225 = arith.cmpi eq, %8, %224 : vector<8x8xi32>
    %cst_65 = arith.constant 0.000000e+00 : f32
    %226 = vector.broadcast %cst_65 : f32 to vector<8x8xf32>
    %227 = arith.select %225, %149, %226 : vector<8x8xi1>, vector<8x8xf32>
    %cst_66 = arith.constant dense<0.000000e+00> : vector<8xf32>
    %228 = vector.multi_reduction <add>, %227, %cst_66 [1] : vector<8x8xf32> to vector<8xf32>
    %229 = vector.shape_cast %228 : vector<8xf32> to vector<8x1xf32>
    %c6_i32_67 = arith.constant 6 : i32
    %230 = vector.broadcast %c6_i32_67 : i32 to vector<8x8xi32>
    %231 = arith.cmpi eq, %8, %230 : vector<8x8xi32>
    %cst_68 = arith.constant 0.000000e+00 : f32
    %232 = vector.broadcast %cst_68 : f32 to vector<8x8xf32>
    %233 = arith.select %231, %149, %232 : vector<8x8xi1>, vector<8x8xf32>
    %cst_69 = arith.constant dense<0.000000e+00> : vector<8xf32>
    %234 = vector.multi_reduction <add>, %233, %cst_69 [1] : vector<8x8xf32> to vector<8xf32>
    %235 = vector.shape_cast %234 : vector<8xf32> to vector<8x1xf32>
    %c7_i32_70 = arith.constant 7 : i32
    %236 = vector.broadcast %c7_i32_70 : i32 to vector<8x8xi32>
    %237 = arith.cmpi sge, %8, %236 : vector<8x8xi32>
    %cst_71 = arith.constant 0.000000e+00 : f32
    %238 = vector.broadcast %cst_71 : f32 to vector<8x8xf32>
    %239 = arith.select %237, %149, %238 : vector<8x8xi1>, vector<8x8xf32>
    %cst_72 = arith.constant dense<0.000000e+00> : vector<8xf32>
    %240 = vector.multi_reduction <add>, %239, %cst_72 [1] : vector<8x8xf32> to vector<8xf32>
    %241 = vector.shape_cast %240 : vector<8xf32> to vector<8x1xf32>
    %242 = tpu.concatenate %157, %163, %169, %175, %181, %187, %193, %199, %205, %211, %217, %223, %229, %235, %241 in 1 : vector<8x1xf32>, vector<8x1xf32>, vector<8x1xf32>, vector<8x1xf32>, vector<8x1xf32>, vector<8x1xf32>, vector<8x1xf32>, vector<8x1xf32>, vector<8x1xf32>, vector<8x1xf32>, vector<8x1xf32>, vector<8x1xf32>, vector<8x1xf32>, vector<8x1xf32>, vector<8x1xf32> -> vector<8x15xf32>
    %cst_73 = arith.constant dense<0.000000e+00> : vector<8x8xf32>
    %243 = tpu.matmul %242, %5, %cst_73 {dimension_numbers = #tpu.dot_dimension_numbers<[1], [0], [0], [1], [0, 0, 1, 1], [], []>} : vector<8x15xf32>, vector<15x8xf32>, vector<8x8xf32> -> vector<8x8xf32>
    %244 = arith.addf %151, %243 : vector<8x8xf32>
    %245 = arith.truncf %244 : vector<8x8xf32> to vector<8x8xbf16>
    %c0_74 = arith.constant 0 : index
    %c0_75 = arith.constant 0 : index
    %c0_76 = arith.constant 0 : index
    %246 = vector.load %arg5[%c0_74, %c0_75, %c0_76] : memref<1x8x32xbf16, #tpu.memory_space<vmem>>, vector<1x8x8xbf16>
    %247 = vector.shape_cast %246 : vector<1x8x8xbf16> to vector<8x8xbf16>
    %248 = vector.shape_cast %245 : vector<8x8xbf16> to vector<1x8x8xbf16>
    tpu.vector_store %arg5[%c0_74, %c0_75, %c0_76], %248 {strides = array<i32>} : memref<1x8x32xbf16, #tpu.memory_space<vmem>>, vector<1x8x8xbf16>,
    %249 = vector.extract_strided_slice %1 {offsets = [0, 8], sizes = [8, 8], strides = [1, 1]} : vector<8x96xbf16> to vector<8x8xbf16>
    %250 = arith.extf %249 : vector<8x8xbf16> to vector<8x8xf32>
    %cst_77 = arith.constant 0.353553385 : f32
    %251 = vector.broadcast %cst_77 : f32 to vector<8x8xf32>
    %252 = arith.mulf %250, %251 : vector<8x8xf32>
    %253 = arith.truncf %252 : vector<8x8xf32> to vector<8x8xbf16>
    %254 = vector.extract_strided_slice %1 {offsets = [0, 40], sizes = [8, 8], strides = [1, 1]} : vector<8x96xbf16> to vector<8x8xbf16>
    %255 = vector.extract_strided_slice %1 {offsets = [0, 72], sizes = [8, 8], strides = [1, 1]} : vector<8x96xbf16> to vector<8x8xbf16>
    %cst_78 = arith.constant dense<0.000000e+00> : vector<8x8xf32>
    %256 = tpu.matmul %253, %254, %cst_78 {dimension_numbers = #tpu.dot_dimension_numbers<[1], [1], [0], [0], [0, 0, 1, 0], [], []>} : vector<8x8xbf16>, vector<8x8xbf16>, vector<8x8xf32> -> vector<8x8xf32>
    %cst_79 = arith.constant dense<0.000000e+00> : vector<8x15xf32>
    %257 = tpu.matmul %253, %4, %cst_79 {dimension_numbers = #tpu.dot_dimension_numbers<[1], [1], [0], [0], [0, 0, 1, 0], [], []>} : vector<8x8xbf16>, vector<15x8xbf16>, vector<8x15xf32> -> vector<8x15xf32>
    %c-7_i32_80 = arith.constant -7 : i32
    %258 = vector.broadcast %c-7_i32_80 : i32 to vector<8x8xi32>
    %259 = arith.cmpi sle, %8, %258 : vector<8x8xi32>
    %260 = vector.extract_strided_slice %257 {offsets = [0, 0], sizes = [8, 1], strides = [1, 1]} : vector<8x15xf32> to vector<8x1xf32>
    %cst_81 = arith.constant 0.000000e+00 : f32
    %261 = vector.shape_cast %260 : vector<8x1xf32> to vector<8x1xf32>
    %262 = vector.broadcast %261 : vector<8x1xf32> to vector<8x8xf32>
    %263 = vector.broadcast %cst_81 : f32 to vector<8x8xf32>
    %264 = arith.select %259, %262, %263 : vector<8x8xi1>, vector<8x8xf32>
    %265 = arith.addf %256, %264 : vector<8x8xf32>
    %c-6_i32_82 = arith.constant -6 : i32
    %266 = vector.broadcast %c-6_i32_82 : i32 to vector<8x8xi32>
    %267 = arith.cmpi eq, %8, %266 : vector<8x8xi32>
    %268 = vector.extract_strided_slice %257 {offsets = [0, 1], sizes = [8, 1], strides = [1, 1]} : vector<8x15xf32> to vector<8x1xf32>
    %cst_83 = arith.constant 0.000000e+00 : f32
    %269 = vector.shape_cast %268 : vector<8x1xf32> to vector<8x1xf32>
    %270 = vector.broadcast %269 : vector<8x1xf32> to vector<8x8xf32>
    %271 = vector.broadcast %cst_83 : f32 to vector<8x8xf32>
    %272 = arith.select %267, %270, %271 : vector<8x8xi1>, vector<8x8xf32>
    %273 = arith.addf %265, %272 : vector<8x8xf32>
    %c-5_i32_84 = arith.constant -5 : i32
    %274 = vector.broadcast %c-5_i32_84 : i32 to vector<8x8xi32>
    %275 = arith.cmpi eq, %8, %274 : vector<8x8xi32>
    %276 = vector.extract_strided_slice %257 {offsets = [0, 2], sizes = [8, 1], strides = [1, 1]} : vector<8x15xf32> to vector<8x1xf32>
    %cst_85 = arith.constant 0.000000e+00 : f32
    %277 = vector.shape_cast %276 : vector<8x1xf32> to vector<8x1xf32>
    %278 = vector.broadcast %277 : vector<8x1xf32> to vector<8x8xf32>
    %279 = vector.broadcast %cst_85 : f32 to vector<8x8xf32>
    %280 = arith.select %275, %278, %279 : vector<8x8xi1>, vector<8x8xf32>
    %281 = arith.addf %273, %280 : vector<8x8xf32>
    %c-4_i32_86 = arith.constant -4 : i32
    %282 = vector.broadcast %c-4_i32_86 : i32 to vector<8x8xi32>
    %283 = arith.cmpi eq, %8, %282 : vector<8x8xi32>
    %284 = vector.extract_strided_slice %257 {offsets = [0, 3], sizes = [8, 1], strides = [1, 1]} : vector<8x15xf32> to vector<8x1xf32>
    %cst_87 = arith.constant 0.000000e+00 : f32
    %285 = vector.shape_cast %284 : vector<8x1xf32> to vector<8x1xf32>
    %286 = vector.broadcast %285 : vector<8x1xf32> to vector<8x8xf32>
    %287 = vector.broadcast %cst_87 : f32 to vector<8x8xf32>
    %288 = arith.select %283, %286, %287 : vector<8x8xi1>, vector<8x8xf32>
    %289 = arith.addf %281, %288 : vector<8x8xf32>
    %c-3_i32_88 = arith.constant -3 : i32
    %290 = vector.broadcast %c-3_i32_88 : i32 to vector<8x8xi32>
    %291 = arith.cmpi eq, %8, %290 : vector<8x8xi32>
    %292 = vector.extract_strided_slice %257 {offsets = [0, 4], sizes = [8, 1], strides = [1, 1]} : vector<8x15xf32> to vector<8x1xf32>
    %cst_89 = arith.constant 0.000000e+00 : f32
    %293 = vector.shape_cast %292 : vector<8x1xf32> to vector<8x1xf32>
    %294 = vector.broadcast %293 : vector<8x1xf32> to vector<8x8xf32>
    %295 = vector.broadcast %cst_89 : f32 to vector<8x8xf32>
    %296 = arith.select %291, %294, %295 : vector<8x8xi1>, vector<8x8xf32>
    %297 = arith.addf %289, %296 : vector<8x8xf32>
    %c-2_i32_90 = arith.constant -2 : i32
    %298 = vector.broadcast %c-2_i32_90 : i32 to vector<8x8xi32>
    %299 = arith.cmpi eq, %8, %298 : vector<8x8xi32>
    %300 = vector.extract_strided_slice %257 {offsets = [0, 5], sizes = [8, 1], strides = [1, 1]} : vector<8x15xf32> to vector<8x1xf32>
    %cst_91 = arith.constant 0.000000e+00 : f32
    %301 = vector.shape_cast %300 : vector<8x1xf32> to vector<8x1xf32>
    %302 = vector.broadcast %301 : vector<8x1xf32> to vector<8x8xf32>
    %303 = vector.broadcast %cst_91 : f32 to vector<8x8xf32>
    %304 = arith.select %299, %302, %303 : vector<8x8xi1>, vector<8x8xf32>
    %305 = arith.addf %297, %304 : vector<8x8xf32>
    %c-1_i32_92 = arith.constant -1 : i32
    %306 = vector.broadcast %c-1_i32_92 : i32 to vector<8x8xi32>
    %307 = arith.cmpi eq, %8, %306 : vector<8x8xi32>
    %308 = vector.extract_strided_slice %257 {offsets = [0, 6], sizes = [8, 1], strides = [1, 1]} : vector<8x15xf32> to vector<8x1xf32>
    %cst_93 = arith.constant 0.000000e+00 : f32
    %309 = vector.shape_cast %308 : vector<8x1xf32> to vector<8x1xf32>
    %310 = vector.broadcast %309 : vector<8x1xf32> to vector<8x8xf32>
    %311 = vector.broadcast %cst_93 : f32 to vector<8x8xf32>
    %312 = arith.select %307, %310, %311 : vector<8x8xi1>, vector<8x8xf32>
    %313 = arith.addf %305, %312 : vector<8x8xf32>
    %c0_i32_94 = arith.constant 0 : i32
    %314 = vector.broadcast %c0_i32_94 : i32 to vector<8x8xi32>
    %315 = arith.cmpi eq, %8, %314 : vector<8x8xi32>
    %316 = vector.extract_strided_slice %257 {offsets = [0, 7], sizes = [8, 1], strides = [1, 1]} : vector<8x15xf32> to vector<8x1xf32>
    %cst_95 = arith.constant 0.000000e+00 : f32
    %317 = vector.shape_cast %316 : vector<8x1xf32> to vector<8x1xf32>
    %318 = vector.broadcast %317 : vector<8x1xf32> to vector<8x8xf32>
    %319 = vector.broadcast %cst_95 : f32 to vector<8x8xf32>
    %320 = arith.select %315, %318, %319 : vector<8x8xi1>, vector<8x8xf32>
    %321 = arith.addf %313, %320 : vector<8x8xf32>
    %c1_i32_96 = arith.constant 1 : i32
    %322 = vector.broadcast %c1_i32_96 : i32 to vector<8x8xi32>
    %323 = arith.cmpi eq, %8, %322 : vector<8x8xi32>
    %324 = vector.extract_strided_slice %257 {offsets = [0, 8], sizes = [8, 1], strides = [1, 1]} : vector<8x15xf32> to vector<8x1xf32>
    %cst_97 = arith.constant 0.000000e+00 : f32
    %325 = vector.shape_cast %324 : vector<8x1xf32> to vector<8x1xf32>
    %326 = vector.broadcast %325 : vector<8x1xf32> to vector<8x8xf32>
    %327 = vector.broadcast %cst_97 : f32 to vector<8x8xf32>
    %328 = arith.select %323, %326, %327 : vector<8x8xi1>, vector<8x8xf32>
    %329 = arith.addf %321, %328 : vector<8x8xf32>
    %c2_i32_98 = arith.constant 2 : i32
    %330 = vector.broadcast %c2_i32_98 : i32 to vector<8x8xi32>
    %331 = arith.cmpi eq, %8, %330 : vector<8x8xi32>
    %332 = vector.extract_strided_slice %257 {offsets = [0, 9], sizes = [8, 1], strides = [1, 1]} : vector<8x15xf32> to vector<8x1xf32>
    %cst_99 = arith.constant 0.000000e+00 : f32
    %333 = vector.shape_cast %332 : vector<8x1xf32> to vector<8x1xf32>
    %334 = vector.broadcast %333 : vector<8x1xf32> to vector<8x8xf32>
    %335 = vector.broadcast %cst_99 : f32 to vector<8x8xf32>
    %336 = arith.select %331, %334, %335 : vector<8x8xi1>, vector<8x8xf32>
    %337 = arith.addf %329, %336 : vector<8x8xf32>
    %c3_i32_100 = arith.constant 3 : i32
    %338 = vector.broadcast %c3_i32_100 : i32 to vector<8x8xi32>
    %339 = arith.cmpi eq, %8, %338 : vector<8x8xi32>
    %340 = vector.extract_strided_slice %257 {offsets = [0, 10], sizes = [8, 1], strides = [1, 1]} : vector<8x15xf32> to vector<8x1xf32>
    %cst_101 = arith.constant 0.000000e+00 : f32
    %341 = vector.shape_cast %340 : vector<8x1xf32> to vector<8x1xf32>
    %342 = vector.broadcast %341 : vector<8x1xf32> to vector<8x8xf32>
    %343 = vector.broadcast %cst_101 : f32 to vector<8x8xf32>
    %344 = arith.select %339, %342, %343 : vector<8x8xi1>, vector<8x8xf32>
    %345 = arith.addf %337, %344 : vector<8x8xf32>
    %c4_i32_102 = arith.constant 4 : i32
    %346 = vector.broadcast %c4_i32_102 : i32 to vector<8x8xi32>
    %347 = arith.cmpi eq, %8, %346 : vector<8x8xi32>
    %348 = vector.extract_strided_slice %257 {offsets = [0, 11], sizes = [8, 1], strides = [1, 1]} : vector<8x15xf32> to vector<8x1xf32>
    %cst_103 = arith.constant 0.000000e+00 : f32
    %349 = vector.shape_cast %348 : vector<8x1xf32> to vector<8x1xf32>
    %350 = vector.broadcast %349 : vector<8x1xf32> to vector<8x8xf32>
    %351 = vector.broadcast %cst_103 : f32 to vector<8x8xf32>
    %352 = arith.select %347, %350, %351 : vector<8x8xi1>, vector<8x8xf32>
    %353 = arith.addf %345, %352 : vector<8x8xf32>
    %c5_i32_104 = arith.constant 5 : i32
    %354 = vector.broadcast %c5_i32_104 : i32 to vector<8x8xi32>
    %355 = arith.cmpi eq, %8, %354 : vector<8x8xi32>
    %356 = vector.extract_strided_slice %257 {offsets = [0, 12], sizes = [8, 1], strides = [1, 1]} : vector<8x15xf32> to vector<8x1xf32>
    %cst_105 = arith.constant 0.000000e+00 : f32
    %357 = vector.shape_cast %356 : vector<8x1xf32> to vector<8x1xf32>
    %358 = vector.broadcast %357 : vector<8x1xf32> to vector<8x8xf32>
    %359 = vector.broadcast %cst_105 : f32 to vector<8x8xf32>
    %360 = arith.select %355, %358, %359 : vector<8x8xi1>, vector<8x8xf32>
    %361 = arith.addf %353, %360 : vector<8x8xf32>
    %c6_i32_106 = arith.constant 6 : i32
    %362 = vector.broadcast %c6_i32_106 : i32 to vector<8x8xi32>
    %363 = arith.cmpi eq, %8, %362 : vector<8x8xi32>
    %364 = vector.extract_strided_slice %257 {offsets = [0, 13], sizes = [8, 1], strides = [1, 1]} : vector<8x15xf32> to vector<8x1xf32>
    %cst_107 = arith.constant 0.000000e+00 : f32
    %365 = vector.shape_cast %364 : vector<8x1xf32> to vector<8x1xf32>
    %366 = vector.broadcast %365 : vector<8x1xf32> to vector<8x8xf32>
    %367 = vector.broadcast %cst_107 : f32 to vector<8x8xf32>
    %368 = arith.select %363, %366, %367 : vector<8x8xi1>, vector<8x8xf32>
    %369 = arith.addf %361, %368 : vector<8x8xf32>
    %c7_i32_108 = arith.constant 7 : i32
    %370 = vector.broadcast %c7_i32_108 : i32 to vector<8x8xi32>
    %371 = arith.cmpi sge, %8, %370 : vector<8x8xi32>
    %372 = vector.extract_strided_slice %257 {offsets = [0, 14], sizes = [8, 1], strides = [1, 1]} : vector<8x15xf32> to vector<8x1xf32>
    %cst_109 = arith.constant 0.000000e+00 : f32
    %373 = vector.shape_cast %372 : vector<8x1xf32> to vector<8x1xf32>
    %374 = vector.broadcast %373 : vector<8x1xf32> to vector<8x8xf32>
    %375 = vector.broadcast %cst_109 : f32 to vector<8x8xf32>
    %376 = arith.select %371, %374, %375 : vector<8x8xi1>, vector<8x8xf32>
    %377 = arith.addf %369, %376 : vector<8x8xf32>
    %378 = vector.broadcast %3 : vector<1x8xf32> to vector<8x8xf32>
    %379 = arith.addf %377, %378 : vector<8x8xf32>
    %cst_110 = arith.constant dense<0xFF800000> : vector<8xf32>
    %380 = vector.multi_reduction <maximumf>, %379, %cst_110 [1] : vector<8x8xf32> to vector<8xf32>
    %381 = vector.shape_cast %380 : vector<8xf32> to vector<8x1xf32>
    %382 = vector.broadcast %381 : vector<8x1xf32> to vector<8x8xf32>
    %383 = arith.subf %379, %382 : vector<8x8xf32>
    %384 = math.exp %383 : vector<8x8xf32>
    %cst_111 = arith.constant dense<0.000000e+00> : vector<8xf32>
    %385 = vector.multi_reduction <add>, %384, %cst_111 [1] : vector<8x8xf32> to vector<8xf32>
    %386 = vector.shape_cast %385 : vector<8xf32> to vector<8x1xf32>
    %387 = tpu.reciprocal %386 : vector<8x1xf32> -> vector<8x1xf32>
    %388 = vector.broadcast %387 : vector<8x1xf32> to vector<8x8xf32>
    %389 = arith.mulf %384, %388 : vector<8x8xf32>
    %390 = arith.truncf %389 : vector<8x8xf32> to vector<8x8xbf16>
    %cst_112 = arith.constant dense<0.000000e+00> : vector<8x8xf32>
    %391 = tpu.matmul %390, %255, %cst_112 {dimension_numbers = #tpu.dot_dimension_numbers<[1], [0], [0], [1], [0, 0, 1, 1], [], []>} : vector<8x8xbf16>, vector<8x8xbf16>, vector<8x8xf32> -> vector<8x8xf32>
    %c-7_i32_113 = arith.constant -7 : i32
    %392 = vector.broadcast %c-7_i32_113 : i32 to vector<8x8xi32>
    %393 = arith.cmpi sle, %8, %392 : vector<8x8xi32>
    %cst_114 = arith.constant 0.000000e+00 : f32
    %394 = vector.broadcast %cst_114 : f32 to vector<8x8xf32>
    %395 = arith.select %393, %389, %394 : vector<8x8xi1>, vector<8x8xf32>
    %cst_115 = arith.constant dense<0.000000e+00> : vector<8xf32>
    %396 = vector.multi_reduction <add>, %395, %cst_115 [1] : vector<8x8xf32> to vector<8xf32>
    %397 = vector.shape_cast %396 : vector<8xf32> to vector<8x1xf32>
    %c-6_i32_116 = arith.constant -6 : i32
    %398 = vector.broadcast %c-6_i32_116 : i32 to vector<8x8xi32>
    %399 = arith.cmpi eq, %8, %398 : vector<8x8xi32>
    %cst_117 = arith.constant 0.000000e+00 : f32
    %400 = vector.broadcast %cst_117 : f32 to vector<8x8xf32>
    %401 = arith.select %399, %389, %400 : vector<8x8xi1>, vector<8x8xf32>
    %cst_118 = arith.constant dense<0.000000e+00> : vector<8xf32>
    %402 = vector.multi_reduction <add>, %401, %cst_118 [1] : vector<8x8xf32> to vector<8xf32>
    %403 = vector.shape_cast %402 : vector<8xf32> to vector<8x1xf32>
    %c-5_i32_119 = arith.constant -5 : i32
    %404 = vector.broadcast %c-5_i32_119 : i32 to vector<8x8xi32>
    %405 = arith.cmpi eq, %8, %404 : vector<8x8xi32>
    %cst_120 = arith.constant 0.000000e+00 : f32
    %406 = vector.broadcast %cst_120 : f32 to vector<8x8xf32>
    %407 = arith.select %405, %389, %406 : vector<8x8xi1>, vector<8x8xf32>
    %cst_121 = arith.constant dense<0.000000e+00> : vector<8xf32>
    %408 = vector.multi_reduction <add>, %407, %cst_121 [1] : vector<8x8xf32> to vector<8xf32>
    %409 = vector.shape_cast %408 : vector<8xf32> to vector<8x1xf32>
    %c-4_i32_122 = arith.constant -4 : i32
    %410 = vector.broadcast %c-4_i32_122 : i32 to vector<8x8xi32>
    %411 = arith.cmpi eq, %8, %410 : vector<8x8xi32>
    %cst_123 = arith.constant 0.000000e+00 : f32
    %412 = vector.broadcast %cst_123 : f32 to vector<8x8xf32>
    %413 = arith.select %411, %389, %412 : vector<8x8xi1>, vector<8x8xf32>
    %cst_124 = arith.constant dense<0.000000e+00> : vector<8xf32>
    %414 = vector.multi_reduction <add>, %413, %cst_124 [1] : vector<8x8xf32> to vector<8xf32>
    %415 = vector.shape_cast %414 : vector<8xf32> to vector<8x1xf32>
    %c-3_i32_125 = arith.constant -3 : i32
    %416 = vector.broadcast %c-3_i32_125 : i32 to vector<8x8xi32>
    %417 = arith.cmpi eq, %8, %416 : vector<8x8xi32>
    %cst_126 = arith.constant 0.000000e+00 : f32
    %418 = vector.broadcast %cst_126 : f32 to vector<8x8xf32>
    %419 = arith.select %417, %389, %418 : vector<8x8xi1>, vector<8x8xf32>
    %cst_127 = arith.constant dense<0.000000e+00> : vector<8xf32>
    %420 = vector.multi_reduction <add>, %419, %cst_127 [1] : vector<8x8xf32> to vector<8xf32>
    %421 = vector.shape_cast %420 : vector<8xf32> to vector<8x1xf32>
    %c-2_i32_128 = arith.constant -2 : i32
    %422 = vector.broadcast %c-2_i32_128 : i32 to vector<8x8xi32>
    %423 = arith.cmpi eq, %8, %422 : vector<8x8xi32>
    %cst_129 = arith.constant 0.000000e+00 : f32
    %424 = vector.broadcast %cst_129 : f32 to vector<8x8xf32>
    %425 = arith.select %423, %389, %424 : vector<8x8xi1>, vector<8x8xf32>
    %cst_130 = arith.constant dense<0.000000e+00> : vector<8xf32>
    %426 = vector.multi_reduction <add>, %425, %cst_130 [1] : vector<8x8xf32> to vector<8xf32>
    %427 = vector.shape_cast %426 : vector<8xf32> to vector<8x1xf32>
    %c-1_i32_131 = arith.constant -1 : i32
    %428 = vector.broadcast %c-1_i32_131 : i32 to vector<8x8xi32>
    %429 = arith.cmpi eq, %8, %428 : vector<8x8xi32>
    %cst_132 = arith.constant 0.000000e+00 : f32
    %430 = vector.broadcast %cst_132 : f32 to vector<8x8xf32>
    %431 = arith.select %429, %389, %430 : vector<8x8xi1>, vector<8x8xf32>
    %cst_133 = arith.constant dense<0.000000e+00> : vector<8xf32>
    %432 = vector.multi_reduction <add>, %431, %cst_133 [1] : vector<8x8xf32> to vector<8xf32>
    %433 = vector.shape_cast %432 : vector<8xf32> to vector<8x1xf32>
    %c0_i32_134 = arith.constant 0 : i32
    %434 = vector.broadcast %c0_i32_134 : i32 to vector<8x8xi32>
    %435 = arith.cmpi eq, %8, %434 : vector<8x8xi32>
    %cst_135 = arith.constant 0.000000e+00 : f32
    %436 = vector.broadcast %cst_135 : f32 to vector<8x8xf32>
    %437 = arith.select %435, %389, %436 : vector<8x8xi1>, vector<8x8xf32>
    %cst_136 = arith.constant dense<0.000000e+00> : vector<8xf32>
    %438 = vector.multi_reduction <add>, %437, %cst_136 [1] : vector<8x8xf32> to vector<8xf32>
    %439 = vector.shape_cast %438 : vector<8xf32> to vector<8x1xf32>
    %c1_i32_137 = arith.constant 1 : i32
    %440 = vector.broadcast %c1_i32_137 : i32 to vector<8x8xi32>
    %441 = arith.cmpi eq, %8, %440 : vector<8x8xi32>
    %cst_138 = arith.constant 0.000000e+00 : f32
    %442 = vector.broadcast %cst_138 : f32 to vector<8x8xf32>
    %443 = arith.select %441, %389, %442 : vector<8x8xi1>, vector<8x8xf32>
    %cst_139 = arith.constant dense<0.000000e+00> : vector<8xf32>
    %444 = vector.multi_reduction <add>, %443, %cst_139 [1] : vector<8x8xf32> to vector<8xf32>
    %445 = vector.shape_cast %444 : vector<8xf32> to vector<8x1xf32>
    %c2_i32_140 = arith.constant 2 : i32
    %446 = vector.broadcast %c2_i32_140 : i32 to vector<8x8xi32>
    %447 = arith.cmpi eq, %8, %446 : vector<8x8xi32>
    %cst_141 = arith.constant 0.000000e+00 : f32
    %448 = vector.broadcast %cst_141 : f32 to vector<8x8xf32>
    %449 = arith.select %447, %389, %448 : vector<8x8xi1>, vector<8x8xf32>
    %cst_142 = arith.constant dense<0.000000e+00> : vector<8xf32>
    %450 = vector.multi_reduction <add>, %449, %cst_142 [1] : vector<8x8xf32> to vector<8xf32>
    %451 = vector.shape_cast %450 : vector<8xf32> to vector<8x1xf32>
    %c3_i32_143 = arith.constant 3 : i32
    %452 = vector.broadcast %c3_i32_143 : i32 to vector<8x8xi32>
    %453 = arith.cmpi eq, %8, %452 : vector<8x8xi32>
    %cst_144 = arith.constant 0.000000e+00 : f32
    %454 = vector.broadcast %cst_144 : f32 to vector<8x8xf32>
    %455 = arith.select %453, %389, %454 : vector<8x8xi1>, vector<8x8xf32>
    %cst_145 = arith.constant dense<0.000000e+00> : vector<8xf32>
    %456 = vector.multi_reduction <add>, %455, %cst_145 [1] : vector<8x8xf32> to vector<8xf32>
    %457 = vector.shape_cast %456 : vector<8xf32> to vector<8x1xf32>
    %c4_i32_146 = arith.constant 4 : i32
    %458 = vector.broadcast %c4_i32_146 : i32 to vector<8x8xi32>
    %459 = arith.cmpi eq, %8, %458 : vector<8x8xi32>
    %cst_147 = arith.constant 0.000000e+00 : f32
    %460 = vector.broadcast %cst_147 : f32 to vector<8x8xf32>
    %461 = arith.select %459, %389, %460 : vector<8x8xi1>, vector<8x8xf32>
    %cst_148 = arith.constant dense<0.000000e+00> : vector<8xf32>
    %462 = vector.multi_reduction <add>, %461, %cst_148 [1] : vector<8x8xf32> to vector<8xf32>
    %463 = vector.shape_cast %462 : vector<8xf32> to vector<8x1xf32>
    %c5_i32_149 = arith.constant 5 : i32
    %464 = vector.broadcast %c5_i32_149 : i32 to vector<8x8xi32>
    %465 = arith.cmpi eq, %8, %464 : vector<8x8xi32>
    %cst_150 = arith.constant 0.000000e+00 : f32
    %466 = vector.broadcast %cst_150 : f32 to vector<8x8xf32>
    %467 = arith.select %465, %389, %466 : vector<8x8xi1>, vector<8x8xf32>
    %cst_151 = arith.constant dense<0.000000e+00> : vector<8xf32>
    %468 = vector.multi_reduction <add>, %467, %cst_151 [1] : vector<8x8xf32> to vector<8xf32>
    %469 = vector.shape_cast %468 : vector<8xf32> to vector<8x1xf32>
    %c6_i32_152 = arith.constant 6 : i32
    %470 = vector.broadcast %c6_i32_152 : i32 to vector<8x8xi32>
    %471 = arith.cmpi eq, %8, %470 : vector<8x8xi32>
    %cst_153 = arith.constant 0.000000e+00 : f32
    %472 = vector.broadcast %cst_153 : f32 to vector<8x8xf32>
    %473 = arith.select %471, %389, %472 : vector<8x8xi1>, vector<8x8xf32>
    %cst_154 = arith.constant dense<0.000000e+00> : vector<8xf32>
    %474 = vector.multi_reduction <add>, %473, %cst_154 [1] : vector<8x8xf32> to vector<8xf32>
    %475 = vector.shape_cast %474 : vector<8xf32> to vector<8x1xf32>
    %c7_i32_155 = arith.constant 7 : i32
    %476 = vector.broadcast %c7_i32_155 : i32 to vector<8x8xi32>
    %477 = arith.cmpi sge, %8, %476 : vector<8x8xi32>
    %cst_156 = arith.constant 0.000000e+00 : f32
    %478 = vector.broadcast %cst_156 : f32 to vector<8x8xf32>
    %479 = arith.select %477, %389, %478 : vector<8x8xi1>, vector<8x8xf32>
    %cst_157 = arith.constant dense<0.000000e+00> : vector<8xf32>
    %480 = vector.multi_reduction <add>, %479, %cst_157 [1] : vector<8x8xf32> to vector<8xf32>
    %481 = vector.shape_cast %480 : vector<8xf32> to vector<8x1xf32>
    %482 = tpu.concatenate %397, %403, %409, %415, %421, %427, %433, %439, %445, %451, %457, %463, %469, %475, %481 in 1 : vector<8x1xf32>, vector<8x1xf32>, vector<8x1xf32>, vector<8x1xf32>, vector<8x1xf32>, vector<8x1xf32>, vector<8x1xf32>, vector<8x1xf32>, vector<8x1xf32>, vector<8x1xf32>, vector<8x1xf32>, vector<8x1xf32>, vector<8x1xf32>, vector<8x1xf32>, vector<8x1xf32> -> vector<8x15xf32>
    %cst_158 = arith.constant dense<0.000000e+00> : vector<8x8xf32>
    %483 = tpu.matmul %482, %5, %cst_158 {dimension_numbers = #tpu.dot_dimension_numbers<[1], [0], [0], [1], [0, 0, 1, 1], [], []>} : vector<8x15xf32>, vector<15x8xf32>, vector<8x8xf32> -> vector<8x8xf32>
    %484 = arith.addf %391, %483 : vector<8x8xf32>
    %485 = arith.truncf %484 : vector<8x8xf32> to vector<8x8xbf16>
    %c0_159 = arith.constant 0 : index
    %c0_160 = arith.constant 0 : index
    %c8 = arith.constant 8 : index
    %486 = vector.load %arg5[%c0_159, %c0_160, %c8] : memref<1x8x32xbf16, #tpu.memory_space<vmem>>, vector<1x8x8xbf16>
    %487 = vector.shape_cast %486 : vector<1x8x8xbf16> to vector<8x8xbf16>
    %488 = vector.shape_cast %485 : vector<8x8xbf16> to vector<1x8x8xbf16>
    tpu.vector_store %arg5[%c0_159, %c0_160, %c8], %488 {strides = array<i32>} : memref<1x8x32xbf16, #tpu.memory_space<vmem>>, vector<1x8x8xbf16>,
    %489 = vector.extract_strided_slice %1 {offsets = [0, 16], sizes = [8, 8], strides = [1, 1]} : vector<8x96xbf16> to vector<8x8xbf16>
    %490 = arith.extf %489 : vector<8x8xbf16> to vector<8x8xf32>
    %cst_161 = arith.constant 0.353553385 : f32
    %491 = vector.broadcast %cst_161 : f32 to vector<8x8xf32>
    %492 = arith.mulf %490, %491 : vector<8x8xf32>
    %493 = arith.truncf %492 : vector<8x8xf32> to vector<8x8xbf16>
    %494 = vector.extract_strided_slice %1 {offsets = [0, 48], sizes = [8, 8], strides = [1, 1]} : vector<8x96xbf16> to vector<8x8xbf16>
    %495 = vector.extract_strided_slice %1 {offsets = [0, 80], sizes = [8, 8], strides = [1, 1]} : vector<8x96xbf16> to vector<8x8xbf16>
    %cst_162 = arith.constant dense<0.000000e+00> : vector<8x8xf32>
    %496 = tpu.matmul %493, %494, %cst_162 {dimension_numbers = #tpu.dot_dimension_numbers<[1], [1], [0], [0], [0, 0, 1, 0], [], []>} : vector<8x8xbf16>, vector<8x8xbf16>, vector<8x8xf32> -> vector<8x8xf32>
    %cst_163 = arith.constant dense<0.000000e+00> : vector<8x15xf32>
    %497 = tpu.matmul %493, %4, %cst_163 {dimension_numbers = #tpu.dot_dimension_numbers<[1], [1], [0], [0], [0, 0, 1, 0], [], []>} : vector<8x8xbf16>, vector<15x8xbf16>, vector<8x15xf32> -> vector<8x15xf32>
    %c-7_i32_164 = arith.constant -7 : i32
    %498 = vector.broadcast %c-7_i32_164 : i32 to vector<8x8xi32>
    %499 = arith.cmpi sle, %8, %498 : vector<8x8xi32>
    %500 = vector.extract_strided_slice %497 {offsets = [0, 0], sizes = [8, 1], strides = [1, 1]} : vector<8x15xf32> to vector<8x1xf32>
    %cst_165 = arith.constant 0.000000e+00 : f32
    %501 = vector.shape_cast %500 : vector<8x1xf32> to vector<8x1xf32>
    %502 = vector.broadcast %501 : vector<8x1xf32> to vector<8x8xf32>
    %503 = vector.broadcast %cst_165 : f32 to vector<8x8xf32>
    %504 = arith.select %499, %502, %503 : vector<8x8xi1>, vector<8x8xf32>
    %505 = arith.addf %496, %504 : vector<8x8xf32>
    %c-6_i32_166 = arith.constant -6 : i32
    %506 = vector.broadcast %c-6_i32_166 : i32 to vector<8x8xi32>
    %507 = arith.cmpi eq, %8, %506 : vector<8x8xi32>
    %508 = vector.extract_strided_slice %497 {offsets = [0, 1], sizes = [8, 1], strides = [1, 1]} : vector<8x15xf32> to vector<8x1xf32>
    %cst_167 = arith.constant 0.000000e+00 : f32
    %509 = vector.shape_cast %508 : vector<8x1xf32> to vector<8x1xf32>
    %510 = vector.broadcast %509 : vector<8x1xf32> to vector<8x8xf32>
    %511 = vector.broadcast %cst_167 : f32 to vector<8x8xf32>
    %512 = arith.select %507, %510, %511 : vector<8x8xi1>, vector<8x8xf32>
    %513 = arith.addf %505, %512 : vector<8x8xf32>
    %c-5_i32_168 = arith.constant -5 : i32
    %514 = vector.broadcast %c-5_i32_168 : i32 to vector<8x8xi32>
    %515 = arith.cmpi eq, %8, %514 : vector<8x8xi32>
    %516 = vector.extract_strided_slice %497 {offsets = [0, 2], sizes = [8, 1], strides = [1, 1]} : vector<8x15xf32> to vector<8x1xf32>
    %cst_169 = arith.constant 0.000000e+00 : f32
    %517 = vector.shape_cast %516 : vector<8x1xf32> to vector<8x1xf32>
    %518 = vector.broadcast %517 : vector<8x1xf32> to vector<8x8xf32>
    %519 = vector.broadcast %cst_169 : f32 to vector<8x8xf32>
    %520 = arith.select %515, %518, %519 : vector<8x8xi1>, vector<8x8xf32>
    %521 = arith.addf %513, %520 : vector<8x8xf32>
    %c-4_i32_170 = arith.constant -4 : i32
    %522 = vector.broadcast %c-4_i32_170 : i32 to vector<8x8xi32>
    %523 = arith.cmpi eq, %8, %522 : vector<8x8xi32>
    %524 = vector.extract_strided_slice %497 {offsets = [0, 3], sizes = [8, 1], strides = [1, 1]} : vector<8x15xf32> to vector<8x1xf32>
    %cst_171 = arith.constant 0.000000e+00 : f32
    %525 = vector.shape_cast %524 : vector<8x1xf32> to vector<8x1xf32>
    %526 = vector.broadcast %525 : vector<8x1xf32> to vector<8x8xf32>
    %527 = vector.broadcast %cst_171 : f32 to vector<8x8xf32>
    %528 = arith.select %523, %526, %527 : vector<8x8xi1>, vector<8x8xf32>
    %529 = arith.addf %521, %528 : vector<8x8xf32>
    %c-3_i32_172 = arith.constant -3 : i32
    %530 = vector.broadcast %c-3_i32_172 : i32 to vector<8x8xi32>
    %531 = arith.cmpi eq, %8, %530 : vector<8x8xi32>
    %532 = vector.extract_strided_slice %497 {offsets = [0, 4], sizes = [8, 1], strides = [1, 1]} : vector<8x15xf32> to vector<8x1xf32>
    %cst_173 = arith.constant 0.000000e+00 : f32
    %533 = vector.shape_cast %532 : vector<8x1xf32> to vector<8x1xf32>
    %534 = vector.broadcast %533 : vector<8x1xf32> to vector<8x8xf32>
    %535 = vector.broadcast %cst_173 : f32 to vector<8x8xf32>
    %536 = arith.select %531, %534, %535 : vector<8x8xi1>, vector<8x8xf32>
    %537 = arith.addf %529, %536 : vector<8x8xf32>
    %c-2_i32_174 = arith.constant -2 : i32
    %538 = vector.broadcast %c-2_i32_174 : i32 to vector<8x8xi32>
    %539 = arith.cmpi eq, %8, %538 : vector<8x8xi32>
    %540 = vector.extract_strided_slice %497 {offsets = [0, 5], sizes = [8, 1], strides = [1, 1]} : vector<8x15xf32> to vector<8x1xf32>
    %cst_175 = arith.constant 0.000000e+00 : f32
    %541 = vector.shape_cast %540 : vector<8x1xf32> to vector<8x1xf32>
    %542 = vector.broadcast %541 : vector<8x1xf32> to vector<8x8xf32>
    %543 = vector.broadcast %cst_175 : f32 to vector<8x8xf32>
    %544 = arith.select %539, %542, %543 : vector<8x8xi1>, vector<8x8xf32>
    %545 = arith.addf %537, %544 : vector<8x8xf32>
    %c-1_i32_176 = arith.constant -1 : i32
    %546 = vector.broadcast %c-1_i32_176 : i32 to vector<8x8xi32>
    %547 = arith.cmpi eq, %8, %546 : vector<8x8xi32>
    %548 = vector.extract_strided_slice %497 {offsets = [0, 6], sizes = [8, 1], strides = [1, 1]} : vector<8x15xf32> to vector<8x1xf32>
    %cst_177 = arith.constant 0.000000e+00 : f32
    %549 = vector.shape_cast %548 : vector<8x1xf32> to vector<8x1xf32>
    %550 = vector.broadcast %549 : vector<8x1xf32> to vector<8x8xf32>
    %551 = vector.broadcast %cst_177 : f32 to vector<8x8xf32>
    %552 = arith.select %547, %550, %551 : vector<8x8xi1>, vector<8x8xf32>
    %553 = arith.addf %545, %552 : vector<8x8xf32>
    %c0_i32_178 = arith.constant 0 : i32
    %554 = vector.broadcast %c0_i32_178 : i32 to vector<8x8xi32>
    %555 = arith.cmpi eq, %8, %554 : vector<8x8xi32>
    %556 = vector.extract_strided_slice %497 {offsets = [0, 7], sizes = [8, 1], strides = [1, 1]} : vector<8x15xf32> to vector<8x1xf32>
    %cst_179 = arith.constant 0.000000e+00 : f32
    %557 = vector.shape_cast %556 : vector<8x1xf32> to vector<8x1xf32>
    %558 = vector.broadcast %557 : vector<8x1xf32> to vector<8x8xf32>
    %559 = vector.broadcast %cst_179 : f32 to vector<8x8xf32>
    %560 = arith.select %555, %558, %559 : vector<8x8xi1>, vector<8x8xf32>
    %561 = arith.addf %553, %560 : vector<8x8xf32>
    %c1_i32_180 = arith.constant 1 : i32
    %562 = vector.broadcast %c1_i32_180 : i32 to vector<8x8xi32>
    %563 = arith.cmpi eq, %8, %562 : vector<8x8xi32>
    %564 = vector.extract_strided_slice %497 {offsets = [0, 8], sizes = [8, 1], strides = [1, 1]} : vector<8x15xf32> to vector<8x1xf32>
    %cst_181 = arith.constant 0.000000e+00 : f32
    %565 = vector.shape_cast %564 : vector<8x1xf32> to vector<8x1xf32>
    %566 = vector.broadcast %565 : vector<8x1xf32> to vector<8x8xf32>
    %567 = vector.broadcast %cst_181 : f32 to vector<8x8xf32>
    %568 = arith.select %563, %566, %567 : vector<8x8xi1>, vector<8x8xf32>
    %569 = arith.addf %561, %568 : vector<8x8xf32>
    %c2_i32_182 = arith.constant 2 : i32
    %570 = vector.broadcast %c2_i32_182 : i32 to vector<8x8xi32>
    %571 = arith.cmpi eq, %8, %570 : vector<8x8xi32>
    %572 = vector.extract_strided_slice %497 {offsets = [0, 9], sizes = [8, 1], strides = [1, 1]} : vector<8x15xf32> to vector<8x1xf32>
    %cst_183 = arith.constant 0.000000e+00 : f32
    %573 = vector.shape_cast %572 : vector<8x1xf32> to vector<8x1xf32>
    %574 = vector.broadcast %573 : vector<8x1xf32> to vector<8x8xf32>
    %575 = vector.broadcast %cst_183 : f32 to vector<8x8xf32>
    %576 = arith.select %571, %574, %575 : vector<8x8xi1>, vector<8x8xf32>
    %577 = arith.addf %569, %576 : vector<8x8xf32>
    %c3_i32_184 = arith.constant 3 : i32
    %578 = vector.broadcast %c3_i32_184 : i32 to vector<8x8xi32>
    %579 = arith.cmpi eq, %8, %578 : vector<8x8xi32>
    %580 = vector.extract_strided_slice %497 {offsets = [0, 10], sizes = [8, 1], strides = [1, 1]} : vector<8x15xf32> to vector<8x1xf32>
    %cst_185 = arith.constant 0.000000e+00 : f32
    %581 = vector.shape_cast %580 : vector<8x1xf32> to vector<8x1xf32>
    %582 = vector.broadcast %581 : vector<8x1xf32> to vector<8x8xf32>
    %583 = vector.broadcast %cst_185 : f32 to vector<8x8xf32>
    %584 = arith.select %579, %582, %583 : vector<8x8xi1>, vector<8x8xf32>
    %585 = arith.addf %577, %584 : vector<8x8xf32>
    %c4_i32_186 = arith.constant 4 : i32
    %586 = vector.broadcast %c4_i32_186 : i32 to vector<8x8xi32>
    %587 = arith.cmpi eq, %8, %586 : vector<8x8xi32>
    %588 = vector.extract_strided_slice %497 {offsets = [0, 11], sizes = [8, 1], strides = [1, 1]} : vector<8x15xf32> to vector<8x1xf32>
    %cst_187 = arith.constant 0.000000e+00 : f32
    %589 = vector.shape_cast %588 : vector<8x1xf32> to vector<8x1xf32>
    %590 = vector.broadcast %589 : vector<8x1xf32> to vector<8x8xf32>
    %591 = vector.broadcast %cst_187 : f32 to vector<8x8xf32>
    %592 = arith.select %587, %590, %591 : vector<8x8xi1>, vector<8x8xf32>
    %593 = arith.addf %585, %592 : vector<8x8xf32>
    %c5_i32_188 = arith.constant 5 : i32
    %594 = vector.broadcast %c5_i32_188 : i32 to vector<8x8xi32>
    %595 = arith.cmpi eq, %8, %594 : vector<8x8xi32>
    %596 = vector.extract_strided_slice %497 {offsets = [0, 12], sizes = [8, 1], strides = [1, 1]} : vector<8x15xf32> to vector<8x1xf32>
    %cst_189 = arith.constant 0.000000e+00 : f32
    %597 = vector.shape_cast %596 : vector<8x1xf32> to vector<8x1xf32>
    %598 = vector.broadcast %597 : vector<8x1xf32> to vector<8x8xf32>
    %599 = vector.broadcast %cst_189 : f32 to vector<8x8xf32>
    %600 = arith.select %595, %598, %599 : vector<8x8xi1>, vector<8x8xf32>
    %601 = arith.addf %593, %600 : vector<8x8xf32>
    %c6_i32_190 = arith.constant 6 : i32
    %602 = vector.broadcast %c6_i32_190 : i32 to vector<8x8xi32>
    %603 = arith.cmpi eq, %8, %602 : vector<8x8xi32>
    %604 = vector.extract_strided_slice %497 {offsets = [0, 13], sizes = [8, 1], strides = [1, 1]} : vector<8x15xf32> to vector<8x1xf32>
    %cst_191 = arith.constant 0.000000e+00 : f32
    %605 = vector.shape_cast %604 : vector<8x1xf32> to vector<8x1xf32>
    %606 = vector.broadcast %605 : vector<8x1xf32> to vector<8x8xf32>
    %607 = vector.broadcast %cst_191 : f32 to vector<8x8xf32>
    %608 = arith.select %603, %606, %607 : vector<8x8xi1>, vector<8x8xf32>
    %609 = arith.addf %601, %608 : vector<8x8xf32>
    %c7_i32_192 = arith.constant 7 : i32
    %610 = vector.broadcast %c7_i32_192 : i32 to vector<8x8xi32>
    %611 = arith.cmpi sge, %8, %610 : vector<8x8xi32>
    %612 = vector.extract_strided_slice %497 {offsets = [0, 14], sizes = [8, 1], strides = [1, 1]} : vector<8x15xf32> to vector<8x1xf32>
    %cst_193 = arith.constant 0.000000e+00 : f32
    %613 = vector.shape_cast %612 : vector<8x1xf32> to vector<8x1xf32>
    %614 = vector.broadcast %613 : vector<8x1xf32> to vector<8x8xf32>
    %615 = vector.broadcast %cst_193 : f32 to vector<8x8xf32>
    %616 = arith.select %611, %614, %615 : vector<8x8xi1>, vector<8x8xf32>
    %617 = arith.addf %609, %616 : vector<8x8xf32>
    %618 = vector.broadcast %3 : vector<1x8xf32> to vector<8x8xf32>
    %619 = arith.addf %617, %618 : vector<8x8xf32>
    %cst_194 = arith.constant dense<0xFF800000> : vector<8xf32>
    %620 = vector.multi_reduction <maximumf>, %619, %cst_194 [1] : vector<8x8xf32> to vector<8xf32>
    %621 = vector.shape_cast %620 : vector<8xf32> to vector<8x1xf32>
    %622 = vector.broadcast %621 : vector<8x1xf32> to vector<8x8xf32>
    %623 = arith.subf %619, %622 : vector<8x8xf32>
    %624 = math.exp %623 : vector<8x8xf32>
    %cst_195 = arith.constant dense<0.000000e+00> : vector<8xf32>
    %625 = vector.multi_reduction <add>, %624, %cst_195 [1] : vector<8x8xf32> to vector<8xf32>
    %626 = vector.shape_cast %625 : vector<8xf32> to vector<8x1xf32>
    %627 = tpu.reciprocal %626 : vector<8x1xf32> -> vector<8x1xf32>
    %628 = vector.broadcast %627 : vector<8x1xf32> to vector<8x8xf32>
    %629 = arith.mulf %624, %628 : vector<8x8xf32>
    %630 = arith.truncf %629 : vector<8x8xf32> to vector<8x8xbf16>
    %cst_196 = arith.constant dense<0.000000e+00> : vector<8x8xf32>
    %631 = tpu.matmul %630, %495, %cst_196 {dimension_numbers = #tpu.dot_dimension_numbers<[1], [0], [0], [1], [0, 0, 1, 1], [], []>} : vector<8x8xbf16>, vector<8x8xbf16>, vector<8x8xf32> -> vector<8x8xf32>
    %c-7_i32_197 = arith.constant -7 : i32
    %632 = vector.broadcast %c-7_i32_197 : i32 to vector<8x8xi32>
    %633 = arith.cmpi sle, %8, %632 : vector<8x8xi32>
    %cst_198 = arith.constant 0.000000e+00 : f32
    %634 = vector.broadcast %cst_198 : f32 to vector<8x8xf32>
    %635 = arith.select %633, %629, %634 : vector<8x8xi1>, vector<8x8xf32>
    %cst_199 = arith.constant dense<0.000000e+00> : vector<8xf32>
    %636 = vector.multi_reduction <add>, %635, %cst_199 [1] : vector<8x8xf32> to vector<8xf32>
    %637 = vector.shape_cast %636 : vector<8xf32> to vector<8x1xf32>
    %c-6_i32_200 = arith.constant -6 : i32
    %638 = vector.broadcast %c-6_i32_200 : i32 to vector<8x8xi32>
    %639 = arith.cmpi eq, %8, %638 : vector<8x8xi32>
    %cst_201 = arith.constant 0.000000e+00 : f32
    %640 = vector.broadcast %cst_201 : f32 to vector<8x8xf32>
    %641 = arith.select %639, %629, %640 : vector<8x8xi1>, vector<8x8xf32>
    %cst_202 = arith.constant dense<0.000000e+00> : vector<8xf32>
    %642 = vector.multi_reduction <add>, %641, %cst_202 [1] : vector<8x8xf32> to vector<8xf32>
    %643 = vector.shape_cast %642 : vector<8xf32> to vector<8x1xf32>
    %c-5_i32_203 = arith.constant -5 : i32
    %644 = vector.broadcast %c-5_i32_203 : i32 to vector<8x8xi32>
    %645 = arith.cmpi eq, %8, %644 : vector<8x8xi32>
    %cst_204 = arith.constant 0.000000e+00 : f32
    %646 = vector.broadcast %cst_204 : f32 to vector<8x8xf32>
    %647 = arith.select %645, %629, %646 : vector<8x8xi1>, vector<8x8xf32>
    %cst_205 = arith.constant dense<0.000000e+00> : vector<8xf32>
    %648 = vector.multi_reduction <add>, %647, %cst_205 [1] : vector<8x8xf32> to vector<8xf32>
    %649 = vector.shape_cast %648 : vector<8xf32> to vector<8x1xf32>
    %c-4_i32_206 = arith.constant -4 : i32
    %650 = vector.broadcast %c-4_i32_206 : i32 to vector<8x8xi32>
    %651 = arith.cmpi eq, %8, %650 : vector<8x8xi32>
    %cst_207 = arith.constant 0.000000e+00 : f32
    %652 = vector.broadcast %cst_207 : f32 to vector<8x8xf32>
    %653 = arith.select %651, %629, %652 : vector<8x8xi1>, vector<8x8xf32>
    %cst_208 = arith.constant dense<0.000000e+00> : vector<8xf32>
    %654 = vector.multi_reduction <add>, %653, %cst_208 [1] : vector<8x8xf32> to vector<8xf32>
    %655 = vector.shape_cast %654 : vector<8xf32> to vector<8x1xf32>
    %c-3_i32_209 = arith.constant -3 : i32
    %656 = vector.broadcast %c-3_i32_209 : i32 to vector<8x8xi32>
    %657 = arith.cmpi eq, %8, %656 : vector<8x8xi32>
    %cst_210 = arith.constant 0.000000e+00 : f32
    %658 = vector.broadcast %cst_210 : f32 to vector<8x8xf32>
    %659 = arith.select %657, %629, %658 : vector<8x8xi1>, vector<8x8xf32>
    %cst_211 = arith.constant dense<0.000000e+00> : vector<8xf32>
    %660 = vector.multi_reduction <add>, %659, %cst_211 [1] : vector<8x8xf32> to vector<8xf32>
    %661 = vector.shape_cast %660 : vector<8xf32> to vector<8x1xf32>
    %c-2_i32_212 = arith.constant -2 : i32
    %662 = vector.broadcast %c-2_i32_212 : i32 to vector<8x8xi32>
    %663 = arith.cmpi eq, %8, %662 : vector<8x8xi32>
    %cst_213 = arith.constant 0.000000e+00 : f32
    %664 = vector.broadcast %cst_213 : f32 to vector<8x8xf32>
    %665 = arith.select %663, %629, %664 : vector<8x8xi1>, vector<8x8xf32>
    %cst_214 = arith.constant dense<0.000000e+00> : vector<8xf32>
    %666 = vector.multi_reduction <add>, %665, %cst_214 [1] : vector<8x8xf32> to vector<8xf32>
    %667 = vector.shape_cast %666 : vector<8xf32> to vector<8x1xf32>
    %c-1_i32_215 = arith.constant -1 : i32
    %668 = vector.broadcast %c-1_i32_215 : i32 to vector<8x8xi32>
    %669 = arith.cmpi eq, %8, %668 : vector<8x8xi32>
    %cst_216 = arith.constant 0.000000e+00 : f32
    %670 = vector.broadcast %cst_216 : f32 to vector<8x8xf32>
    %671 = arith.select %669, %629, %670 : vector<8x8xi1>, vector<8x8xf32>
    %cst_217 = arith.constant dense<0.000000e+00> : vector<8xf32>
    %672 = vector.multi_reduction <add>, %671, %cst_217 [1] : vector<8x8xf32> to vector<8xf32>
    %673 = vector.shape_cast %672 : vector<8xf32> to vector<8x1xf32>
    %c0_i32_218 = arith.constant 0 : i32
    %674 = vector.broadcast %c0_i32_218 : i32 to vector<8x8xi32>
    %675 = arith.cmpi eq, %8, %674 : vector<8x8xi32>
    %cst_219 = arith.constant 0.000000e+00 : f32
    %676 = vector.broadcast %cst_219 : f32 to vector<8x8xf32>
    %677 = arith.select %675, %629, %676 : vector<8x8xi1>, vector<8x8xf32>
    %cst_220 = arith.constant dense<0.000000e+00> : vector<8xf32>
    %678 = vector.multi_reduction <add>, %677, %cst_220 [1] : vector<8x8xf32> to vector<8xf32>
    %679 = vector.shape_cast %678 : vector<8xf32> to vector<8x1xf32>
    %c1_i32_221 = arith.constant 1 : i32
    %680 = vector.broadcast %c1_i32_221 : i32 to vector<8x8xi32>
    %681 = arith.cmpi eq, %8, %680 : vector<8x8xi32>
    %cst_222 = arith.constant 0.000000e+00 : f32
    %682 = vector.broadcast %cst_222 : f32 to vector<8x8xf32>
    %683 = arith.select %681, %629, %682 : vector<8x8xi1>, vector<8x8xf32>
    %cst_223 = arith.constant dense<0.000000e+00> : vector<8xf32>
    %684 = vector.multi_reduction <add>, %683, %cst_223 [1] : vector<8x8xf32> to vector<8xf32>
    %685 = vector.shape_cast %684 : vector<8xf32> to vector<8x1xf32>
    %c2_i32_224 = arith.constant 2 : i32
    %686 = vector.broadcast %c2_i32_224 : i32 to vector<8x8xi32>
    %687 = arith.cmpi eq, %8, %686 : vector<8x8xi32>
    %cst_225 = arith.constant 0.000000e+00 : f32
    %688 = vector.broadcast %cst_225 : f32 to vector<8x8xf32>
    %689 = arith.select %687, %629, %688 : vector<8x8xi1>, vector<8x8xf32>
    %cst_226 = arith.constant dense<0.000000e+00> : vector<8xf32>
    %690 = vector.multi_reduction <add>, %689, %cst_226 [1] : vector<8x8xf32> to vector<8xf32>
    %691 = vector.shape_cast %690 : vector<8xf32> to vector<8x1xf32>
    %c3_i32_227 = arith.constant 3 : i32
    %692 = vector.broadcast %c3_i32_227 : i32 to vector<8x8xi32>
    %693 = arith.cmpi eq, %8, %692 : vector<8x8xi32>
    %cst_228 = arith.constant 0.000000e+00 : f32
    %694 = vector.broadcast %cst_228 : f32 to vector<8x8xf32>
    %695 = arith.select %693, %629, %694 : vector<8x8xi1>, vector<8x8xf32>
    %cst_229 = arith.constant dense<0.000000e+00> : vector<8xf32>
    %696 = vector.multi_reduction <add>, %695, %cst_229 [1] : vector<8x8xf32> to vector<8xf32>
    %697 = vector.shape_cast %696 : vector<8xf32> to vector<8x1xf32>
    %c4_i32_230 = arith.constant 4 : i32
    %698 = vector.broadcast %c4_i32_230 : i32 to vector<8x8xi32>
    %699 = arith.cmpi eq, %8, %698 : vector<8x8xi32>
    %cst_231 = arith.constant 0.000000e+00 : f32
    %700 = vector.broadcast %cst_231 : f32 to vector<8x8xf32>
    %701 = arith.select %699, %629, %700 : vector<8x8xi1>, vector<8x8xf32>
    %cst_232 = arith.constant dense<0.000000e+00> : vector<8xf32>
    %702 = vector.multi_reduction <add>, %701, %cst_232 [1] : vector<8x8xf32> to vector<8xf32>
    %703 = vector.shape_cast %702 : vector<8xf32> to vector<8x1xf32>
    %c5_i32_233 = arith.constant 5 : i32
    %704 = vector.broadcast %c5_i32_233 : i32 to vector<8x8xi32>
    %705 = arith.cmpi eq, %8, %704 : vector<8x8xi32>
    %cst_234 = arith.constant 0.000000e+00 : f32
    %706 = vector.broadcast %cst_234 : f32 to vector<8x8xf32>
    %707 = arith.select %705, %629, %706 : vector<8x8xi1>, vector<8x8xf32>
    %cst_235 = arith.constant dense<0.000000e+00> : vector<8xf32>
    %708 = vector.multi_reduction <add>, %707, %cst_235 [1] : vector<8x8xf32> to vector<8xf32>
    %709 = vector.shape_cast %708 : vector<8xf32> to vector<8x1xf32>
    %c6_i32_236 = arith.constant 6 : i32
    %710 = vector.broadcast %c6_i32_236 : i32 to vector<8x8xi32>
    %711 = arith.cmpi eq, %8, %710 : vector<8x8xi32>
    %cst_237 = arith.constant 0.000000e+00 : f32
    %712 = vector.broadcast %cst_237 : f32 to vector<8x8xf32>
    %713 = arith.select %711, %629, %712 : vector<8x8xi1>, vector<8x8xf32>
    %cst_238 = arith.constant dense<0.000000e+00> : vector<8xf32>
    %714 = vector.multi_reduction <add>, %713, %cst_238 [1] : vector<8x8xf32> to vector<8xf32>
    %715 = vector.shape_cast %714 : vector<8xf32> to vector<8x1xf32>
    %c7_i32_239 = arith.constant 7 : i32
    %716 = vector.broadcast %c7_i32_239 : i32 to vector<8x8xi32>
    %717 = arith.cmpi sge, %8, %716 : vector<8x8xi32>
    %cst_240 = arith.constant 0.000000e+00 : f32
    %718 = vector.broadcast %cst_240 : f32 to vector<8x8xf32>
    %719 = arith.select %717, %629, %718 : vector<8x8xi1>, vector<8x8xf32>
    %cst_241 = arith.constant dense<0.000000e+00> : vector<8xf32>
    %720 = vector.multi_reduction <add>, %719, %cst_241 [1] : vector<8x8xf32> to vector<8xf32>
    %721 = vector.shape_cast %720 : vector<8xf32> to vector<8x1xf32>
    %722 = tpu.concatenate %637, %643, %649, %655, %661, %667, %673, %679, %685, %691, %697, %703, %709, %715, %721 in 1 : vector<8x1xf32>, vector<8x1xf32>, vector<8x1xf32>, vector<8x1xf32>, vector<8x1xf32>, vector<8x1xf32>, vector<8x1xf32>, vector<8x1xf32>, vector<8x1xf32>, vector<8x1xf32>, vector<8x1xf32>, vector<8x1xf32>, vector<8x1xf32>, vector<8x1xf32>, vector<8x1xf32> -> vector<8x15xf32>
    %cst_242 = arith.constant dense<0.000000e+00> : vector<8x8xf32>
    %723 = tpu.matmul %722, %5, %cst_242 {dimension_numbers = #tpu.dot_dimension_numbers<[1], [0], [0], [1], [0, 0, 1, 1], [], []>} : vector<8x15xf32>, vector<15x8xf32>, vector<8x8xf32> -> vector<8x8xf32>
    %724 = arith.addf %631, %723 : vector<8x8xf32>
    %725 = arith.truncf %724 : vector<8x8xf32> to vector<8x8xbf16>
    %c0_243 = arith.constant 0 : index
    %c0_244 = arith.constant 0 : index
    %c16 = arith.constant 16 : index
    %726 = vector.load %arg5[%c0_243, %c0_244, %c16] : memref<1x8x32xbf16, #tpu.memory_space<vmem>>, vector<1x8x8xbf16>
    %727 = vector.shape_cast %726 : vector<1x8x8xbf16> to vector<8x8xbf16>
    %728 = vector.shape_cast %725 : vector<8x8xbf16> to vector<1x8x8xbf16>
    tpu.vector_store %arg5[%c0_243, %c0_244, %c16], %728 {strides = array<i32>} : memref<1x8x32xbf16, #tpu.memory_space<vmem>>, vector<1x8x8xbf16>,
    %729 = vector.extract_strided_slice %1 {offsets = [0, 24], sizes = [8, 8], strides = [1, 1]} : vector<8x96xbf16> to vector<8x8xbf16>
    %730 = arith.extf %729 : vector<8x8xbf16> to vector<8x8xf32>
    %cst_245 = arith.constant 0.353553385 : f32
    %731 = vector.broadcast %cst_245 : f32 to vector<8x8xf32>
    %732 = arith.mulf %730, %731 : vector<8x8xf32>
    %733 = arith.truncf %732 : vector<8x8xf32> to vector<8x8xbf16>
    %734 = vector.extract_strided_slice %1 {offsets = [0, 56], sizes = [8, 8], strides = [1, 1]} : vector<8x96xbf16> to vector<8x8xbf16>
    %735 = vector.extract_strided_slice %1 {offsets = [0, 88], sizes = [8, 8], strides = [1, 1]} : vector<8x96xbf16> to vector<8x8xbf16>
    %cst_246 = arith.constant dense<0.000000e+00> : vector<8x8xf32>
    %736 = tpu.matmul %733, %734, %cst_246 {dimension_numbers = #tpu.dot_dimension_numbers<[1], [1], [0], [0], [0, 0, 1, 0], [], []>} : vector<8x8xbf16>, vector<8x8xbf16>, vector<8x8xf32> -> vector<8x8xf32>
    %cst_247 = arith.constant dense<0.000000e+00> : vector<8x15xf32>
    %737 = tpu.matmul %733, %4, %cst_247 {dimension_numbers = #tpu.dot_dimension_numbers<[1], [1], [0], [0], [0, 0, 1, 0], [], []>} : vector<8x8xbf16>, vector<15x8xbf16>, vector<8x15xf32> -> vector<8x15xf32>
    %c-7_i32_248 = arith.constant -7 : i32
    %738 = vector.broadcast %c-7_i32_248 : i32 to vector<8x8xi32>
    %739 = arith.cmpi sle, %8, %738 : vector<8x8xi32>
    %740 = vector.extract_strided_slice %737 {offsets = [0, 0], sizes = [8, 1], strides = [1, 1]} : vector<8x15xf32> to vector<8x1xf32>
    %cst_249 = arith.constant 0.000000e+00 : f32
    %741 = vector.shape_cast %740 : vector<8x1xf32> to vector<8x1xf32>
    %742 = vector.broadcast %741 : vector<8x1xf32> to vector<8x8xf32>
    %743 = vector.broadcast %cst_249 : f32 to vector<8x8xf32>
    %744 = arith.select %739, %742, %743 : vector<8x8xi1>, vector<8x8xf32>
    %745 = arith.addf %736, %744 : vector<8x8xf32>
    %c-6_i32_250 = arith.constant -6 : i32
    %746 = vector.broadcast %c-6_i32_250 : i32 to vector<8x8xi32>
    %747 = arith.cmpi eq, %8, %746 : vector<8x8xi32>
    %748 = vector.extract_strided_slice %737 {offsets = [0, 1], sizes = [8, 1], strides = [1, 1]} : vector<8x15xf32> to vector<8x1xf32>
    %cst_251 = arith.constant 0.000000e+00 : f32
    %749 = vector.shape_cast %748 : vector<8x1xf32> to vector<8x1xf32>
    %750 = vector.broadcast %749 : vector<8x1xf32> to vector<8x8xf32>
    %751 = vector.broadcast %cst_251 : f32 to vector<8x8xf32>
    %752 = arith.select %747, %750, %751 : vector<8x8xi1>, vector<8x8xf32>
    %753 = arith.addf %745, %752 : vector<8x8xf32>
    %c-5_i32_252 = arith.constant -5 : i32
    %754 = vector.broadcast %c-5_i32_252 : i32 to vector<8x8xi32>
    %755 = arith.cmpi eq, %8, %754 : vector<8x8xi32>
    %756 = vector.extract_strided_slice %737 {offsets = [0, 2], sizes = [8, 1], strides = [1, 1]} : vector<8x15xf32> to vector<8x1xf32>
    %cst_253 = arith.constant 0.000000e+00 : f32
    %757 = vector.shape_cast %756 : vector<8x1xf32> to vector<8x1xf32>
    %758 = vector.broadcast %757 : vector<8x1xf32> to vector<8x8xf32>
    %759 = vector.broadcast %cst_253 : f32 to vector<8x8xf32>
    %760 = arith.select %755, %758, %759 : vector<8x8xi1>, vector<8x8xf32>
    %761 = arith.addf %753, %760 : vector<8x8xf32>
    %c-4_i32_254 = arith.constant -4 : i32
    %762 = vector.broadcast %c-4_i32_254 : i32 to vector<8x8xi32>
    %763 = arith.cmpi eq, %8, %762 : vector<8x8xi32>
    %764 = vector.extract_strided_slice %737 {offsets = [0, 3], sizes = [8, 1], strides = [1, 1]} : vector<8x15xf32> to vector<8x1xf32>
    %cst_255 = arith.constant 0.000000e+00 : f32
    %765 = vector.shape_cast %764 : vector<8x1xf32> to vector<8x1xf32>
    %766 = vector.broadcast %765 : vector<8x1xf32> to vector<8x8xf32>
    %767 = vector.broadcast %cst_255 : f32 to vector<8x8xf32>
    %768 = arith.select %763, %766, %767 : vector<8x8xi1>, vector<8x8xf32>
    %769 = arith.addf %761, %768 : vector<8x8xf32>
    %c-3_i32_256 = arith.constant -3 : i32
    %770 = vector.broadcast %c-3_i32_256 : i32 to vector<8x8xi32>
    %771 = arith.cmpi eq, %8, %770 : vector<8x8xi32>
    %772 = vector.extract_strided_slice %737 {offsets = [0, 4], sizes = [8, 1], strides = [1, 1]} : vector<8x15xf32> to vector<8x1xf32>
    %cst_257 = arith.constant 0.000000e+00 : f32
    %773 = vector.shape_cast %772 : vector<8x1xf32> to vector<8x1xf32>
    %774 = vector.broadcast %773 : vector<8x1xf32> to vector<8x8xf32>
    %775 = vector.broadcast %cst_257 : f32 to vector<8x8xf32>
    %776 = arith.select %771, %774, %775 : vector<8x8xi1>, vector<8x8xf32>
    %777 = arith.addf %769, %776 : vector<8x8xf32>
    %c-2_i32_258 = arith.constant -2 : i32
    %778 = vector.broadcast %c-2_i32_258 : i32 to vector<8x8xi32>
    %779 = arith.cmpi eq, %8, %778 : vector<8x8xi32>
    %780 = vector.extract_strided_slice %737 {offsets = [0, 5], sizes = [8, 1], strides = [1, 1]} : vector<8x15xf32> to vector<8x1xf32>
    %cst_259 = arith.constant 0.000000e+00 : f32
    %781 = vector.shape_cast %780 : vector<8x1xf32> to vector<8x1xf32>
    %782 = vector.broadcast %781 : vector<8x1xf32> to vector<8x8xf32>
    %783 = vector.broadcast %cst_259 : f32 to vector<8x8xf32>
    %784 = arith.select %779, %782, %783 : vector<8x8xi1>, vector<8x8xf32>
    %785 = arith.addf %777, %784 : vector<8x8xf32>
    %c-1_i32_260 = arith.constant -1 : i32
    %786 = vector.broadcast %c-1_i32_260 : i32 to vector<8x8xi32>
    %787 = arith.cmpi eq, %8, %786 : vector<8x8xi32>
    %788 = vector.extract_strided_slice %737 {offsets = [0, 6], sizes = [8, 1], strides = [1, 1]} : vector<8x15xf32> to vector<8x1xf32>
    %cst_261 = arith.constant 0.000000e+00 : f32
    %789 = vector.shape_cast %788 : vector<8x1xf32> to vector<8x1xf32>
    %790 = vector.broadcast %789 : vector<8x1xf32> to vector<8x8xf32>
    %791 = vector.broadcast %cst_261 : f32 to vector<8x8xf32>
    %792 = arith.select %787, %790, %791 : vector<8x8xi1>, vector<8x8xf32>
    %793 = arith.addf %785, %792 : vector<8x8xf32>
    %c0_i32_262 = arith.constant 0 : i32
    %794 = vector.broadcast %c0_i32_262 : i32 to vector<8x8xi32>
    %795 = arith.cmpi eq, %8, %794 : vector<8x8xi32>
    %796 = vector.extract_strided_slice %737 {offsets = [0, 7], sizes = [8, 1], strides = [1, 1]} : vector<8x15xf32> to vector<8x1xf32>
    %cst_263 = arith.constant 0.000000e+00 : f32
    %797 = vector.shape_cast %796 : vector<8x1xf32> to vector<8x1xf32>
    %798 = vector.broadcast %797 : vector<8x1xf32> to vector<8x8xf32>
    %799 = vector.broadcast %cst_263 : f32 to vector<8x8xf32>
    %800 = arith.select %795, %798, %799 : vector<8x8xi1>, vector<8x8xf32>
    %801 = arith.addf %793, %800 : vector<8x8xf32>
    %c1_i32_264 = arith.constant 1 : i32
    %802 = vector.broadcast %c1_i32_264 : i32 to vector<8x8xi32>
    %803 = arith.cmpi eq, %8, %802 : vector<8x8xi32>
    %804 = vector.extract_strided_slice %737 {offsets = [0, 8], sizes = [8, 1], strides = [1, 1]} : vector<8x15xf32> to vector<8x1xf32>
    %cst_265 = arith.constant 0.000000e+00 : f32
    %805 = vector.shape_cast %804 : vector<8x1xf32> to vector<8x1xf32>
    %806 = vector.broadcast %805 : vector<8x1xf32> to vector<8x8xf32>
    %807 = vector.broadcast %cst_265 : f32 to vector<8x8xf32>
    %808 = arith.select %803, %806, %807 : vector<8x8xi1>, vector<8x8xf32>
    %809 = arith.addf %801, %808 : vector<8x8xf32>
    %c2_i32_266 = arith.constant 2 : i32
    %810 = vector.broadcast %c2_i32_266 : i32 to vector<8x8xi32>
    %811 = arith.cmpi eq, %8, %810 : vector<8x8xi32>
    %812 = vector.extract_strided_slice %737 {offsets = [0, 9], sizes = [8, 1], strides = [1, 1]} : vector<8x15xf32> to vector<8x1xf32>
    %cst_267 = arith.constant 0.000000e+00 : f32
    %813 = vector.shape_cast %812 : vector<8x1xf32> to vector<8x1xf32>
    %814 = vector.broadcast %813 : vector<8x1xf32> to vector<8x8xf32>
    %815 = vector.broadcast %cst_267 : f32 to vector<8x8xf32>
    %816 = arith.select %811, %814, %815 : vector<8x8xi1>, vector<8x8xf32>
    %817 = arith.addf %809, %816 : vector<8x8xf32>
    %c3_i32_268 = arith.constant 3 : i32
    %818 = vector.broadcast %c3_i32_268 : i32 to vector<8x8xi32>
    %819 = arith.cmpi eq, %8, %818 : vector<8x8xi32>
    %820 = vector.extract_strided_slice %737 {offsets = [0, 10], sizes = [8, 1], strides = [1, 1]} : vector<8x15xf32> to vector<8x1xf32>
    %cst_269 = arith.constant 0.000000e+00 : f32
    %821 = vector.shape_cast %820 : vector<8x1xf32> to vector<8x1xf32>
    %822 = vector.broadcast %821 : vector<8x1xf32> to vector<8x8xf32>
    %823 = vector.broadcast %cst_269 : f32 to vector<8x8xf32>
    %824 = arith.select %819, %822, %823 : vector<8x8xi1>, vector<8x8xf32>
    %825 = arith.addf %817, %824 : vector<8x8xf32>
    %c4_i32_270 = arith.constant 4 : i32
    %826 = vector.broadcast %c4_i32_270 : i32 to vector<8x8xi32>
    %827 = arith.cmpi eq, %8, %826 : vector<8x8xi32>
    %828 = vector.extract_strided_slice %737 {offsets = [0, 11], sizes = [8, 1], strides = [1, 1]} : vector<8x15xf32> to vector<8x1xf32>
    %cst_271 = arith.constant 0.000000e+00 : f32
    %829 = vector.shape_cast %828 : vector<8x1xf32> to vector<8x1xf32>
    %830 = vector.broadcast %829 : vector<8x1xf32> to vector<8x8xf32>
    %831 = vector.broadcast %cst_271 : f32 to vector<8x8xf32>
    %832 = arith.select %827, %830, %831 : vector<8x8xi1>, vector<8x8xf32>
    %833 = arith.addf %825, %832 : vector<8x8xf32>
    %c5_i32_272 = arith.constant 5 : i32
    %834 = vector.broadcast %c5_i32_272 : i32 to vector<8x8xi32>
    %835 = arith.cmpi eq, %8, %834 : vector<8x8xi32>
    %836 = vector.extract_strided_slice %737 {offsets = [0, 12], sizes = [8, 1], strides = [1, 1]} : vector<8x15xf32> to vector<8x1xf32>
    %cst_273 = arith.constant 0.000000e+00 : f32
    %837 = vector.shape_cast %836 : vector<8x1xf32> to vector<8x1xf32>
    %838 = vector.broadcast %837 : vector<8x1xf32> to vector<8x8xf32>
    %839 = vector.broadcast %cst_273 : f32 to vector<8x8xf32>
    %840 = arith.select %835, %838, %839 : vector<8x8xi1>, vector<8x8xf32>
    %841 = arith.addf %833, %840 : vector<8x8xf32>
    %c6_i32_274 = arith.constant 6 : i32
    %842 = vector.broadcast %c6_i32_274 : i32 to vector<8x8xi32>
    %843 = arith.cmpi eq, %8, %842 : vector<8x8xi32>
    %844 = vector.extract_strided_slice %737 {offsets = [0, 13], sizes = [8, 1], strides = [1, 1]} : vector<8x15xf32> to vector<8x1xf32>
    %cst_275 = arith.constant 0.000000e+00 : f32
    %845 = vector.shape_cast %844 : vector<8x1xf32> to vector<8x1xf32>
    %846 = vector.broadcast %845 : vector<8x1xf32> to vector<8x8xf32>
    %847 = vector.broadcast %cst_275 : f32 to vector<8x8xf32>
    %848 = arith.select %843, %846, %847 : vector<8x8xi1>, vector<8x8xf32>
    %849 = arith.addf %841, %848 : vector<8x8xf32>
    %c7_i32_276 = arith.constant 7 : i32
    %850 = vector.broadcast %c7_i32_276 : i32 to vector<8x8xi32>
    %851 = arith.cmpi sge, %8, %850 : vector<8x8xi32>
    %852 = vector.extract_strided_slice %737 {offsets = [0, 14], sizes = [8, 1], strides = [1, 1]} : vector<8x15xf32> to vector<8x1xf32>
    %cst_277 = arith.constant 0.000000e+00 : f32
    %853 = vector.shape_cast %852 : vector<8x1xf32> to vector<8x1xf32>
    %854 = vector.broadcast %853 : vector<8x1xf32> to vector<8x8xf32>
    %855 = vector.broadcast %cst_277 : f32 to vector<8x8xf32>
    %856 = arith.select %851, %854, %855 : vector<8x8xi1>, vector<8x8xf32>
    %857 = arith.addf %849, %856 : vector<8x8xf32>
    %858 = vector.broadcast %3 : vector<1x8xf32> to vector<8x8xf32>
    %859 = arith.addf %857, %858 : vector<8x8xf32>
    %cst_278 = arith.constant dense<0xFF800000> : vector<8xf32>
    %860 = vector.multi_reduction <maximumf>, %859, %cst_278 [1] : vector<8x8xf32> to vector<8xf32>
    %861 = vector.shape_cast %860 : vector<8xf32> to vector<8x1xf32>
    %862 = vector.broadcast %861 : vector<8x1xf32> to vector<8x8xf32>
    %863 = arith.subf %859, %862 : vector<8x8xf32>
    %864 = math.exp %863 : vector<8x8xf32>
    %cst_279 = arith.constant dense<0.000000e+00> : vector<8xf32>
    %865 = vector.multi_reduction <add>, %864, %cst_279 [1] : vector<8x8xf32> to vector<8xf32>
    %866 = vector.shape_cast %865 : vector<8xf32> to vector<8x1xf32>
    %867 = tpu.reciprocal %866 : vector<8x1xf32> -> vector<8x1xf32>
    %868 = vector.broadcast %867 : vector<8x1xf32> to vector<8x8xf32>
    %869 = arith.mulf %864, %868 : vector<8x8xf32>
    %870 = arith.truncf %869 : vector<8x8xf32> to vector<8x8xbf16>
    %cst_280 = arith.constant dense<0.000000e+00> : vector<8x8xf32>
    %871 = tpu.matmul %870, %735, %cst_280 {dimension_numbers = #tpu.dot_dimension_numbers<[1], [0], [0], [1], [0, 0, 1, 1], [], []>} : vector<8x8xbf16>, vector<8x8xbf16>, vector<8x8xf32> -> vector<8x8xf32>
    %c-7_i32_281 = arith.constant -7 : i32
    %872 = vector.broadcast %c-7_i32_281 : i32 to vector<8x8xi32>
    %873 = arith.cmpi sle, %8, %872 : vector<8x8xi32>
    %cst_282 = arith.constant 0.000000e+00 : f32
    %874 = vector.broadcast %cst_282 : f32 to vector<8x8xf32>
    %875 = arith.select %873, %869, %874 : vector<8x8xi1>, vector<8x8xf32>
    %cst_283 = arith.constant dense<0.000000e+00> : vector<8xf32>
    %876 = vector.multi_reduction <add>, %875, %cst_283 [1] : vector<8x8xf32> to vector<8xf32>
    %877 = vector.shape_cast %876 : vector<8xf32> to vector<8x1xf32>
    %c-6_i32_284 = arith.constant -6 : i32
    %878 = vector.broadcast %c-6_i32_284 : i32 to vector<8x8xi32>
    %879 = arith.cmpi eq, %8, %878 : vector<8x8xi32>
    %cst_285 = arith.constant 0.000000e+00 : f32
    %880 = vector.broadcast %cst_285 : f32 to vector<8x8xf32>
    %881 = arith.select %879, %869, %880 : vector<8x8xi1>, vector<8x8xf32>
    %cst_286 = arith.constant dense<0.000000e+00> : vector<8xf32>
    %882 = vector.multi_reduction <add>, %881, %cst_286 [1] : vector<8x8xf32> to vector<8xf32>
    %883 = vector.shape_cast %882 : vector<8xf32> to vector<8x1xf32>
    %c-5_i32_287 = arith.constant -5 : i32
    %884 = vector.broadcast %c-5_i32_287 : i32 to vector<8x8xi32>
    %885 = arith.cmpi eq, %8, %884 : vector<8x8xi32>
    %cst_288 = arith.constant 0.000000e+00 : f32
    %886 = vector.broadcast %cst_288 : f32 to vector<8x8xf32>
    %887 = arith.select %885, %869, %886 : vector<8x8xi1>, vector<8x8xf32>
    %cst_289 = arith.constant dense<0.000000e+00> : vector<8xf32>
    %888 = vector.multi_reduction <add>, %887, %cst_289 [1] : vector<8x8xf32> to vector<8xf32>
    %889 = vector.shape_cast %888 : vector<8xf32> to vector<8x1xf32>
    %c-4_i32_290 = arith.constant -4 : i32
    %890 = vector.broadcast %c-4_i32_290 : i32 to vector<8x8xi32>
    %891 = arith.cmpi eq, %8, %890 : vector<8x8xi32>
    %cst_291 = arith.constant 0.000000e+00 : f32
    %892 = vector.broadcast %cst_291 : f32 to vector<8x8xf32>
    %893 = arith.select %891, %869, %892 : vector<8x8xi1>, vector<8x8xf32>
    %cst_292 = arith.constant dense<0.000000e+00> : vector<8xf32>
    %894 = vector.multi_reduction <add>, %893, %cst_292 [1] : vector<8x8xf32> to vector<8xf32>
    %895 = vector.shape_cast %894 : vector<8xf32> to vector<8x1xf32>
    %c-3_i32_293 = arith.constant -3 : i32
    %896 = vector.broadcast %c-3_i32_293 : i32 to vector<8x8xi32>
    %897 = arith.cmpi eq, %8, %896 : vector<8x8xi32>
    %cst_294 = arith.constant 0.000000e+00 : f32
    %898 = vector.broadcast %cst_294 : f32 to vector<8x8xf32>
    %899 = arith.select %897, %869, %898 : vector<8x8xi1>, vector<8x8xf32>
    %cst_295 = arith.constant dense<0.000000e+00> : vector<8xf32>
    %900 = vector.multi_reduction <add>, %899, %cst_295 [1] : vector<8x8xf32> to vector<8xf32>
    %901 = vector.shape_cast %900 : vector<8xf32> to vector<8x1xf32>
    %c-2_i32_296 = arith.constant -2 : i32
    %902 = vector.broadcast %c-2_i32_296 : i32 to vector<8x8xi32>
    %903 = arith.cmpi eq, %8, %902 : vector<8x8xi32>
    %cst_297 = arith.constant 0.000000e+00 : f32
    %904 = vector.broadcast %cst_297 : f32 to vector<8x8xf32>
    %905 = arith.select %903, %869, %904 : vector<8x8xi1>, vector<8x8xf32>
    %cst_298 = arith.constant dense<0.000000e+00> : vector<8xf32>
    %906 = vector.multi_reduction <add>, %905, %cst_298 [1] : vector<8x8xf32> to vector<8xf32>
    %907 = vector.shape_cast %906 : vector<8xf32> to vector<8x1xf32>
    %c-1_i32_299 = arith.constant -1 : i32
    %908 = vector.broadcast %c-1_i32_299 : i32 to vector<8x8xi32>
    %909 = arith.cmpi eq, %8, %908 : vector<8x8xi32>
    %cst_300 = arith.constant 0.000000e+00 : f32
    %910 = vector.broadcast %cst_300 : f32 to vector<8x8xf32>
    %911 = arith.select %909, %869, %910 : vector<8x8xi1>, vector<8x8xf32>
    %cst_301 = arith.constant dense<0.000000e+00> : vector<8xf32>
    %912 = vector.multi_reduction <add>, %911, %cst_301 [1] : vector<8x8xf32> to vector<8xf32>
    %913 = vector.shape_cast %912 : vector<8xf32> to vector<8x1xf32>
    %c0_i32_302 = arith.constant 0 : i32
    %914 = vector.broadcast %c0_i32_302 : i32 to vector<8x8xi32>
    %915 = arith.cmpi eq, %8, %914 : vector<8x8xi32>
    %cst_303 = arith.constant 0.000000e+00 : f32
    %916 = vector.broadcast %cst_303 : f32 to vector<8x8xf32>
    %917 = arith.select %915, %869, %916 : vector<8x8xi1>, vector<8x8xf32>
    %cst_304 = arith.constant dense<0.000000e+00> : vector<8xf32>
    %918 = vector.multi_reduction <add>, %917, %cst_304 [1] : vector<8x8xf32> to vector<8xf32>
    %919 = vector.shape_cast %918 : vector<8xf32> to vector<8x1xf32>
    %c1_i32_305 = arith.constant 1 : i32
    %920 = vector.broadcast %c1_i32_305 : i32 to vector<8x8xi32>
    %921 = arith.cmpi eq, %8, %920 : vector<8x8xi32>
    %cst_306 = arith.constant 0.000000e+00 : f32
    %922 = vector.broadcast %cst_306 : f32 to vector<8x8xf32>
    %923 = arith.select %921, %869, %922 : vector<8x8xi1>, vector<8x8xf32>
    %cst_307 = arith.constant dense<0.000000e+00> : vector<8xf32>
    %924 = vector.multi_reduction <add>, %923, %cst_307 [1] : vector<8x8xf32> to vector<8xf32>
    %925 = vector.shape_cast %924 : vector<8xf32> to vector<8x1xf32>
    %c2_i32_308 = arith.constant 2 : i32
    %926 = vector.broadcast %c2_i32_308 : i32 to vector<8x8xi32>
    %927 = arith.cmpi eq, %8, %926 : vector<8x8xi32>
    %cst_309 = arith.constant 0.000000e+00 : f32
    %928 = vector.broadcast %cst_309 : f32 to vector<8x8xf32>
    %929 = arith.select %927, %869, %928 : vector<8x8xi1>, vector<8x8xf32>
    %cst_310 = arith.constant dense<0.000000e+00> : vector<8xf32>
    %930 = vector.multi_reduction <add>, %929, %cst_310 [1] : vector<8x8xf32> to vector<8xf32>
    %931 = vector.shape_cast %930 : vector<8xf32> to vector<8x1xf32>
    %c3_i32_311 = arith.constant 3 : i32
    %932 = vector.broadcast %c3_i32_311 : i32 to vector<8x8xi32>
    %933 = arith.cmpi eq, %8, %932 : vector<8x8xi32>
    %cst_312 = arith.constant 0.000000e+00 : f32
    %934 = vector.broadcast %cst_312 : f32 to vector<8x8xf32>
    %935 = arith.select %933, %869, %934 : vector<8x8xi1>, vector<8x8xf32>
    %cst_313 = arith.constant dense<0.000000e+00> : vector<8xf32>
    %936 = vector.multi_reduction <add>, %935, %cst_313 [1] : vector<8x8xf32> to vector<8xf32>
    %937 = vector.shape_cast %936 : vector<8xf32> to vector<8x1xf32>
    %c4_i32_314 = arith.constant 4 : i32
    %938 = vector.broadcast %c4_i32_314 : i32 to vector<8x8xi32>
    %939 = arith.cmpi eq, %8, %938 : vector<8x8xi32>
    %cst_315 = arith.constant 0.000000e+00 : f32
    %940 = vector.broadcast %cst_315 : f32 to vector<8x8xf32>
    %941 = arith.select %939, %869, %940 : vector<8x8xi1>, vector<8x8xf32>
    %cst_316 = arith.constant dense<0.000000e+00> : vector<8xf32>
    %942 = vector.multi_reduction <add>, %941, %cst_316 [1] : vector<8x8xf32> to vector<8xf32>
    %943 = vector.shape_cast %942 : vector<8xf32> to vector<8x1xf32>
    %c5_i32_317 = arith.constant 5 : i32
    %944 = vector.broadcast %c5_i32_317 : i32 to vector<8x8xi32>
    %945 = arith.cmpi eq, %8, %944 : vector<8x8xi32>
    %cst_318 = arith.constant 0.000000e+00 : f32
    %946 = vector.broadcast %cst_318 : f32 to vector<8x8xf32>
    %947 = arith.select %945, %869, %946 : vector<8x8xi1>, vector<8x8xf32>
    %cst_319 = arith.constant dense<0.000000e+00> : vector<8xf32>
    %948 = vector.multi_reduction <add>, %947, %cst_319 [1] : vector<8x8xf32> to vector<8xf32>
    %949 = vector.shape_cast %948 : vector<8xf32> to vector<8x1xf32>
    %c6_i32_320 = arith.constant 6 : i32
    %950 = vector.broadcast %c6_i32_320 : i32 to vector<8x8xi32>
    %951 = arith.cmpi eq, %8, %950 : vector<8x8xi32>
    %cst_321 = arith.constant 0.000000e+00 : f32
    %952 = vector.broadcast %cst_321 : f32 to vector<8x8xf32>
    %953 = arith.select %951, %869, %952 : vector<8x8xi1>, vector<8x8xf32>
    %cst_322 = arith.constant dense<0.000000e+00> : vector<8xf32>
    %954 = vector.multi_reduction <add>, %953, %cst_322 [1] : vector<8x8xf32> to vector<8xf32>
    %955 = vector.shape_cast %954 : vector<8xf32> to vector<8x1xf32>
    %c7_i32_323 = arith.constant 7 : i32
    %956 = vector.broadcast %c7_i32_323 : i32 to vector<8x8xi32>
    %957 = arith.cmpi sge, %8, %956 : vector<8x8xi32>
    %cst_324 = arith.constant 0.000000e+00 : f32
    %958 = vector.broadcast %cst_324 : f32 to vector<8x8xf32>
    %959 = arith.select %957, %869, %958 : vector<8x8xi1>, vector<8x8xf32>
    %cst_325 = arith.constant dense<0.000000e+00> : vector<8xf32>
    %960 = vector.multi_reduction <add>, %959, %cst_325 [1] : vector<8x8xf32> to vector<8xf32>
    %961 = vector.shape_cast %960 : vector<8xf32> to vector<8x1xf32>
    %962 = tpu.concatenate %877, %883, %889, %895, %901, %907, %913, %919, %925, %931, %937, %943, %949, %955, %961 in 1 : vector<8x1xf32>, vector<8x1xf32>, vector<8x1xf32>, vector<8x1xf32>, vector<8x1xf32>, vector<8x1xf32>, vector<8x1xf32>, vector<8x1xf32>, vector<8x1xf32>, vector<8x1xf32>, vector<8x1xf32>, vector<8x1xf32>, vector<8x1xf32>, vector<8x1xf32>, vector<8x1xf32> -> vector<8x15xf32>
    %cst_326 = arith.constant dense<0.000000e+00> : vector<8x8xf32>
    %963 = tpu.matmul %962, %5, %cst_326 {dimension_numbers = #tpu.dot_dimension_numbers<[1], [0], [0], [1], [0, 0, 1, 1], [], []>} : vector<8x15xf32>, vector<15x8xf32>, vector<8x8xf32> -> vector<8x8xf32>
    %964 = arith.addf %871, %963 : vector<8x8xf32>
    %965 = arith.truncf %964 : vector<8x8xf32> to vector<8x8xbf16>
    %c0_327 = arith.constant 0 : index
    %c0_328 = arith.constant 0 : index
    %c24 = arith.constant 24 : index
    %966 = vector.load %arg5[%c0_327, %c0_328, %c24] : memref<1x8x32xbf16, #tpu.memory_space<vmem>>, vector<1x8x8xbf16>
    %967 = vector.shape_cast %966 : vector<1x8x8xbf16> to vector<8x8xbf16>
    %968 = vector.shape_cast %965 : vector<8x8xbf16> to vector<1x8x8xbf16>
    tpu.vector_store %arg5[%c0_327, %c0_328, %c24], %968 {strides = array<i32>} : memref<1x8x32xbf16, #tpu.memory_space<vmem>>, vector<1x8x8xbf16>,
    return
  }
  func.func @transform_0(%arg0: i32) -> (i32, i32, i32) {
    %c0_i32 = arith.constant 0 : i32
    %c0_i32_0 = arith.constant 0 : i32
    %c0_i32_1 = arith.constant 0 : i32
    return %arg0, %c0_i32, %c0_i32_0 : i32, i32, i32
  }
  func.func @transform_1(%arg0: i32) -> (i32, i32, i32) {
    %c0_i32 = arith.constant 0 : i32
    %c0_i32_0 = arith.constant 0 : i32
    %c0_i32_1 = arith.constant 0 : i32
    return %arg0, %c0_i32, %c0_i32_0 : i32, i32, i32
  }
  func.func @transform_2(%arg0: i32) -> (i32, i32) {
    %c0_i32 = arith.constant 0 : i32
    %c0_i32_0 = arith.constant 0 : i32
    %c0_i32_1 = arith.constant 0 : i32
    return %c0_i32, %c0_i32_0 : i32, i32
  }
  func.func @transform_3(%arg0: i32) -> (i32, i32) {
    %c0_i32 = arith.constant 0 : i32
    %c0_i32_0 = arith.constant 0 : i32
    %c0_i32_1 = arith.constant 0 : i32
    return %c0_i32, %c0_i32_0 : i32, i32
  }
  func.func @transform_4(%arg0: i32) -> (i32, i32, i32) {
    %c0_i32 = arith.constant 0 : i32
    %c0_i32_0 = arith.constant 0 : i32
    %c0_i32_1 = arith.constant 0 : i32
    return %arg0, %c0_i32, %c0_i32_0 : i32, i32, i32
  }
}

module attributes {stable_mosaic.version = 11 : i64} {
  func.func @_mask_add_ln_kernel(%arg0: i32, %arg1: memref<16x32xf32, #tpu.memory_space<vmem>>, %arg2: memref<16x32xf32, #tpu.memory_space<vmem>>, %arg3: memref<16x1xf32, #tpu.memory_space<vmem>>, %arg4: memref<1x32xf32, #tpu.memory_space<vmem>>, %arg5: memref<1x32xf32, #tpu.memory_space<vmem>>, %arg6: memref<16x32xf32, #tpu.memory_space<vmem>>) attributes {dimension_semantics = [#tpu.dimension_semantics<parallel>], iteration_bounds = array<i64: 1>, scalar_prefetch = 0 : i64, scratch_operands = 0 : i64, tpu.core_type = #tpu.core_type<tc>, window_params = [{transform_indices = @transform_0, window_bounds = array<i64: 16, 32>}, {transform_indices = @transform_1, window_bounds = array<i64: 16, 32>}, {transform_indices = @transform_2, window_bounds = array<i64: 16, 1>}, {pipeline_mode = #tpu.pipeline_mode<synchronous>, transform_indices = @transform_3, window_bounds = array<i64: 1, 32>}, {pipeline_mode = #tpu.pipeline_mode<synchronous>, transform_indices = @transform_4, window_bounds = array<i64: 1, 32>}, {transform_indices = @transform_5, window_bounds = array<i64: 16, 32>}]} {
    %c0 = arith.constant 0 : index
    %c0_0 = arith.constant 0 : index
    %0 = vector.load %arg3[%c0, %c0_0] : memref<16x1xf32, #tpu.memory_space<vmem>>, vector<16x1xf32>
    %cst = arith.constant 5.000000e-01 : f32
    %1 = vector.broadcast %cst : f32 to vector<16x1xf32>
    %2 = arith.cmpf ogt, %0, %1 : vector<16x1xf32>
    %c0_1 = arith.constant 0 : index
    %c0_2 = arith.constant 0 : index
    %3 = vector.load %arg1[%c0_1, %c0_2] : memref<16x32xf32, #tpu.memory_space<vmem>>, vector<16x32xf32>
    %cst_3 = arith.constant 0.000000e+00 : f32
    %4 = vector.shape_cast %2 : vector<16x1xi1> to vector<16x1xi1>
    %5 = vector.broadcast %4 : vector<16x1xi1> to vector<16x32xi1>
    %6 = vector.broadcast %cst_3 : f32 to vector<16x32xf32>
    %7 = arith.select %5, %6, %3 : vector<16x32xi1>, vector<16x32xf32>
    %c0_4 = arith.constant 0 : index
    %c0_5 = arith.constant 0 : index
    %8 = vector.load %arg2[%c0_4, %c0_5] : memref<16x32xf32, #tpu.memory_space<vmem>>, vector<16x32xf32>
    %9 = arith.addf %7, %8 : vector<16x32xf32>
    %cst_6 = arith.constant dense<0.000000e+00> : vector<16xf32>
    %10 = vector.multi_reduction <add>, %9, %cst_6 [1] : vector<16x32xf32> to vector<16xf32>
    %11 = vector.shape_cast %10 : vector<16xf32> to vector<16x1xf32>
    %cst_7 = arith.constant 3.200000e+01 : f32
    %12 = vector.broadcast %cst_7 : f32 to vector<16x1xf32>
    %13 = arith.divf %11, %12 : vector<16x1xf32>
    %14 = vector.broadcast %13 : vector<16x1xf32> to vector<16x32xf32>
    %15 = arith.subf %9, %14 : vector<16x32xf32>
    %16 = arith.mulf %15, %15 : vector<16x32xf32>
    %cst_8 = arith.constant dense<0.000000e+00> : vector<16xf32>
    %17 = vector.multi_reduction <add>, %16, %cst_8 [1] : vector<16x32xf32> to vector<16xf32>
    %18 = vector.shape_cast %17 : vector<16xf32> to vector<16x1xf32>
    %cst_9 = arith.constant 3.200000e+01 : f32
    %19 = vector.broadcast %cst_9 : f32 to vector<16x1xf32>
    %20 = arith.divf %18, %19 : vector<16x1xf32>
    %21 = vector.broadcast %13 : vector<16x1xf32> to vector<16x32xf32>
    %22 = arith.subf %9, %21 : vector<16x32xf32>
    %cst_10 = arith.constant 9.99999997E-7 : f32
    %23 = vector.broadcast %cst_10 : f32 to vector<16x1xf32>
    %24 = arith.addf %20, %23 : vector<16x1xf32>
    %25 = math.rsqrt %24 : vector<16x1xf32>
    %26 = vector.broadcast %25 : vector<16x1xf32> to vector<16x32xf32>
    %27 = arith.mulf %22, %26 : vector<16x32xf32>
    %c0_11 = arith.constant 0 : index
    %c0_12 = arith.constant 0 : index
    %28 = vector.load %arg4[%c0_11, %c0_12] : memref<1x32xf32, #tpu.memory_space<vmem>>, vector<1x32xf32>
    %29 = vector.broadcast %28 : vector<1x32xf32> to vector<16x32xf32>
    %30 = arith.mulf %27, %29 : vector<16x32xf32>
    %c0_13 = arith.constant 0 : index
    %c0_14 = arith.constant 0 : index
    %31 = vector.load %arg5[%c0_13, %c0_14] : memref<1x32xf32, #tpu.memory_space<vmem>>, vector<1x32xf32>
    %32 = vector.broadcast %31 : vector<1x32xf32> to vector<16x32xf32>
    %33 = arith.addf %30, %32 : vector<16x32xf32>
    %c0_15 = arith.constant 0 : index
    %c0_16 = arith.constant 0 : index
    %34 = vector.load %arg6[%c0_15, %c0_16] : memref<16x32xf32, #tpu.memory_space<vmem>>, vector<16x32xf32>
    tpu.vector_store %arg6[%c0_15, %c0_16], %33 {strides = array<i32>} : memref<16x32xf32, #tpu.memory_space<vmem>>, vector<16x32xf32>,
    return
  }
  func.func @transform_0(%arg0: i32) -> (i32, i32) {
    %c0_i32 = arith.constant 0 : i32
    %c0_i32_0 = arith.constant 0 : i32
    return %arg0, %c0_i32 : i32, i32
  }
  func.func @transform_1(%arg0: i32) -> (i32, i32) {
    %c0_i32 = arith.constant 0 : i32
    %c0_i32_0 = arith.constant 0 : i32
    return %arg0, %c0_i32 : i32, i32
  }
  func.func @transform_2(%arg0: i32) -> (i32, i32) {
    %c0_i32 = arith.constant 0 : i32
    %c0_i32_0 = arith.constant 0 : i32
    return %arg0, %c0_i32 : i32, i32
  }
  func.func @transform_3(%arg0: i32) -> (i32, i32) {
    %c0_i32 = arith.constant 0 : i32
    %c0_i32_0 = arith.constant 0 : i32
    %c0_i32_1 = arith.constant 0 : i32
    return %c0_i32, %c0_i32_0 : i32, i32
  }
  func.func @transform_4(%arg0: i32) -> (i32, i32) {
    %c0_i32 = arith.constant 0 : i32
    %c0_i32_0 = arith.constant 0 : i32
    %c0_i32_1 = arith.constant 0 : i32
    return %c0_i32, %c0_i32_0 : i32, i32
  }
  func.func @transform_5(%arg0: i32) -> (i32, i32) {
    %c0_i32 = arith.constant 0 : i32
    %c0_i32_0 = arith.constant 0 : i32
    return %arg0, %c0_i32 : i32, i32
  }
}

module attributes {stable_mosaic.version = 11 : i64} {
  func.func @_ffn_kernel(%arg0: i32, %arg1: memref<16x32xf32, #tpu.memory_space<vmem>>, %arg2: memref<32x64xbf16, #tpu.memory_space<vmem>>, %arg3: memref<1x64xf32, #tpu.memory_space<vmem>>, %arg4: memref<64x32xbf16, #tpu.memory_space<vmem>>, %arg5: memref<1x32xf32, #tpu.memory_space<vmem>>, %arg6: memref<16x32xf32, #tpu.memory_space<vmem>>) attributes {dimension_semantics = [#tpu.dimension_semantics<parallel>], iteration_bounds = array<i64: 1>, scalar_prefetch = 0 : i64, scratch_operands = 0 : i64, tpu.core_type = #tpu.core_type<tc>, window_params = [{transform_indices = @transform_0, window_bounds = array<i64: 16, 32>}, {pipeline_mode = #tpu.pipeline_mode<synchronous>, transform_indices = @transform_1, window_bounds = array<i64: 32, 64>}, {pipeline_mode = #tpu.pipeline_mode<synchronous>, transform_indices = @transform_2, window_bounds = array<i64: 1, 64>}, {pipeline_mode = #tpu.pipeline_mode<synchronous>, transform_indices = @transform_3, window_bounds = array<i64: 64, 32>}, {pipeline_mode = #tpu.pipeline_mode<synchronous>, transform_indices = @transform_4, window_bounds = array<i64: 1, 32>}, {transform_indices = @transform_5, window_bounds = array<i64: 16, 32>}]} {
    %c0 = arith.constant 0 : index
    %c0_0 = arith.constant 0 : index
    %0 = vector.load %arg1[%c0, %c0_0] : memref<16x32xf32, #tpu.memory_space<vmem>>, vector<16x32xf32>
    %1 = arith.truncf %0 : vector<16x32xf32> to vector<16x32xbf16>
    %c0_1 = arith.constant 0 : index
    %c0_2 = arith.constant 0 : index
    %2 = vector.load %arg2[%c0_1, %c0_2] : memref<32x64xbf16, #tpu.memory_space<vmem>>, vector<32x64xbf16>
    %cst = arith.constant dense<0.000000e+00> : vector<16x64xf32>
    %3 = tpu.matmul %1, %2, %cst {dimension_numbers = #tpu.dot_dimension_numbers<[1], [0], [0], [1], [0, 0, 1, 1], [], []>} : vector<16x32xbf16>, vector<32x64xbf16>, vector<16x64xf32> -> vector<16x64xf32>
    %c0_3 = arith.constant 0 : index
    %c0_4 = arith.constant 0 : index
    %4 = vector.load %arg3[%c0_3, %c0_4] : memref<1x64xf32, #tpu.memory_space<vmem>>, vector<1x64xf32>
    %5 = vector.broadcast %4 : vector<1x64xf32> to vector<16x64xf32>
    %6 = arith.addf %3, %5 : vector<16x64xf32>
    %cst_5 = arith.constant 0.000000e+00 : f32
    %7 = vector.broadcast %cst_5 : f32 to vector<16x64xf32>
    %8 = arith.maximumf %6, %7 : vector<16x64xf32>
    %9 = arith.truncf %8 : vector<16x64xf32> to vector<16x64xbf16>
    %c0_6 = arith.constant 0 : index
    %c0_7 = arith.constant 0 : index
    %10 = vector.load %arg4[%c0_6, %c0_7] : memref<64x32xbf16, #tpu.memory_space<vmem>>, vector<64x32xbf16>
    %cst_8 = arith.constant dense<0.000000e+00> : vector<16x32xf32>
    %11 = tpu.matmul %9, %10, %cst_8 {dimension_numbers = #tpu.dot_dimension_numbers<[1], [0], [0], [1], [0, 0, 1, 1], [], []>} : vector<16x64xbf16>, vector<64x32xbf16>, vector<16x32xf32> -> vector<16x32xf32>
    %c0_9 = arith.constant 0 : index
    %c0_10 = arith.constant 0 : index
    %12 = vector.load %arg5[%c0_9, %c0_10] : memref<1x32xf32, #tpu.memory_space<vmem>>, vector<1x32xf32>
    %13 = vector.broadcast %12 : vector<1x32xf32> to vector<16x32xf32>
    %14 = arith.addf %11, %13 : vector<16x32xf32>
    %c0_11 = arith.constant 0 : index
    %c0_12 = arith.constant 0 : index
    %15 = vector.load %arg6[%c0_11, %c0_12] : memref<16x32xf32, #tpu.memory_space<vmem>>, vector<16x32xf32>
    tpu.vector_store %arg6[%c0_11, %c0_12], %14 {strides = array<i32>} : memref<16x32xf32, #tpu.memory_space<vmem>>, vector<16x32xf32>,
    return
  }
  func.func @transform_0(%arg0: i32) -> (i32, i32) {
    %c0_i32 = arith.constant 0 : i32
    %c0_i32_0 = arith.constant 0 : i32
    return %arg0, %c0_i32 : i32, i32
  }
  func.func @transform_1(%arg0: i32) -> (i32, i32) {
    %c0_i32 = arith.constant 0 : i32
    %c0_i32_0 = arith.constant 0 : i32
    %c0_i32_1 = arith.constant 0 : i32
    return %c0_i32, %c0_i32_0 : i32, i32
  }
  func.func @transform_2(%arg0: i32) -> (i32, i32) {
    %c0_i32 = arith.constant 0 : i32
    %c0_i32_0 = arith.constant 0 : i32
    %c0_i32_1 = arith.constant 0 : i32
    return %c0_i32, %c0_i32_0 : i32, i32
  }
  func.func @transform_3(%arg0: i32) -> (i32, i32) {
    %c0_i32 = arith.constant 0 : i32
    %c0_i32_0 = arith.constant 0 : i32
    %c0_i32_1 = arith.constant 0 : i32
    return %c0_i32, %c0_i32_0 : i32, i32
  }
  func.func @transform_4(%arg0: i32) -> (i32, i32) {
    %c0_i32 = arith.constant 0 : i32
    %c0_i32_0 = arith.constant 0 : i32
    %c0_i32_1 = arith.constant 0 : i32
    return %c0_i32, %c0_i32_0 : i32, i32
  }
  func.func @transform_5(%arg0: i32) -> (i32, i32) {
    %c0_i32 = arith.constant 0 : i32
    %c0_i32_0 = arith.constant 0 : i32
    return %arg0, %c0_i32 : i32, i32
  }
}

</mosaic_0001>

<bundles_post_ra>
// kernel: fwd.6
= control target key start
LH: loop header
LB: loop body
LE: loop exit
PB: predicated region body
PF: predicated region fallthrough
CT: control target
= control target key end

     0   :  { %8 = vsyncpa [#allocation3], 0  ;;  %s164_s12 = smov [#allocation2]   ;;  %s207_s0 = inlined_call_operand.vmem [shape: f32[16,32], index: 0, kind: input, shape index: {}]   ;;  %s208_s1 = inlined_call_operand.hbm [shape: bf16[32,96], index: 1, kind: input, shape index: {}]   ;;  %s209_s2 = inlined_call_operand.vmem [shape: f32[1,96], index: 2, kind: input, shape index: {}]   ;;  %s210_s3 = inlined_call_operand.vmem [shape: bf16[16,96], index: 3, kind: output, shape index: {}]  }
   0x1   :  { %s16_s13 = sshll.u32 %s164_s12, 4  ;;  %s17_s13 = int_to_ptr.vmem [resolvable:$true] %s16_s13 }
   0x2   :  { %s150_s14 = scalar_lea.vmem %s17_s13, 256  ;;  %p155_p1 = scmp.lt.s32.totalorder %s17_s13, %s17_s13 }
   0x3   :  { %p151_p0 = scmp.ne.s32.totalorder %s17_s13, %s150_s14  ;;  %p156_p2 = scmp.lt.s32.totalorder %s150_s14, %s150_s14 }
   0x5   :  { %p157_p3 = por %p156_p2, %p155_p1 }
   0x7   :  { %p158_p4 = pnand %p157_p3, %p151_p0 }
   0x9   :  { %161 = shalt.err (!%p158_p4)
}
   0xa   :  { %s165_s15 = smov 64   ;;  %s166_s16 = smov 4  }
   0xb   :  { %22 = dma.hbm_to_vmem [thread:$0]  %s208_s1, 256, %s17_s13, [#allocation3], %s165_s15, %s165_s15, %s166_s16  }
   0xc   :  { %162 = dma.done.wait [#allocation3], 256  }
   0xd   :  { %163 = vsyncadd [#allocation3], 4294967040  ;;  %v167_v0 = vmov 0.0   ;;  %vm168_vm0 = vmmov 0   ;;  %v140_v1 = vld [vmem:[#allocation2 + $0x8] sm:$0xff]   ;;  %v141_v2 = vld [vmem:[#allocation2] sm:$0xff]  }
   0xe   :  { %127 = vmatprep.subr.bf16.mxu0 %v167_v0  ;;  %131 = vmatprep.mubr.msk.bf16.mxu0 %vm168_vm0, %v167_v0  ;;  %v29_v3 = vld [vmem:[%s207_s0] sm:$0xff]  ;;  %v30_v4 = vld [vmem:[%s207_s0 + $0x8] sm:$0xff]  ;;  %vm55_vm1 = vcmask 261120   ;;  %vm108_vm2 = vcmask 781312  }
   0xf   :  { %128 = vmatpush3.bf16.msra.mxu0 %v140_v1  ;;  %v31_v5 = vpack.c.bf16 %v30_v4, %v29_v3  ;;  %v116_v6 = vld [vmem:[%s209_s2] ss:$0 sm:$0xff] }
  0x10   :  { %129 = vmatprep.subr.bf16.mxu0 %v167_v0 }
  0x13   :  { %130 = vmatpush3.bf16.msra.mxu0 %v141_v2 }
  0x16   :  { %132 = vmatmul.mubr.msk.bf16.vlgmr.msra.gmra.mxu0 %vm55_vm1, %v31_v5 }
  0xd6   :  { %v93_v7 = vpop.f32.mrf.mxu0 }
  0xd7   :  { %v94_v8 = vadd.f32 %v116_v6, %v93_v7 }
  0xd8   :  { %v133_v9 = vpop.f32.mrf.mxu0 }
  0xd9   :  { %v122_v10 = vpack.c.bf16 %v94_v8, %v94_v8 }
  0xda   :  { %v96_v11 = vpop.f32.mrf.mxu0 }
  0xdb   :  { %109 = vst.msk [vmem:[%s210_s3] sm:$0xf] %vm108_vm2, %v122_v10  ;;  %v97_v12 = vadd.f32 %v116_v6, %v96_v11 }
  0xdc   :  { %v134_v13 = vpop.f32.mrf.mxu0 }
  0xdd   :  { %v123_v14 = vpack.c.bf16 %v97_v12, %v97_v12 }
  0xdf   :  { %110 = vst.msk [vmem:[%s210_s3 + $0x4] sm:$0xf] %vm108_vm2, %v123_v14 }
  0xe0   :  { %115 = vsyncpa [#allocation3], 1 }

// kernel: fwd.8
= control target key start
LH: loop header
LB: loop body
LE: loop exit
PB: predicated region body
PF: predicated region fallthrough
CT: control target
= control target key end

     0   :  { %v117_v0 = vmov 0.0   ;;  %vm118_vm0 = vmmov 0   ;;  %vm45_vm1 = vcmask 261120   ;;  %s157_s1 = inlined_call_operand.vmem [shape: bf16[32,32], index: 1, kind: input, shape index: {}]   ;;  %s158_s0 = inlined_call_operand.vmem [shape: bf16[16,32], index: 0, kind: input, shape index: {}]   ;;  %s159_s2 = inlined_call_operand.vmem [shape: f32[1,32], index: 2, kind: input, shape index: {}]   ;;  %s160_s3 = inlined_call_operand.vmem [shape: f32[16,32], index: 3, kind: output, shape index: {}]  }
   0x1   :  { %104 = vmatprep.subr.bf16.mxu0 %v117_v0  ;;  %v114_v1 = vld [vmem:[%s157_s1 + $0x8] sm:$0xff]   ;;  %108 = vmatprep.mubr.msk.bf16.mxu0 %vm118_vm0, %v117_v0  ;;  %v115_v2 = vld [vmem:[%s157_s1] sm:$0xff]  }
   0x2   :  { %105 = vmatpush3.bf16.msra.mxu0 %v114_v1  ;;  %v116_v3 = vld [vmem:[%s158_s0] sm:$0xff]  }
   0x3   :  { %106 = vmatprep.subr.bf16.mxu0 %v117_v0  ;;  %v96_v4 = vld [vmem:[%s159_s2] ss:$0 sm:$0xff] }
   0x6   :  { %107 = vmatpush3.bf16.msra.mxu0 %v115_v2 }
   0x9   :  { %109 = vmatmul.mubr.msk.bf16.vlgmr.msra.gmra.mxu0 %vm45_vm1, %v116_v3 }
  0xc9   :  { %v83_v5 = vpop.f32.mrf.mxu0 }
  0xca   :  { %v84_v6 = vadd.f32 %v96_v4, %v83_v5 }
  0xcb   :  { %v110_v7 = vpop.f32.mrf.mxu0 }
  0xcc   :  { %90 = vst.msk [vmem:[%s160_s3] sm:$0xff] %vm45_vm1, %v84_v6 }
  0xcd   :  { %v86_v8 = vpop.f32.mrf.mxu0 }
  0xce   :  { %v87_v9 = vadd.f32 %v96_v4, %v86_v8 }
  0xcf   :  { %v111_v10 = vpop.f32.mrf.mxu0 }
  0xd0   :  { %91 = vst.msk [vmem:[%s160_s3 + $0x8] sm:$0xff] %vm45_vm1, %v87_v9 }

// kernel: fwd.9
= control target key start
LH: loop header
LB: loop body
LE: loop exit
PB: predicated region body
PF: predicated region fallthrough
CT: control target
= control target key end

     0   :  { %v102_v0 = vmov 0   ;;  %vm42_vm3 = vcmask 261120   ;;  %s169_s2 = inlined_call_operand.vmem [shape: f32[16,1], index: 2, kind: input, shape index: {}]   ;;  %s170_s0 = inlined_call_operand.vmem [shape: f32[16,32], index: 0, kind: input, shape index: {}]   ;;  %s171_s1 = inlined_call_operand.vmem [shape: f32[16,32], index: 1, kind: input, shape index: {}]   ;;  %s172_s3 = inlined_call_operand.vmem [shape: f32[1,32], index: 3, kind: input, shape index: {}]   ;;  %s173_s4 = inlined_call_operand.vmem [shape: f32[1,32], index: 4, kind: input, shape index: {}]   ;;  %s174_s5 = inlined_call_operand.vmem [shape: f32[16,32], index: 5, kind: output, shape index: {}]  }
   0x1   :  { %97 = vset.pattern.permute.xlu0 %v102_v0  ;;  %v20_v1 = vld [vmem:[%s169_s2] sm:$0xff]  ;;  %v21_v2 = vld [vmem:[%s169_s2 + $0x8] sm:$0xff] }
   0x2   :  { %vm22_vm0 = vcmp.gt.f32.partialorder %v20_v1, 0.5  ;;  %vm23_vm1 = vcmp.gt.f32.partialorder %v21_v2, 0.5  ;;  %v24_v5 = vld [vmem:[%s170_s0] sm:$0xff]  ;;  %v25_v9 = vld [vmem:[%s170_s0 + $0x8] sm:$0xff] }
   0x3   :  { %v26_v3 = vsel %vm22_vm0, 1, %v102_v0  ;;  %v27_v4 = vsel %vm23_vm1, 1, %v102_v0  ;;  %v38_v7 = vld [vmem:[%s171_s1] sm:$0xff]  ;;  %v39_v12 = vld [vmem:[%s171_s1 + $0x8] sm:$0xff] }
   0x4   :  { %29 = vperm.xlu0 %97, %v26_v3   ;;  %v94_v34 = vld [vmem:[%s172_s3] ss:$0 sm:$0xff] }
   0x5   :  { %v95_v36 = vld [vmem:[%s173_s4] ss:$0 sm:$0xff] }
   0x8   :  { %32 = vperm.xlu0 %97, %v27_v4  }
  0x7f   :  { %v30_v6 = vpop.permute.xlu0 %29 }
  0x80   :  { %vm34_vm2 = vcmp.eq.s32.totalorder %v30_v6, 1 }
  0x81   :  { %v36_v8 = vsel %vm34_vm2, 0.0, %v24_v5 }
  0x82   :  { %v40_v10 = vadd.f32 %v38_v7, %v36_v8 }
  0x83   :  { %v33_v11 = vpop.permute.xlu0 %32 }
  0x84   :  { %vm35_vm4 = vcmp.eq.s32.totalorder %v33_v11, 1  ;;  %v43_v13 = vsel %vm42_vm3, %v40_v10, 0.0 }
  0x85   :  { %v37_v14 = vsel %vm35_vm4, 0.0, %v25_v9  ;;  %44 = vadd.xlane.f32.xlu1 %v43_v13 }
  0x86   :  { %v41_v15 = vadd.f32 %v39_v12, %v37_v14 }
  0x88   :  { %v46_v16 = vsel %vm42_vm3, %v41_v15, 0.0 }
  0x89   :  { %47 = vadd.xlane.f32.xlu1 %v46_v16 }
 0x10e   :  { %v45_v17 = vpop.xlane.xlu1 %44 }
 0x10f   :  { %v50_v18 = vmul.f32 0.03125, %v45_v17 }
 0x111   :  { %v52_v19 = vsub.f32 %v40_v10, %v50_v18 }
 0x112   :  { %v48_v20 = vpop.xlane.xlu1 %47 }
 0x113   :  { %v51_v21 = vmul.f32 0.03125, %v48_v20  ;;  %v54_v22 = vmul.f32 %v52_v19, %v52_v19 }
 0x115   :  { %v53_v23 = vsub.f32 %v41_v15, %v51_v21  ;;  %v56_v24 = vsel %vm42_vm3, %v54_v22, 0.0 }
 0x116   :  { %57 = vadd.xlane.f32.xlu0 %v56_v24 }
 0x117   :  { %v55_v25 = vmul.f32 %v53_v23, %v53_v23 }
 0x119   :  { %v59_v26 = vsel %vm42_vm3, %v55_v25, 0.0 }
 0x11a   :  { %60 = vadd.xlane.f32.xlu1 %v59_v26 }
 0x19f   :  { %v58_v27 = vpop.xlane.xlu0 %57 }
 0x1a0   :  { %v62_v28 = vmul.f32 0.03125, %v58_v27 }
 0x1a2   :  { %v64_v29 = vadd.f32 1e-06, %v62_v28 }
 0x1a3   :  { %v61_v30 = vpop.xlane.xlu1 %60 }
 0x1a4   :  { %98 = vrsqrt.f32 %v64_v29  ;;  %v63_v31 = vmul.f32 0.03125, %v61_v30 }
 0x1a6   :  { %v65_v32 = vadd.f32 1e-06, %v63_v31 }
 0x1a8   :  { %100 = vrsqrt.f32 %v65_v32 }
 0x1b1   :  { %v99_v33 = vpop.eup %98 }
 0x1b2   :  { %v68_v35 = vmul.f32 %v99_v33, %v52_v19 }
 0x1b4   :  { %v77_v37 = vmul.f32 %v94_v34, %v68_v35 }
 0x1b5   :  { %v101_v38 = vpop.eup %100 }
 0x1b6   :  { %v86_v39 = vadd.f32 %v95_v36, %v77_v37  ;;  %v69_v40 = vmul.f32 %v101_v38, %v53_v23 }
 0x1b8   :  { %88 = vst.msk [vmem:[%s174_s5] sm:$0xff] %vm42_vm3, %v86_v39  ;;  %v78_v41 = vmul.f32 %v94_v34, %v69_v40 }
 0x1ba   :  { %v87_v42 = vadd.f32 %v95_v36, %v78_v41 }
 0x1bc   :  { %89 = vst.msk [vmem:[%s174_s5 + $0x8] sm:$0xff] %vm42_vm3, %v87_v42 }

// kernel: fwd.11
= control target key start
LH: loop header
LB: loop body
LE: loop exit
PB: predicated region body
PF: predicated region fallthrough
CT: control target
= control target key end

     0   :  { %v140_v2 = vmov 0   ;;  %s207_s0 = inlined_call_operand.vmem [shape: f32[16,32], index: 0, kind: input, shape index: {}]   ;;  %s208_s1 = inlined_call_operand.vmem [shape: f32[16,32], index: 1, kind: input, shape index: {}]   ;;  %s209_s2 = inlined_call_operand.vmem [shape: f32[16,1], index: 2, kind: input, shape index: {}]   ;;  %s210_s3 = inlined_call_operand.vmem [shape: f32[1,32], index: 3, kind: input, shape index: {}]   ;;  %s211_s4 = inlined_call_operand.vmem [shape: f32[1,32], index: 4, kind: input, shape index: {}]   ;;  %s212_s5 = inlined_call_operand.hbm [shape: f32[16,32], index: 5, kind: output, shape index: {}]  }
   0x1   :  { %v21_v0 = vld [vmem:[%s209_s2] sm:$0xff]  ;;  %v22_v1 = vld [vmem:[%s209_s2 + $0x8] sm:$0xff]  ;;  %113 = vset.pattern.permute.xlu0 %v140_v2 }
   0x2   :  { %vm23_vm0 = vcmp.gt.f32.partialorder %v21_v0, 0.5  ;;  %vm24_vm1 = vcmp.gt.f32.partialorder %v22_v1, 0.5 }
   0x3   :  { %10 = vsyncpa [#allocation3], 0  ;;  %v27_v3 = vsel %vm23_vm0, 1, %v140_v2  ;;  %v28_v4 = vsel %vm24_vm1, 1, %v140_v2  ;;  %v25_v5 = vld [vmem:[%s207_s0] sm:$0xff]  ;;  %vm43_vm3 = vcmask 261120  }
   0x4   :  { %30 = vperm.xlu0 %113, %v27_v3   ;;  %v39_v7 = vld [vmem:[%s208_s1] sm:$0xff]  ;;  %v26_v9 = vld [vmem:[%s207_s0 + $0x8] sm:$0xff]  ;;  %s141_s6 = smov [#allocation2]  }
   0x5   :  { %v40_v12 = vld [vmem:[%s208_s1 + $0x8] sm:$0xff]  ;;  %v107_v34 = vld [vmem:[%s210_s3] ss:$0 sm:$0xff]  ;;  %s96_s7 = sshll.u32 %s141_s6, 4  ;;  %s97_s7 = int_to_ptr.vmem [resolvable:$true] %s96_s7 }
   0x6   :  { %v108_v36 = vld [vmem:[%s211_s4] ss:$0 sm:$0xff]  ;;  %s118_s8 = scalar_lea.vmem %s97_s7, 256  ;;  %p123_p1 = scmp.lt.s32.totalorder %s97_s7, %s97_s7 }
   0x7   :  { %p119_p0 = scmp.ne.s32.totalorder %s97_s7, %s118_s8  ;;  %p124_p2 = scmp.lt.s32.totalorder %s118_s8, %s118_s8 }
   0x8   :  { %33 = vperm.xlu0 %113, %v28_v4  }
   0x9   :  { %p125_p3 = por %p124_p2, %p123_p1 }
   0xb   :  { %p126_p4 = pnand %p125_p3, %p119_p0 }
  0x7f   :  { %v31_v6 = vpop.permute.xlu0 %30 }
  0x80   :  { %vm35_vm2 = vcmp.eq.s32.totalorder %v31_v6, 1 }
  0x81   :  { %v37_v8 = vsel %vm35_vm2, 0.0, %v25_v5 }
  0x82   :  { %v41_v10 = vadd.f32 %v39_v7, %v37_v8 }
  0x83   :  { %v34_v11 = vpop.permute.xlu0 %33 }
  0x84   :  { %vm36_vm4 = vcmp.eq.s32.totalorder %v34_v11, 1  ;;  %v44_v13 = vsel %vm43_vm3, %v41_v10, 0.0 }
  0x85   :  { %v38_v14 = vsel %vm36_vm4, 0.0, %v26_v9  ;;  %45 = vadd.xlane.f32.xlu1 %v44_v13 }
  0x86   :  { %v42_v15 = vadd.f32 %v40_v12, %v38_v14 }
  0x88   :  { %v47_v16 = vsel %vm43_vm3, %v42_v15, 0.0 }
  0x89   :  { %48 = vadd.xlane.f32.xlu1 %v47_v16 }
 0x10e   :  { %v46_v17 = vpop.xlane.xlu1 %45 }
 0x10f   :  { %v51_v18 = vmul.f32 0.03125, %v46_v17 }
 0x111   :  { %v53_v19 = vsub.f32 %v41_v10, %v51_v18 }
 0x112   :  { %v49_v20 = vpop.xlane.xlu1 %48 }
 0x113   :  { %v52_v21 = vmul.f32 0.03125, %v49_v20  ;;  %v55_v22 = vmul.f32 %v53_v19, %v53_v19 }
 0x115   :  { %v54_v23 = vsub.f32 %v42_v15, %v52_v21  ;;  %v57_v24 = vsel %vm43_vm3, %v55_v22, 0.0 }
 0x116   :  { %58 = vadd.xlane.f32.xlu0 %v57_v24 }
 0x117   :  { %v56_v25 = vmul.f32 %v54_v23, %v54_v23 }
 0x119   :  { %v60_v26 = vsel %vm43_vm3, %v56_v25, 0.0 }
 0x11a   :  { %61 = vadd.xlane.f32.xlu1 %v60_v26 }
 0x19f   :  { %v59_v27 = vpop.xlane.xlu0 %58 }
 0x1a0   :  { %v63_v28 = vmul.f32 0.03125, %v59_v27 }
 0x1a2   :  { %v65_v29 = vadd.f32 1e-06, %v63_v28 }
 0x1a3   :  { %v62_v30 = vpop.xlane.xlu1 %61 }
 0x1a4   :  { %114 = vrsqrt.f32 %v65_v29  ;;  %v64_v31 = vmul.f32 0.03125, %v62_v30 }
 0x1a6   :  { %v66_v32 = vadd.f32 1e-06, %v64_v31 }
 0x1a8   :  { %116 = vrsqrt.f32 %v66_v32 }
 0x1b1   :  { %v115_v33 = vpop.eup %114 }
 0x1b2   :  { %v69_v35 = vmul.f32 %v115_v33, %v53_v19 }
 0x1b4   :  { %v78_v37 = vmul.f32 %v107_v34, %v69_v35 }
 0x1b5   :  { %v117_v38 = vpop.eup %116 }
 0x1b6   :  { %v70_v39 = vmul.f32 %v117_v38, %v54_v23  ;;  %v87_v40 = vadd.f32 %v108_v36, %v78_v37 }
 0x1b8   :  { %v79_v41 = vmul.f32 %v107_v34, %v70_v39  ;;  %89 = vst.msk [vmem:[#allocation2] sm:$0xff] %vm43_vm3, %v87_v40 }
 0x1ba   :  { %v88_v42 = vadd.f32 %v108_v36, %v79_v41 }
 0x1bc   :  { %90 = vst.msk [vmem:[#allocation2 + $0x8] sm:$0xff] %vm43_vm3, %v88_v42 }
 0x1bd   :  { %129 = shalt.err (!%p126_p4)
}
 0x1be   :  { %s142_s3 = smov 128   ;;  %s143_s4 = smov 8  }
 0x1bf   :  { %102 = dma.vmem_to_hbm [thread:$0]  %s97_s7, 256, %s212_s5, [#allocation3], %s142_s3, %s142_s3, %s143_s4  }
 0x1c0   :  { %138 = dma.done.wait [#allocation3], 256  }
 0x1c1   :  { %139 = vsyncadd [#allocation3], 4294967040 }
 0x1c2   :  { %106 = vsyncpa [#allocation3], 1 }

// kernel: fwd.10
= control target key start
LH: loop header
LB: loop body
LE: loop exit
PB: predicated region body
PF: predicated region fallthrough
CT: control target
= control target key end

     0   :  { %v231_v0 = vmov 0.0   ;;  %vm232_vm0 = vmmov 0   ;;  %vm47_vm1 = vcmask 261120   ;;  %vm134_vm2 = vcmask 523264   ;;  %s302_s1 = inlined_call_operand.vmem [shape: bf16[32,64], index: 1, kind: input, shape index: {}]   ;;  %s303_s0 = inlined_call_operand.vmem [shape: f32[16,32], index: 0, kind: input, shape index: {}]   ;;  %s304_s3 = inlined_call_operand.vmem [shape: bf16[64,32], index: 3, kind: input, shape index: {}]   ;;  %s305_s2 = inlined_call_operand.vmem [shape: f32[1,64], index: 2, kind: input, shape index: {}]   ;;  %s306_s4 = inlined_call_operand.vmem [shape: f32[1,32], index: 4, kind: input, shape index: {}]   ;;  %s307_s5 = inlined_call_operand.vmem [shape: f32[16,32], index: 5, kind: output, shape index: {}]  }
   0x1   :  { %203 = vmatprep.subr.bf16.mxu0 %v231_v0  ;;  %v225_v1 = vld [vmem:[%s302_s1 + $0x8] sm:$0xff]   ;;  %207 = vmatprep.mubr.msk.bf16.mxu0 %vm232_vm0, %v231_v0  ;;  %v226_v2 = vld [vmem:[%s302_s1] sm:$0xff]   ;;  %v227_v5 = vld [vmem:[%s304_s3 + $0x18] sm:$0xff]  }
   0x2   :  { %211 = vmatprep.subr.bf16.mxu1 %v231_v0  ;;  %219 = vmatprep.mubr.msk.bf16.mxu1 %vm232_vm0, %v231_v0  ;;  %v21_v3 = vld [vmem:[%s303_s0] sm:$0xff]  ;;  %v22_v4 = vld [vmem:[%s303_s0 + $0x8] sm:$0xff]  ;;  %v228_v7 = vld [vmem:[%s304_s3 + $0x10] sm:$0xff]  }
   0x3   :  { %204 = vmatpush3.bf16.msra.mxu0 %v225_v1  ;;  %v23_v6 = vpack.c.bf16 %v22_v4, %v21_v3  ;;  %212 = vmatpush3.bf16.msra.mxu1 %v227_v5  ;;  %v229_v8 = vld [vmem:[%s304_s3 + $0x8] sm:$0xff]   ;;  %v230_v9 = vld [vmem:[%s304_s3] sm:$0xff]  }
   0x4   :  { %205 = vmatprep.subr.bf16.mxu0 %v231_v0  ;;  %213 = vmatprep.subr.bf16.mxu1 %v231_v0  ;;  %v185_v10 = vld [vmem:[%s305_s2] ss:$0 sm:$0xff] }
   0x5   :  { %v189_v20 = vld [vmem:[%s306_s4] ss:$0 sm:$0xff] }
   0x7   :  { %206 = vmatpush3.bf16.msra.mxu0 %v226_v2  ;;  %214 = vmatpush3.bf16.msra.mxu1 %v228_v7 }
   0x8   :  { %215 = vmatprep.subr.bf16.mxu1 %v231_v0 }
   0xa   :  { %208 = vmatmul.mubr.msk.bf16.vlgmr.msra.gmra.mxu0 %vm47_vm1, %v23_v6 }
   0xb   :  { %216 = vmatpush3.bf16.msra.mxu1 %v229_v8 }
   0xc   :  { %217 = vmatprep.subr.bf16.mxu1 %v231_v0 }
   0xf   :  { %218 = vmatpush3.bf16.msra.mxu1 %v230_v9 }
  0xca   :  { %v85_v11 = vpop.f32.mrf.mxu0 }
  0xcb   :  { %v86_v13 = vadd.f32 %v185_v10, %v85_v11 }
  0xcc   :  { %v209_v12 = vpop.f32.mrf.mxu0 }
  0xcd   :  { %v92_v17 = vmax.f32 %v86_v13, 0.0 }
  0xce   :  { %v88_v14 = vpop.f32.mrf.mxu0 }
  0xcf   :  { %v89_v15 = vadd.f32 %v185_v10, %v88_v14 }
  0xd0   :  { %v210_v16 = vpop.f32.mrf.mxu0 }
  0xd1   :  { %v93_v18 = vmax.f32 %v89_v15, 0.0 }
  0xd3   :  { %v94_v19 = vpack.c.bf16 %v93_v18, %v92_v17 }
  0xd5   :  { %220 = vmatmul.mubr.msk.bf16.vlgmr.msra.gmra.mxu1 %vm134_vm2, %v94_v19 }
 0x195   :  { %v172_v21 = vpop.f32.mrf.mxu1 }
 0x196   :  { %v173_v22 = vadd.f32 %v189_v20, %v172_v21 }
 0x197   :  { %v221_v23 = vpop.f32.mrf.mxu1 }
 0x198   :  { %179 = vst.msk [vmem:[%s307_s5] sm:$0xff] %vm47_vm1, %v173_v22 }
 0x199   :  { %v175_v24 = vpop.f32.mrf.mxu1 }
 0x19a   :  { %v176_v25 = vadd.f32 %v189_v20, %v175_v24 }
 0x19b   :  { %v222_v26 = vpop.f32.mrf.mxu1 }
 0x19c   :  { %180 = vst.msk [vmem:[%s307_s5 + $0x8] sm:$0xff] %vm47_vm1, %v176_v25 }

// kernel: fwd.7
= control target key start
LH: loop header
LB: loop body
LE: loop exit
PB: predicated region body
PF: predicated region fallthrough
CT: control target
= control target key end

     0   :  { %s2281_s15 = smov 0   ;;  %s2975_s0 = inlined_call_operand.vmem [shape: bf16[2,8,96], index: 0, kind: input, shape index: {}]   ;;  %s2976_s1 = inlined_call_operand.vmem [shape: f32[2,1,8], index: 1, kind: input, shape index: {}]   ;;  %s2977_s2 = inlined_call_operand.vmem [shape: bf16[33,8], index: 2, kind: input, shape index: {}]   ;;  %s2978_s3 = inlined_call_operand.vmem [shape: f32[33,8], index: 3, kind: input, shape index: {}]   ;;  %s2979_s4 = inlined_call_operand.vmem [shape: bf16[2,8,32], index: 4, kind: output, shape index: {}]  }
   0x1 LB: > { %s1924_s16 = sadd.s32 4294967295, %s2223_s15   ;;  %p1928_p0 = scmp.ge.s32.totalorder %s2223_s15, 1  ;;  %s2223_s15 = sphi %s2281_s15, %s14_s15  }
   0x2   : > { %p169_p1 = scmp.lt.s32.totalorder %s2223_s15, 3 }
   0x4   : > { %p170_p2 = pnand %p1928_p0, %p169_p1 }
   0x5   : > { %p196_p3 = scmp.lt.s32.totalorder (!%p170_p2), %s1924_s16, 1  ;;  %s2229_s23 = smov (!%p170_p2), 96  }
   0x6   : > { %173 = sbr.rel (%p170_p2) target bundleno = 3758 (0xeae), region = 36  ;;  %s2243_s5 = smov (!%p170_p2), 120  }
   0x7   : > { %s2244_s6 = smov (!%p170_p2), 88   ;;  %s2245_s7 = smov (!%p170_p2), 64  }
   0x8   : > { %s2246_s11 = smov (!%p170_p2), 112   ;;  %s2247_s12 = smov (!%p170_p2), 80  }
   0x9   : > { %s2248_s13 = smov (!%p170_p2), 56   ;;  %s2249_s14 = smov (!%p170_p2), 104  }
   0xa   : > { %s2251_s17 = smov (!%p170_p2), 48   ;;  %s2252_s18 = smov (!%p170_p2), 40  }
   0xb   : > { %v2198_v0 = vld [vmem:[%s2977_s2 + $0x4] sm:$0xff]   ;;  %v2225_v1 = vmov 0.0   ;;  %vm2980_vm0 = vmmov 0   ;;  %s3105_s16 = smov (!%p196_p3, %s1924_s16), 1  ;;  %vm234_vm1 = vcmask 64512   ;;  %v2227_v6 = vmov 1  }
   0xc   : > { %1998 = vmatprep.subr.bf16.mxu0 %v2225_v1  ;;  %2004 = vmatprep.subr.bf16.mxu1 %v2225_v1  ;;  %v228_v2 = vshrl.u32 %v2198_v0, 16  ;;  %v230_v3 = vshll.u32 %v2198_v0, 16  ;;  %s1929_s19 = sshll.u32 %s3105_s16, 2  ;;  %v2228_v7 = vmov 0   ;;  %v2230_v19 = vmov 2   ;;  %s2392_s26 = scalar_lea.vmem %s2976_s1, %s3105_s16 }
   0xd   : > { %2000 = vmatprep.mubr.msk.bf16.mxu0 %vm2980_vm0, %v2225_v1  ;;  %2006 = vmatprep.mubr.msk.bf16.mxu1 %vm2980_vm0, %v2225_v1  ;;  %s199_s22 = scalar_lea.vmem %s2975_s0, %s1929_s19  ;;  %v2231_v20 = vmov 4   ;;  %v2232_v22 = vmov 3   ;;  %v2233_v23 = vmov 7   ;;  %v2234_v24 = vmov 5   ;;  %s2526_s10 = scalar_lea.vmem %s2979_s4, %s1929_s19 }
   0xe   : > { %v232_v4 = vrot.slane %v230_v3, 1  ;;  %2138 = vset.pattern.permute.xlu1 %v2227_v6  ;;  %2137 = vset.pattern.permute.xlu0 %v2228_v7  ;;  %v208_v8 = vld [vmem:[%s199_s22] sm:$0xf]  ;;  %v2235_v25 = vmov 10   ;;  %v2236_v26 = vmov 6   ;;  %v2237_v27 = vmov 13  }
   0xf   : > { %v219_v10 = vunpack.c.l.bf16 %v208_v8  ;;  %v2311_v11 = vcombine.low %v208_v8, %v208_v8  ;;  %v2238_v28 = vmov 8   ;;  %v2239_v29 = vmov 9   ;;  %s2250_s16 = smov 72   ;;  %s2253_s19 = smov 16  }
  0x10   : > { %v233_v5 = vor.u32 %v232_v4, %v228_v2  ;;  %v2240_v30 = vmov 11   ;;  %v2241_v31 = vmov 12   ;;  %v2242_v32 = vmov 14   ;;  %s2254_s20 = smov 8   ;;  %s2255_s21 = smov 24  }
  0x11   : > { %v220_v12 = vmul.f32 0.35355338, %v219_v10  ;;  %291 = vrot.lane.b32.xlu0 %v2311_v11, %s2229_s23  ;;  %v214_v33 = vlaneseq }
  0x12   : > { %v2309_v9 = vsel %vm234_vm1, %v233_v5, 0 }
  0x13   : > { %1999 = vmatpush3.bf16.xpose.msra.mxu0 %v2309_v9  ;;  %v2316_v13 = vpack.c.bf16 %v220_v12, %v220_v12  ;;  %v215_v34 = vshrl.u32 %v214_v33, 7  ;;  %v217_v35 = vand.u32 127, %v214_v33 }
  0x14   : > { %2010 = vmatprep.subr.mxu0 %v2225_v1 }
  0x15   : > { %v2343_v37 = vsub.s32 %v217_v35, %v215_v34 }
  0x17   : > { %vm281_vm2 = vcmp.le.s32.totalorder %v2343_v37, 4294967289  ;;  %vm336_vm3 = vcmp.eq.s32.totalorder %v2343_v37, 4294967290  ;;  %vm343_vm4 = vcmp.eq.s32.totalorder %v2343_v37, 4294967291  ;;  %vm350_vm5 = vcmp.eq.s32.totalorder %v2343_v37, 4294967292 }
  0x18   : > { %vm357_vm6 = vcmp.eq.s32.totalorder %v2343_v37, 4294967293  ;;  %vm3005_vm7 = vcmp.eq.s32.totalorder %v2343_v37, 4294967294  ;;  %vm3004_vm8 = vcmp.eq.s32.totalorder %v2343_v37, 4294967295  ;;  %vm2996_vm9 = vcmp.eq.s32.totalorder %v2343_v37, 0 }
  0x19   : > { %vm2988_vm10 = vcmp.eq.s32.totalorder %v2343_v37, 1  ;;  %vm2987_vm11 = vcmp.eq.s32.totalorder %v2343_v37, 2  ;;  %vm2986_vm12 = vcmp.eq.s32.totalorder %v2343_v37, 3  ;;  %vm2985_vm13 = vcmp.eq.s32.totalorder %v2343_v37, 4 }
  0x1a   : > { %2001 = vmatmul.mubr.msk.bf16.vlgmr.msra.gmra.mxu0 %vm234_vm1, %v2316_v13  ;;  %vm2984_vm14 = vcmp.eq.s32.totalorder %v2343_v37, 5  ;;  %vm2982_vm15 = vcmp.eq.s32.totalorder %v2343_v37, 6 }
  0x1b   : > { %2014 = vmatprep.mubr.msk.f32.mxu0 %vm2980_vm0, %v2225_v1 }
  0x83   : > { %v292_v14 = vpop.permute.xlu0 %291 }
  0x84   : > { %v294_v15 = vsel %vm234_vm1, %v292_v14, 0 }
  0x85   : > { %2005 = vmatpush3.bf16.xpose.msra.mxu1 %v294_v15 }
  0x86   : > { %2017 = vmatprep.subr.bf16.mxu1 %v2225_v1 }
  0x8c   : > { %2007 = vmatmul.mubr.msk.bf16.vlgmr.msra.gmra.mxu1 %vm234_vm1, %v2316_v13 }
  0x8d   : > { %2019 = vmatprep.mubr.msk.bf16.mxu1 %vm2980_vm0, %v2225_v1  ;;  %vm2983_vm0 = vcmp.ge.s32.totalorder %v2343_v37, 7 }
  0xda   : > { %v275_v16 = vpop.f32.mrf.mxu0 }
  0xdb   : > { %338 = vperm.xlu1 %2138, %v275_v16   ;;  %284 = vperm.xlu0 %2137, %v275_v16  }
  0xdc   : > { %v2002_v17 = vpop.f32.mrf.mxu0 }
  0xde   : > { %v278_v18 = vpop.f32.mrf.mxu0 }
  0xdf   : > { %2139 = vset.pattern.permute.xlu1 %v2230_v19  ;;  %2141 = vset.pattern.permute.xlu0 %v2231_v20 }
  0xe0   : > { %345 = vperm.xlu1 %2139, %v275_v16   ;;  %359 = vperm.xlu0 %2141, %v275_v16   ;;  %v2003_v21 = vpop.f32.mrf.mxu0 }
  0xe4   : > { %2140 = vset.pattern.permute.xlu1 %v2232_v22  ;;  %2144 = vset.pattern.permute.xlu0 %v2233_v23 }
  0xe5   : > { %352 = vperm.xlu1 %2140, %v275_v16   ;;  %380 = vperm.xlu0 %2144, %v275_v16  }
  0xe9   : > { %2142 = vset.pattern.permute.xlu1 %v2234_v24  ;;  %2147 = vset.pattern.permute.xlu0 %v2235_v25 }
  0xea   : > { %366 = vperm.xlu1 %2142, %v275_v16   ;;  %401 = vperm.xlu0 %2147, %v275_v16  }
  0xee   : > { %2143 = vset.pattern.permute.xlu1 %v2236_v26  ;;  %2150 = vset.pattern.permute.xlu0 %v2237_v27 }
  0xef   : > { %373 = vperm.xlu1 %2143, %v275_v16   ;;  %422 = vperm.xlu0 %2150, %v275_v16  }
  0xf3   : > { %2145 = vset.pattern.permute.xlu1 %v2238_v28  ;;  %2153 = vset.pattern.permute.xlu0 %v2227_v6 }
  0xf4   : > { %387 = vperm.xlu1 %2145, %v275_v16  }
  0xf8   : > { %2146 = vset.pattern.permute.xlu1 %v2239_v29 }
  0xf9   : > { %394 = vperm.xlu1 %2146, %v275_v16  }
  0xfd   : > { %2148 = vset.pattern.permute.xlu1 %v2240_v30 }
  0xfe   : > { %408 = vperm.xlu1 %2148, %v275_v16  }
 0x102   : > { %2149 = vset.pattern.permute.xlu1 %v2241_v31 }
 0x103   : > { %415 = vperm.xlu1 %2149, %v275_v16  }
 0x107   : > { %2151 = vset.pattern.permute.xlu1 %v2242_v32 }
 0x108   : > { %429 = vperm.xlu1 %2151, %v275_v16  }
 0x10c   : > { %2152 = vset.pattern.permute.xlu1 %v2228_v7 }
 0x14c   : > { %v330_v36 = vpop.f32.mrf.mxu1 }
 0x14e   : > { %v2008_v38 = vpop.f32.mrf.mxu1 }
 0x150   : > { %v333_v39 = vpop.f32.mrf.mxu1 }
 0x152   : > { %v2009_v40 = vpop.f32.mrf.mxu1 }
 0x156   : > { %v339_v41 = vpop.permute.xlu1 %338  ;;  %v285_v42 = vpop.permute.xlu0 %284 }
 0x157   : > { %v287_v43 = vsel %vm281_vm2, %v285_v42, 0.0  ;;  %v341_v45 = vsel %vm336_vm3, %v339_v41, 0.0  ;;  %v2397_v41 = vld [vmem:[%s2392_s26] ss:$0 sm:$0xff] }
 0x158   : > { %v331_v44 = vadd.f32 %v330_v36, %v287_v43 }
 0x15a   : > { %v342_v47 = vadd.f32 %v341_v45, %v331_v44 }
 0x15b   : > { %v346_v46 = vpop.permute.xlu1 %345  ;;  %v360_v52 = vpop.permute.xlu0 %359 }
 0x15c   : > { %v348_v48 = vsel %vm343_vm4, %v346_v46, 0.0  ;;  %v362_v54 = vsel %vm357_vm6, %v360_v52, 0.0 }
 0x15d   : > { %v349_v49 = vadd.f32 %v348_v48, %v342_v47 }
 0x160   : > { %v353_v50 = vpop.permute.xlu1 %352  ;;  %v381_v61 = vpop.permute.xlu0 %380 }
 0x161   : > { %v355_v51 = vsel %vm350_vm5, %v353_v50, 0.0  ;;  %v383_v63 = vsel %vm2996_vm9, %v381_v61, 0.0 }
 0x162   : > { %v356_v53 = vadd.f32 %v355_v51, %v349_v49 }
 0x164   : > { %v363_v56 = vadd.f32 %v362_v54, %v356_v53 }
 0x165   : > { %v367_v55 = vpop.permute.xlu1 %366  ;;  %v402_v10 = vpop.permute.xlu0 %401 }
 0x166   : > { %v369_v57 = vsel %vm3005_vm7, %v367_v55, 0.0  ;;  %v404_v14 = vsel %vm2986_vm12, %v402_v10, 0.0 }
 0x167   : > { %v370_v58 = vadd.f32 %v369_v57, %v363_v56 }
 0x16a   : > { %v374_v59 = vpop.permute.xlu1 %373  ;;  %v423_v18 = vpop.permute.xlu0 %422 }
 0x16b   : > { %v376_v60 = vsel %vm3004_vm8, %v374_v59, 0.0  ;;  %v425_v36 = vsel %vm2982_vm15, %v423_v18, 0.0 }
 0x16c   : > { %v377_v62 = vadd.f32 %v376_v60, %v370_v58 }
 0x16e   : > { %v384_v2 = vadd.f32 %v383_v63, %v377_v62 }
 0x16f   : > { %v388_v0 = vpop.permute.xlu1 %387 }
 0x170   : > { %v390_v3 = vsel %vm2988_vm10, %v388_v0, 0.0 }
 0x171   : > { %v391_v4 = vadd.f32 %v390_v3, %v384_v2 }
 0x174   : > { %v395_v5 = vpop.permute.xlu1 %394 }
 0x175   : > { %v397_v8 = vsel %vm2987_vm11, %v395_v5, 0.0 }
 0x176   : > { %v398_v12 = vadd.f32 %v397_v8, %v391_v4 }
 0x178   : > { %v405_v16 = vadd.f32 %v404_v14, %v398_v12 }
 0x179   : > { %v409_v15 = vpop.permute.xlu1 %408 }
 0x17a   : > { %v411_v17 = vsel %vm2985_vm13, %v409_v15, 0.0 }
 0x17b   : > { %v412_v21 = vadd.f32 %v411_v17, %v405_v16 }
 0x17e   : > { %v416_v33 = vpop.permute.xlu1 %415 }
 0x17f   : > { %v418_v34 = vsel %vm2984_vm14, %v416_v33, 0.0 }
 0x180   : > { %v419_v35 = vadd.f32 %v418_v34, %v412_v21 }
 0x182   : > { %v426_v38 = vadd.f32 %v425_v36, %v419_v35 }
 0x183   : > { %v430_v39 = vpop.permute.xlu1 %429 }
 0x184   : > { %v432_v40 = vsel %vm2983_vm0, %v430_v39, 0.0  ;;  %v2467_v39 = vld [vmem:[%s2978_s3 + $0x11] sm:$0x7f] }
 0x185   : > { %v433_v42 = vadd.f32 %v432_v40, %v426_v38  ;;  %v2472_v40 = vld [vmem:[%s2978_s3 + $0x9] sm:$0xff] }
 0x187   : > { %v440_v43 = vadd.f32 %v2397_v41, %v433_v42 }
 0x189   : > { %v441_v44 = vsel %vm234_vm1, %v440_v43, -inf }
 0x18a   : > { %442 = vmax.xlane.f32.xlu1 %v441_v44 }
 0x213   : > { %v443_v45 = vpop.xlane.xlu1 %442 }
 0x214   : > { %v444_v46 = vsub.f32 %v440_v43, %v443_v45 }
 0x216   : > { %v445_v47 = vmul.f32 1.442695, %v444_v46 }
 0x218   : > { %2200 = vpow2.f32 %v445_v47 }
 0x225   : > { %v2201_v48 = vpop.eup %2200 }
 0x226   : > { %v447_v49 = vsel %vm234_vm1, %v2201_v48, 0.0 }
 0x227   : > { %448 = vadd.xlane.f32.xlu0 %v447_v49 }
 0x2b0   : > { %v449_v50 = vpop.xlane.xlu0 %448 }
 0x2b1   : > { %2202 = vrcp.f32 %v449_v50 }
 0x2be   : > { %v2203_v51 = vpop.eup %2202 }
 0x2bf   : > { %v2402_v52 = vmul.f32 %v2203_v51, %v2201_v48 }
 0x2c1   : > { %v457_v53 = vsel %vm336_vm3, %v2402_v52, 0.0  ;;  %v453_v54 = vsel %vm281_vm2, %v2402_v52, 0.0  ;;  %v465_v57 = vsel %vm350_vm5, %v2402_v52, 0.0  ;;  %v461_v58 = vsel %vm343_vm4, %v2402_v52, 0.0 }
 0x2c2   : > { %v458_v55 = vsel %vm234_vm1, %v457_v53, 0.0  ;;  %v454_v56 = vsel %vm234_vm1, %v453_v54, 0.0  ;;  %v466_v59 = vsel %vm234_vm1, %v465_v57, 0.0  ;;  %v462_v60 = vsel %vm234_vm1, %v461_v58, 0.0 }
 0x2c3   : > { %459 = vadd.xlane.f32.xlu1 %v458_v55  ;;  %455 = vadd.xlane.f32.xlu0 %v454_v56  ;;  %v473_v61 = vsel %vm3005_vm7, %v2402_v52, 0.0  ;;  %v469_v62 = vsel %vm357_vm6, %v2402_v52, 0.0  ;;  %v481_v2 = vsel %vm2996_vm9, %v2402_v52, 0.0  ;;  %v477_v3 = vsel %vm3004_vm8, %v2402_v52, 0.0 }
 0x2c4   : > { %v474_v63 = vsel %vm234_vm1, %v473_v61, 0.0  ;;  %v470_v0 = vsel %vm234_vm1, %v469_v62, 0.0  ;;  %v482_v4 = vsel %vm234_vm1, %v481_v2, 0.0  ;;  %v478_v5 = vsel %vm234_vm1, %v477_v3, 0.0 }
 0x2c5   : > { %v489_v8 = vsel %vm2987_vm11, %v2402_v52, 0.0  ;;  %v485_v10 = vsel %vm2988_vm10, %v2402_v52, 0.0  ;;  %v497_v15 = vsel %vm2985_vm13, %v2402_v52, 0.0  ;;  %v493_v16 = vsel %vm2986_vm12, %v2402_v52, 0.0 }
 0x2c6   : > { %v490_v12 = vsel %vm234_vm1, %v489_v8, 0.0  ;;  %v486_v14 = vsel %vm234_vm1, %v485_v10, 0.0  ;;  %v498_v17 = vsel %vm234_vm1, %v497_v15, 0.0  ;;  %v494_v18 = vsel %vm234_vm1, %v493_v16, 0.0 }
 0x2c7   : > { %467 = vadd.xlane.f32.xlu1 %v466_v59  ;;  %463 = vadd.xlane.f32.xlu0 %v462_v60  ;;  %v505_v21 = vsel %vm2982_vm15, %v2402_v52, 0.0  ;;  %v501_v33 = vsel %vm2984_vm14, %v2402_v52, 0.0  ;;  %v509_v36 = vsel %vm2983_vm0, %v2402_v52, 0.0  ;;  %vm2999_vm15 = vcmask 1046528  }
 0x2c8   : > { %v506_v34 = vsel %vm234_vm1, %v505_v21, 0.0  ;;  %v502_v35 = vsel %vm234_vm1, %v501_v33, 0.0  ;;  %v510_v38 = vsel %vm234_vm1, %v509_v36, 0.0  ;;  %2011 = vmatpush3.msk.msra.mxu0 %vm2999_vm15, %v2467_v39  ;;  %vm2989_vm0 = vcmask 7168  }
 0x2c9   : > { %2012 = vmatprep.subr.mxu0 %v2225_v1  ;;  %vm2990_vm14 = vcmask 15360   ;;  %vm2991_vm13 = vcmask 23552   ;;  %vm2992_vm12 = vcmask 31744   ;;  %vm2993_vm11 = vcmask 39936  }
 0x2ca   : > { %2013 = vmatpush3.msra.mxu0 %v2472_v40  ;;  %vm2995_vm10 = vcmask 48128   ;;  %vm3001_vm9 = vcmask 121856   ;;  %v452_v21 = vpack.c.bf16 %v2402_v52, %v2402_v52 }
 0x2cb   : > { %475 = vadd.xlane.f32.xlu1 %v474_v63  ;;  %471 = vadd.xlane.f32.xlu0 %v470_v0 }
 0x2cc   : > { %2023 = vmatprep.subr.bf16.mxu0 %v2225_v1 }
 0x2cf   : > { %483 = vadd.xlane.f32.xlu1 %v482_v4  ;;  %479 = vadd.xlane.f32.xlu0 %v478_v5 }
 0x2d3   : > { %491 = vadd.xlane.f32.xlu1 %v490_v12  ;;  %487 = vadd.xlane.f32.xlu0 %v486_v14 }
 0x2d7   : > { %499 = vadd.xlane.f32.xlu1 %v498_v17  ;;  %495 = vadd.xlane.f32.xlu0 %v494_v18 }
 0x2db   : > { %507 = vadd.xlane.f32.xlu1 %v506_v34  ;;  %503 = vadd.xlane.f32.xlu0 %v502_v35 }
 0x2df   : > { %511 = vadd.xlane.f32.xlu0 %v510_v38 }
 0x2ec   : > { %671 = vrot.lane.b32.xlu1 %v2316_v13, %s2243_s5 }
 0x2f0   : > { %722 = vrot.lane.b32.xlu1 %v2311_v11, %s2244_s6 }
 0x2f5   : > { %618 = vrot.lane.b32.xlu0 %v2311_v11, %s2245_s7 }
 0x34c   : > { %v460_v42 = vpop.xlane.xlu1 %459  ;;  %v456_v43 = vpop.xlane.xlu0 %455 }
 0x34d   : > { %v514_v44 = vsel %vm2989_vm0, %v456_v43, %v460_v42  ;;  %vm2994_vm0 = vcmask 56320  }
 0x350   : > { %v468_v45 = vpop.xlane.xlu1 %467  ;;  %v464_v46 = vpop.xlane.xlu0 %463 }
 0x351   : > { %v516_v47 = vsel %vm2990_vm14, %v514_v44, %v464_v46  ;;  %vm2998_vm14 = vcmask 72704  }
 0x352   : > { %v518_v49 = vsel %vm2991_vm13, %v516_v47, %v468_v45  ;;  %vm2997_vm13 = vcmask 80896  }
 0x354   : > { %v476_v48 = vpop.xlane.xlu1 %475  ;;  %v472_v50 = vpop.xlane.xlu0 %471 }
 0x355   : > { %v520_v51 = vsel %vm2992_vm12, %v518_v49, %v472_v50  ;;  %vm532_vm12 = vcmask 89088  }
 0x356   : > { %v522_v54 = vsel %vm2993_vm11, %v520_v51, %v476_v48  ;;  %vm534_vm11 = vcmask 97280  }
 0x358   : > { %v484_v53 = vpop.xlane.xlu1 %483  ;;  %v480_v55 = vpop.xlane.xlu0 %479 }
 0x359   : > { %v524_v56 = vsel %vm2995_vm10, %v522_v54, %v480_v55  ;;  %vm3002_vm10 = vcmask 113664  }
 0x35a   : > { %v526_v58 = vsel %vm2994_vm0, %v524_v56, %v484_v53  ;;  %vm3003_vm0 = vcmask 105472  }
 0x35c   : > { %v492_v57 = vpop.xlane.xlu1 %491  ;;  %v488_v59 = vpop.xlane.xlu0 %487 }
 0x35d   : > { %v527_v60 = vsel %vm234_vm1, %v526_v58, %v488_v59 }
 0x35e   : > { %v529_v62 = vsel %vm2998_vm14, %v527_v60, %v492_v57  ;;  %vm3006_vm14 = vmmov 0  }
 0x360   : > { %v500_v61 = vpop.xlane.xlu1 %499  ;;  %v496_v63 = vpop.xlane.xlu0 %495 }
 0x361   : > { %v531_v0 = vsel %vm2997_vm13, %v529_v62, %v496_v63  ;;  %vm3000_vm13 = vcmask 1043456  }
 0x362   : > { %v533_v3 = vsel %vm532_vm12, %v531_v0, %v500_v61 }
 0x364   : > { %v508_v2 = vpop.xlane.xlu1 %507  ;;  %v504_v4 = vpop.xlane.xlu0 %503 }
 0x365   : > { %v535_v5 = vsel %vm534_vm11, %v533_v3, %v504_v4 }
 0x366   : > { %v537_v8 = vsel %vm3003_vm0, %v535_v5, %v508_v2  ;;  %vm3011_vm0 = vcmp.eq.s32.totalorder %v2343_v37, 4 }
 0x368   : > { %v512_v10 = vpop.xlane.xlu0 %511  ;;  %v672_v12 = vpop.permute.xlu1 %671 }
 0x369   : > { %v539_v14 = vsel %vm3002_vm10, %v537_v8, %v512_v10  ;;  %vm3010_vm10 = vcmp.eq.s32.totalorder %v2343_v37, 3 }
 0x36a   : > { %2015 = vmatmul.mubr.msk.f32.vlgmr.msra.gmra.mxu0 %vm3001_vm9, %v539_v14  ;;  %vm3009_vm9 = vcmp.eq.s32.totalorder %v2343_v37, 2 }
 0x36b   : > { %2024 = vmatpush3.bf16.xpose.msra.mxu0 %v2309_v9  ;;  %2025 = vmatprep.mubr.msk.bf16.mxu0 %vm3006_vm14, %v2225_v1 }
 0x36c   : > { %v619_v15 = vpop.permute.xlu0 %618  ;;  %v723_v16 = vpop.permute.xlu1 %722  ;;  %2035 = vmatprep.subr.mxu0 %v2225_v1 }
 0x36d   : > { %v625_v17 = vsel %vm3000_vm13, %v619_v15, 0  ;;  %v725_v18 = vsel %vm234_vm1, %v723_v16, 0  ;;  %vm3008_vm13 = vcmp.eq.s32.totalorder %v2343_v37, 1 }
 0x36e   : > { %2018 = vmatpush3.bf16.msra.mxu1 %v625_v17 }
 0x36f   : > { %2029 = vmatprep.subr.bf16.mxu1 %v2225_v1 }
 0x371   : > { %2020 = vmatmul.mubr.msk.bf16.vlgmr.msra.gmra.mxu1 %vm234_vm1, %v452_v21 }
 0x372   : > { %2026 = vmatmul.mubr.msk.bf16.vlgmr.msra.gmra.mxu0 %vm234_vm1, %v672_v12  ;;  %2030 = vmatpush3.bf16.xpose.msra.mxu1 %v725_v18 }
 0x373   : > { %2031 = vmatprep.mubr.msk.bf16.mxu1 %vm3006_vm14, %v2225_v1  ;;  %2036 = vmatpush3.msk.msra.mxu0 %vm2999_vm15, %v2467_v39  ;;  %vm668_vm15 = vcmask 60416  }
 0x374   : > { %2037 = vmatprep.subr.mxu0 %v2225_v1  ;;  %2039 = vmatprep.mubr.msk.f32.mxu0 %vm3006_vm14, %v2225_v1 }
 0x375   : > { %2038 = vmatpush3.msra.mxu0 %v2472_v40  ;;  %2042 = vmatprep.subr.bf16.mxu1 %v2225_v1 }
 0x376   : > { %2048 = vmatprep.subr.bf16.mxu0 %v2225_v1 }
 0x379   : > { %2032 = vmatmul.mubr.msk.bf16.vlgmr.msra.gmra.mxu1 %vm234_vm1, %v672_v12 }
 0x37a   : > { %2044 = vmatprep.mubr.msk.bf16.mxu1 %vm3006_vm14, %v2225_v1 }
 0x42a   : > { %v614_v52 = vpop.f32.mrf.mxu0 }
 0x42c   : > { %v2016_v33 = vpop.f32.mrf.mxu0 }
 0x431   : > { %v661_v34 = vpop.f32.mrf.mxu1 }
 0x432   : > { %v662_v35 = vadd.f32 %v661_v34, %v614_v52  ;;  %v710_v36 = vpop.f32.mrf.mxu0 }
 0x433   : > { %768 = vperm.xlu0 %2153, %v710_v36   ;;  %718 = vperm.xlu1 %2152, %v710_v36   ;;  %v2021_v38 = vpop.f32.mrf.mxu1 }
 0x434   : > { %v667_v42 = vpack.c.bf16 %v662_v35, %v662_v35  ;;  %v2027_v43 = vpop.f32.mrf.mxu0 }
 0x435   : > { %v664_v44 = vpop.f32.mrf.mxu1 }
 0x436   : > { %669 = vst.msk [vmem:[%s2526_s10] sm:$0xf] %vm668_vm15, %v667_v42  ;;  %v713_v45 = vpop.f32.mrf.mxu0  ;;  %vm3007_vm15 = vcmp.eq.s32.totalorder %v2343_v37, 0 }
 0x437   : > { %2156 = vset.pattern.permute.xlu0 %v2231_v20  ;;  %2154 = vset.pattern.permute.xlu1 %v2230_v19  ;;  %v2022_v46 = vpop.f32.mrf.mxu1 }
 0x438   : > { %786 = vperm.xlu0 %2156, %v710_v36   ;;  %774 = vperm.xlu1 %2154, %v710_v36   ;;  %v2028_v47 = vpop.f32.mrf.mxu0 }
 0x439   : > { %v761_v48 = vpop.f32.mrf.mxu1 }
 0x43b   : > { %v2033_v49 = vpop.f32.mrf.mxu1 }
 0x43c   : > { %2159 = vset.pattern.permute.xlu0 %v2233_v23  ;;  %2155 = vset.pattern.permute.xlu1 %v2232_v22 }
 0x43d   : > { %804 = vperm.xlu0 %2159, %v710_v36   ;;  %780 = vperm.xlu1 %2155, %v710_v36   ;;  %v764_v50 = vpop.f32.mrf.mxu1 }
 0x43f   : > { %v2034_v51 = vpop.f32.mrf.mxu1 }
 0x441   : > { %2162 = vset.pattern.permute.xlu0 %v2235_v25  ;;  %2157 = vset.pattern.permute.xlu1 %v2234_v24 }
 0x442   : > { %822 = vperm.xlu0 %2162, %v710_v36   ;;  %792 = vperm.xlu1 %2157, %v710_v36  }
 0x446   : > { %2165 = vset.pattern.permute.xlu0 %v2237_v27  ;;  %2158 = vset.pattern.permute.xlu1 %v2236_v26 }
 0x447   : > { %840 = vperm.xlu0 %2165, %v710_v36   ;;  %798 = vperm.xlu1 %2158, %v710_v36  }
 0x44b   : > { %2160 = vset.pattern.permute.xlu1 %v2238_v28  ;;  %2168 = vset.pattern.permute.xlu0 %v2227_v6 }
 0x44c   : > { %810 = vperm.xlu1 %2160, %v710_v36  }
 0x450   : > { %2161 = vset.pattern.permute.xlu1 %v2239_v29 }
 0x451   : > { %816 = vperm.xlu1 %2161, %v710_v36  }
 0x455   : > { %2163 = vset.pattern.permute.xlu1 %v2240_v30 }
 0x456   : > { %828 = vperm.xlu1 %2163, %v710_v36  }
 0x45a   : > { %2164 = vset.pattern.permute.xlu1 %v2241_v31 }
 0x45b   : > { %834 = vperm.xlu1 %2164, %v710_v36  }
 0x45f   : > { %2166 = vset.pattern.permute.xlu1 %v2242_v32 }
 0x460   : > { %846 = vperm.xlu1 %2166, %v710_v36  }
 0x464   : > { %2167 = vset.pattern.permute.xlu1 %v2228_v7 }
 0x4ae   : > { %v719_v53 = vpop.permute.xlu1 %718  ;;  %v769_v55 = vpop.permute.xlu0 %768 }
 0x4af   : > { %v721_v54 = vsel %vm281_vm2, %v719_v53, 0.0  ;;  %v771_v57 = vsel %vm336_vm3, %v769_v55, 0.0 }
 0x4b0   : > { %v762_v56 = vadd.f32 %v761_v48, %v721_v54 }
 0x4b2   : > { %v772_v59 = vadd.f32 %v771_v57, %v762_v56 }
 0x4b3   : > { %v775_v58 = vpop.permute.xlu1 %774  ;;  %v787_v0 = vpop.permute.xlu0 %786 }
 0x4b4   : > { %v777_v60 = vsel %vm343_vm4, %v775_v58, 0.0  ;;  %v789_v3 = vsel %vm357_vm6, %v787_v0, 0.0 }
 0x4b5   : > { %v778_v61 = vadd.f32 %v777_v60, %v772_v59 }
 0x4b8   : > { %v781_v62 = vpop.permute.xlu1 %780  ;;  %v805_v15 = vpop.permute.xlu0 %804 }
 0x4b9   : > { %v783_v63 = vsel %vm350_vm5, %v781_v62, 0.0  ;;  %v807_v17 = vsel %vm3007_vm15, %v805_v15, 0.0  ;;  %vm3013_vm15 = vcmp.eq.s32.totalorder %v2343_v37, 6 }
 0x4ba   : > { %v784_v2 = vadd.f32 %v783_v63, %v778_v61 }
 0x4bc   : > { %v790_v5 = vadd.f32 %v789_v3, %v784_v2 }
 0x4bd   : > { %v793_v4 = vpop.permute.xlu1 %792  ;;  %v823_v36 = vpop.permute.xlu0 %822 }
 0x4be   : > { %v795_v8 = vsel %vm3005_vm7, %v793_v4, 0.0  ;;  %v825_v42 = vsel %vm3010_vm10, %v823_v36, 0.0  ;;  %vm3016_vm10 = vcmp.eq.s32.totalorder %v2343_v37, 2 }
 0x4bf   : > { %v796_v10 = vadd.f32 %v795_v8, %v790_v5 }
 0x4c2   : > { %v799_v12 = vpop.permute.xlu1 %798  ;;  %v841_v46 = vpop.permute.xlu0 %840 }
 0x4c3   : > { %v801_v14 = vsel %vm3004_vm8, %v799_v12, 0.0  ;;  %v843_v51 = vsel %vm3013_vm15, %v841_v46, 0.0  ;;  %vm3018_vm15 = vcmp.eq.s32.totalorder %v2343_v37, 4 }
 0x4c4   : > { %v802_v16 = vadd.f32 %v801_v14, %v796_v10 }
 0x4c6   : > { %v808_v21 = vadd.f32 %v807_v17, %v802_v16 }
 0x4c7   : > { %v811_v18 = vpop.permute.xlu1 %810 }
 0x4c8   : > { %v813_v52 = vsel %vm3008_vm13, %v811_v18, 0.0  ;;  %vm3012_vm13 = vcmp.eq.s32.totalorder %v2343_v37, 5 }
 0x4c9   : > { %v814_v33 = vadd.f32 %v813_v52, %v808_v21 }
 0x4cc   : > { %v817_v34 = vpop.permute.xlu1 %816 }
 0x4cd   : > { %v819_v35 = vsel %vm3009_vm9, %v817_v34, 0.0  ;;  %vm3014_vm9 = vcmp.ge.s32.totalorder %v2343_v37, 7 }
 0x4ce   : > { %v820_v38 = vadd.f32 %v819_v35, %v814_v33 }
 0x4d0   : > { %v826_v44 = vadd.f32 %v825_v42, %v820_v38 }
 0x4d1   : > { %v829_v43 = vpop.permute.xlu1 %828 }
 0x4d2   : > { %v831_v45 = vsel %vm3011_vm0, %v829_v43, 0.0  ;;  %vm3015_vm0 = vcmp.eq.s32.totalorder %v2343_v37, 0 }
 0x4d3   : > { %v832_v47 = vadd.f32 %v831_v45, %v826_v44 }
 0x4d6   : > { %v835_v48 = vpop.permute.xlu1 %834 }
 0x4d7   : > { %v837_v49 = vsel %vm3012_vm13, %v835_v48, 0.0  ;;  %vm3017_vm13 = vcmp.eq.s32.totalorder %v2343_v37, 1 }
 0x4d8   : > { %v838_v50 = vadd.f32 %v837_v49, %v832_v47 }
 0x4da   : > { %v844_v53 = vadd.f32 %v843_v51, %v838_v50 }
 0x4db   : > { %v847_v54 = vpop.permute.xlu1 %846 }
 0x4dc   : > { %v849_v55 = vsel %vm3014_vm9, %v847_v54, 0.0  ;;  %vm3019_vm9 = vcmp.eq.s32.totalorder %v2343_v37, 3 }
 0x4dd   : > { %v850_v56 = vadd.f32 %v849_v55, %v844_v53 }
 0x4df   : > { %v851_v57 = vadd.f32 %v2397_v41, %v850_v56 }
 0x4e1   : > { %v852_v58 = vsel %vm234_vm1, %v851_v57, -inf }
 0x4e2   : > { %853 = vmax.xlane.f32.xlu1 %v852_v58 }
 0x56b   : > { %v854_v59 = vpop.xlane.xlu1 %853 }
 0x56c   : > { %v855_v60 = vsub.f32 %v851_v57, %v854_v59 }
 0x56e   : > { %v856_v61 = vmul.f32 1.442695, %v855_v60 }
 0x570   : > { %2204 = vpow2.f32 %v856_v61 }
 0x57d   : > { %v2205_v62 = vpop.eup %2204 }
 0x57e   : > { %v858_v63 = vsel %vm234_vm1, %v2205_v62, 0.0 }
 0x57f   : > { %859 = vadd.xlane.f32.xlu0 %v858_v63 }
 0x608   : > { %v860_v0 = vpop.xlane.xlu0 %859 }
 0x609   : > { %2206 = vrcp.f32 %v860_v0 }
 0x616   : > { %v2207_v2 = vpop.eup %2206 }
 0x617   : > { %v2577_v3 = vmul.f32 %v2207_v2, %v2205_v62 }
 0x619   : > { %v868_v4 = vsel %vm336_vm3, %v2577_v3, 0.0  ;;  %v864_v5 = vsel %vm281_vm2, %v2577_v3, 0.0  ;;  %v876_v12 = vsel %vm350_vm5, %v2577_v3, 0.0  ;;  %v872_v14 = vsel %vm343_vm4, %v2577_v3, 0.0 }
 0x61a   : > { %v869_v8 = vsel %vm234_vm1, %v868_v4, 0.0  ;;  %v865_v10 = vsel %vm234_vm1, %v864_v5, 0.0  ;;  %v877_v15 = vsel %vm234_vm1, %v876_v12, 0.0  ;;  %v873_v16 = vsel %vm234_vm1, %v872_v14, 0.0 }
 0x61b   : > { %870 = vadd.xlane.f32.xlu1 %v869_v8  ;;  %866 = vadd.xlane.f32.xlu0 %v865_v10  ;;  %v884_v17 = vsel %vm3005_vm7, %v2577_v3, 0.0  ;;  %v880_v18 = vsel %vm357_vm6, %v2577_v3, 0.0  ;;  %v892_v33 = vsel %vm3015_vm0, %v2577_v3, 0.0  ;;  %v888_v34 = vsel %vm3004_vm8, %v2577_v3, 0.0 }
 0x61c   : > { %v885_v21 = vsel %vm234_vm1, %v884_v17, 0.0  ;;  %v881_v52 = vsel %vm234_vm1, %v880_v18, 0.0  ;;  %v893_v35 = vsel %vm234_vm1, %v892_v33, 0.0  ;;  %v889_v36 = vsel %vm234_vm1, %v888_v34, 0.0 }
 0x61d   : > { %v900_v38 = vsel %vm3016_vm10, %v2577_v3, 0.0  ;;  %v896_v42 = vsel %vm3017_vm13, %v2577_v3, 0.0  ;;  %v908_v45 = vsel %vm3018_vm15, %v2577_v3, 0.0  ;;  %v904_v46 = vsel %vm3019_vm9, %v2577_v3, 0.0 }
 0x61e   : > { %v901_v43 = vsel %vm234_vm1, %v900_v38, 0.0  ;;  %v897_v44 = vsel %vm234_vm1, %v896_v42, 0.0  ;;  %v909_v47 = vsel %vm234_vm1, %v908_v45, 0.0  ;;  %v905_v48 = vsel %vm234_vm1, %v904_v46, 0.0 }
 0x61f   : > { %878 = vadd.xlane.f32.xlu1 %v877_v15  ;;  %874 = vadd.xlane.f32.xlu0 %v873_v16  ;;  %vm3020_vm0 = vcmp.eq.s32.totalorder %v2343_v37, 6  ;;  %vm3021_vm10 = vcmp.eq.s32.totalorder %v2343_v37, 5  ;;  %vm3022_vm13 = vcmp.ge.s32.totalorder %v2343_v37, 7  ;;  %vm3023_vm15 = vcmask 7168  }
 0x620   : > { %v916_v49 = vsel %vm3020_vm0, %v2577_v3, 0.0  ;;  %v912_v50 = vsel %vm3021_vm10, %v2577_v3, 0.0  ;;  %v920_v54 = vsel %vm3022_vm13, %v2577_v3, 0.0  ;;  %vm3024_vm9 = vcmask 15360  }
 0x621   : > { %v917_v51 = vsel %vm234_vm1, %v916_v49, 0.0  ;;  %v913_v53 = vsel %vm234_vm1, %v912_v50, 0.0  ;;  %v921_v55 = vsel %vm234_vm1, %v920_v54, 0.0  ;;  %vm3025_vm0 = vcmask 23552  }
 0x622   : > { %vm3026_vm10 = vcmask 31744   ;;  %vm3027_vm13 = vcmask 39936   ;;  %vm3028_vm8 = vcmask 48128   ;;  %vm3029_vm7 = vcmask 56320  }
 0x623   : > { %886 = vadd.xlane.f32.xlu1 %v885_v21  ;;  %882 = vadd.xlane.f32.xlu0 %v881_v52  ;;  %v863_v49 = vpack.c.bf16 %v2577_v3, %v2577_v3 }
 0x627   : > { %894 = vadd.xlane.f32.xlu1 %v893_v35  ;;  %890 = vadd.xlane.f32.xlu0 %v889_v36 }
 0x62b   : > { %902 = vadd.xlane.f32.xlu1 %v901_v43  ;;  %898 = vadd.xlane.f32.xlu0 %v897_v44 }
 0x62f   : > { %910 = vadd.xlane.f32.xlu1 %v909_v47  ;;  %906 = vadd.xlane.f32.xlu0 %v905_v48 }
 0x633   : > { %918 = vadd.xlane.f32.xlu1 %v917_v51  ;;  %914 = vadd.xlane.f32.xlu0 %v913_v53 }
 0x637   : > { %922 = vadd.xlane.f32.xlu0 %v921_v55 }
 0x644   : > { %1068 = vrot.lane.b32.xlu1 %v2316_v13, %s2246_s11 }
 0x648   : > { %1119 = vrot.lane.b32.xlu1 %v2311_v11, %s2247_s12 }
 0x64d   : > { %1011 = vrot.lane.b32.xlu0 %v2311_v11, %s2248_s13 }
 0x6a4   : > { %v871_v56 = vpop.xlane.xlu1 %870  ;;  %v867_v57 = vpop.xlane.xlu0 %866 }
 0x6a5   : > { %v924_v58 = vsel %vm3023_vm15, %v867_v57, %v871_v56  ;;  %vm3030_vm15 = vcmask 72704  }
 0x6a8   : > { %v879_v59 = vpop.xlane.xlu1 %878  ;;  %v875_v60 = vpop.xlane.xlu0 %874 }
 0x6a9   : > { %v925_v61 = vsel %vm3024_vm9, %v924_v58, %v875_v60  ;;  %vm3031_vm9 = vcmask 80896  }
 0x6aa   : > { %v926_v63 = vsel %vm3025_vm0, %v925_v61, %v879_v59  ;;  %vm3032_vm0 = vcmask 105472  }
 0x6ac   : > { %v887_v62 = vpop.xlane.xlu1 %886  ;;  %v883_v0 = vpop.xlane.xlu0 %882 }
 0x6ad   : > { %v927_v2 = vsel %vm3026_vm10, %v926_v63, %v883_v0  ;;  %vm3035_vm10 = vcmask 1043456  }
 0x6ae   : > { %v928_v5 = vsel %vm3027_vm13, %v927_v2, %v887_v62  ;;  %vm3036_vm13 = vcmask 1046528  }
 0x6b0   : > { %v895_v4 = vpop.xlane.xlu1 %894  ;;  %v891_v8 = vpop.xlane.xlu0 %890 }
 0x6b1   : > { %v929_v10 = vsel %vm3028_vm8, %v928_v5, %v891_v8  ;;  %vm3034_vm8 = vcmask 121856  }
 0x6b2   : > { %v930_v14 = vsel %vm3029_vm7, %v929_v10, %v895_v4  ;;  %vm3033_vm7 = vcmask 113664  }
 0x6b4   : > { %v903_v12 = vpop.xlane.xlu1 %902  ;;  %v899_v15 = vpop.xlane.xlu0 %898 }
 0x6b5   : > { %v931_v16 = vsel %vm234_vm1, %v930_v14, %v899_v15 }
 0x6b6   : > { %v932_v18 = vsel %vm3030_vm15, %v931_v16, %v903_v12  ;;  %vm3037_vm15 = vcmp.eq.s32.totalorder %v2343_v37, 4294967294 }
 0x6b8   : > { %v911_v17 = vpop.xlane.xlu1 %910  ;;  %v907_v21 = vpop.xlane.xlu0 %906 }
 0x6b9   : > { %v933_v52 = vsel %vm3031_vm9, %v932_v18, %v907_v21  ;;  %vm3038_vm9 = vcmp.eq.s32.totalorder %v2343_v37, 4294967295 }
 0x6ba   : > { %v934_v34 = vsel %vm532_vm12, %v933_v52, %v911_v17 }
 0x6bc   : > { %v919_v33 = vpop.xlane.xlu1 %918  ;;  %v915_v35 = vpop.xlane.xlu0 %914 }
 0x6bd   : > { %v935_v36 = vsel %vm534_vm11, %v934_v34, %v915_v35 }
 0x6be   : > { %v936_v38 = vsel %vm3032_vm0, %v935_v36, %v919_v33  ;;  %vm3039_vm0 = vcmp.eq.s32.totalorder %v2343_v37, 0 }
 0x6c0   : > { %v923_v42 = vpop.xlane.xlu0 %922  ;;  %v1069_v43 = vpop.permute.xlu1 %1068 }
 0x6c1   : > { %v937_v44 = vsel %vm3033_vm7, %v936_v38, %v923_v42  ;;  %vm3040_vm7 = vcmp.eq.s32.totalorder %v2343_v37, 1 }
 0x6c2   : > { %2040 = vmatmul.mubr.msk.f32.vlgmr.msra.gmra.mxu0 %vm3034_vm8, %v937_v44  ;;  %vm3041_vm8 = vcmp.eq.s32.totalorder %v2343_v37, 2 }
 0x6c3   : > { %2049 = vmatpush3.bf16.xpose.msra.mxu0 %v2309_v9  ;;  %2050 = vmatprep.mubr.msk.bf16.mxu0 %vm3006_vm14, %v2225_v1 }
 0x6c4   : > { %v1012_v45 = vpop.permute.xlu0 %1011  ;;  %v1120_v46 = vpop.permute.xlu1 %1119  ;;  %2060 = vmatprep.subr.mxu0 %v2225_v1 }
 0x6c5   : > { %v1017_v47 = vsel %vm3035_vm10, %v1012_v45, 0  ;;  %v1122_v48 = vsel %vm234_vm1, %v1120_v46, 0  ;;  %vm3042_vm10 = vcmp.eq.s32.totalorder %v2343_v37, 3 }
 0x6c6   : > { %2043 = vmatpush3.bf16.msra.mxu1 %v1017_v47 }
 0x6c7   : > { %2054 = vmatprep.subr.bf16.mxu1 %v2225_v1 }
 0x6c9   : > { %2045 = vmatmul.mubr.msk.bf16.vlgmr.msra.gmra.mxu1 %vm234_vm1, %v863_v49 }
 0x6ca   : > { %2051 = vmatmul.mubr.msk.bf16.vlgmr.msra.gmra.mxu0 %vm234_vm1, %v1069_v43  ;;  %2055 = vmatpush3.bf16.xpose.msra.mxu1 %v1122_v48 }
 0x6cb   : > { %2056 = vmatprep.mubr.msk.bf16.mxu1 %vm3006_vm14, %v2225_v1  ;;  %2061 = vmatpush3.msk.msra.mxu0 %vm3036_vm13, %v2467_v39  ;;  %vm3043_vm13 = vcmp.eq.s32.totalorder %v2343_v37, 4 }
 0x6cc   : > { %2062 = vmatprep.subr.mxu0 %v2225_v1  ;;  %2064 = vmatprep.mubr.msk.f32.mxu0 %vm3006_vm14, %v2225_v1 }
 0x6cd   : > { %2063 = vmatpush3.msra.mxu0 %v2472_v40  ;;  %2067 = vmatprep.subr.bf16.mxu1 %v2225_v1 }
 0x6ce   : > { %2073 = vmatprep.subr.bf16.mxu0 %v2225_v1 }
 0x6d1   : > { %2057 = vmatmul.mubr.msk.bf16.vlgmr.msra.gmra.mxu1 %vm234_vm1, %v1069_v43 }
 0x6d2   : > { %2069 = vmatprep.mubr.msk.bf16.mxu1 %vm3006_vm14, %v2225_v1 }
 0x782   : > { %v1007_v3 = vpop.f32.mrf.mxu0 }
 0x784   : > { %v2041_v50 = vpop.f32.mrf.mxu0 }
 0x789   : > { %v1053_v51 = vpop.f32.mrf.mxu1 }
 0x78a   : > { %v2681_v53 = vadd.f32 %v1053_v51, %v1007_v3  ;;  %v1107_v54 = vpop.f32.mrf.mxu0 }
 0x78b   : > { %1165 = vperm.xlu0 %2168, %v1107_v54   ;;  %1115 = vperm.xlu1 %2167, %v1107_v54   ;;  %v2046_v55 = vpop.f32.mrf.mxu1 }
 0x78c   : > { %v2052_v56 = vpop.f32.mrf.mxu0 }
 0x78d   : > { %v1056_v57 = vpop.f32.mrf.mxu1 }
 0x78e   : > { %v1110_v58 = vpop.f32.mrf.mxu0 }
 0x78f   : > { %2171 = vset.pattern.permute.xlu0 %v2231_v20  ;;  %2169 = vset.pattern.permute.xlu1 %v2230_v19  ;;  %v2047_v59 = vpop.f32.mrf.mxu1 }
 0x790   : > { %1183 = vperm.xlu0 %2171, %v1107_v54   ;;  %1171 = vperm.xlu1 %2169, %v1107_v54   ;;  %v2053_v60 = vpop.f32.mrf.mxu0 }
 0x791   : > { %v1158_v61 = vpop.f32.mrf.mxu1 }
 0x793   : > { %v2058_v62 = vpop.f32.mrf.mxu1 }
 0x794   : > { %2174 = vset.pattern.permute.xlu0 %v2233_v23  ;;  %2170 = vset.pattern.permute.xlu1 %v2232_v22 }
 0x795   : > { %1201 = vperm.xlu0 %2174, %v1107_v54   ;;  %1177 = vperm.xlu1 %2170, %v1107_v54   ;;  %v1161_v63 = vpop.f32.mrf.mxu1 }
 0x797   : > { %v2059_v0 = vpop.f32.mrf.mxu1 }
 0x799   : > { %2177 = vset.pattern.permute.xlu0 %v2235_v25  ;;  %2172 = vset.pattern.permute.xlu1 %v2234_v24 }
 0x79a   : > { %1219 = vperm.xlu0 %2177, %v1107_v54   ;;  %1189 = vperm.xlu1 %2172, %v1107_v54  }
 0x79e   : > { %2180 = vset.pattern.permute.xlu0 %v2237_v27  ;;  %2173 = vset.pattern.permute.xlu1 %v2236_v26 }
 0x79f   : > { %1237 = vperm.xlu0 %2180, %v1107_v54   ;;  %1195 = vperm.xlu1 %2173, %v1107_v54  }
 0x7a3   : > { %2175 = vset.pattern.permute.xlu1 %v2238_v28  ;;  %2183 = vset.pattern.permute.xlu0 %v2227_v6 }
 0x7a4   : > { %1207 = vperm.xlu1 %2175, %v1107_v54  }
 0x7a8   : > { %2176 = vset.pattern.permute.xlu1 %v2239_v29 }
 0x7a9   : > { %1213 = vperm.xlu1 %2176, %v1107_v54  }
 0x7ad   : > { %2178 = vset.pattern.permute.xlu1 %v2240_v30 }
 0x7ae   : > { %1225 = vperm.xlu1 %2178, %v1107_v54  }
 0x7b2   : > { %2179 = vset.pattern.permute.xlu1 %v2241_v31 }
 0x7b3   : > { %1231 = vperm.xlu1 %2179, %v1107_v54  }
 0x7b7   : > { %2181 = vset.pattern.permute.xlu1 %v2242_v32 }
 0x7b8   : > { %1243 = vperm.xlu1 %2181, %v1107_v54  }
 0x7bc   : > { %2182 = vset.pattern.permute.xlu1 %v2228_v7 }
 0x806   : > { %v1116_v2 = vpop.permute.xlu1 %1115  ;;  %v1166_v6 = vpop.permute.xlu0 %1165 }
 0x807   : > { %v1118_v4 = vsel %vm281_vm2, %v1116_v2, 0.0  ;;  %v1168_v8 = vsel %vm336_vm3, %v1166_v6, 0.0 }
 0x808   : > { %v1159_v5 = vadd.f32 %v1158_v61, %v1118_v4 }
 0x80a   : > { %v1169_v12 = vadd.f32 %v1168_v8, %v1159_v5 }
 0x80b   : > { %v1172_v10 = vpop.permute.xlu1 %1171  ;;  %v1184_v7 = vpop.permute.xlu0 %1183 }
 0x80c   : > { %v1174_v14 = vsel %vm343_vm4, %v1172_v10, 0.0  ;;  %v1186_v21 = vsel %vm357_vm6, %v1184_v7, 0.0 }
 0x80d   : > { %v1175_v15 = vadd.f32 %v1174_v14, %v1169_v12 }
 0x810   : > { %v1178_v16 = vpop.permute.xlu1 %1177  ;;  %v1202_v42 = vpop.permute.xlu0 %1201 }
 0x811   : > { %v1180_v17 = vsel %vm350_vm5, %v1178_v16, 0.0  ;;  %v1204_v44 = vsel %vm3039_vm0, %v1202_v42, 0.0  ;;  %vm3046_vm0 = vcmp.ge.s32.totalorder %v2343_v37, 7 }
 0x812   : > { %v1181_v18 = vadd.f32 %v1180_v17, %v1175_v15 }
 0x814   : > { %v1187_v33 = vadd.f32 %v1186_v21, %v1181_v18 }
 0x815   : > { %v1190_v52 = vpop.permute.xlu1 %1189  ;;  %v1220_v50 = vpop.permute.xlu0 %1219 }
 0x816   : > { %v1192_v34 = vsel %vm3037_vm15, %v1190_v52, 0.0  ;;  %v1222_v54 = vsel %vm3042_vm10, %v1220_v50, 0.0  ;;  %vm3044_vm15 = vcmp.eq.s32.totalorder %v2343_v37, 5  ;;  %vm3049_vm10 = vcmp.eq.s32.totalorder %v2343_v37, 4294967295 }
 0x817   : > { %v1193_v35 = vadd.f32 %v1192_v34, %v1187_v33 }
 0x81a   : > { %v1196_v36 = vpop.permute.xlu1 %1195  ;;  %v1238_v58 = vpop.permute.xlu0 %1237 }
 0x81b   : > { %v1198_v38 = vsel %vm3038_vm9, %v1196_v36, 0.0  ;;  %vm3045_vm9 = vcmp.eq.s32.totalorder %v2343_v37, 6 }
 0x81c   : > { %v1199_v43 = vadd.f32 %v1198_v38, %v1193_v35  ;;  %v1240_v63 = vsel %vm3045_vm9, %v1238_v58, 0.0  ;;  %vm3052_vm9 = vcmp.eq.s32.totalorder %v2343_v37, 4 }
 0x81e   : > { %v1205_v46 = vadd.f32 %v1204_v44, %v1199_v43 }
 0x81f   : > { %v1208_v45 = vpop.permute.xlu1 %1207 }
 0x820   : > { %v1210_v47 = vsel %vm3040_vm7, %v1208_v45, 0.0  ;;  %vm3047_vm7 = vcmp.eq.s32.totalorder %v2343_v37, 4294967294 }
 0x821   : > { %v1211_v48 = vadd.f32 %v1210_v47, %v1205_v46 }
 0x824   : > { %v1214_v49 = vpop.permute.xlu1 %1213 }
 0x825   : > { %v1216_v3 = vsel %vm3041_vm8, %v1214_v49, 0.0  ;;  %vm3048_vm8 = vcmp.eq.s32.totalorder %v2343_v37, 0 }
 0x826   : > { %v1217_v51 = vadd.f32 %v1216_v3, %v1211_v48 }
 0x828   : > { %v1223_v56 = vadd.f32 %v1222_v54, %v1217_v51 }
 0x829   : > { %v1226_v55 = vpop.permute.xlu1 %1225 }
 0x82a   : > { %v1228_v57 = vsel %vm3043_vm13, %v1226_v55, 0.0  ;;  %vm3050_vm13 = vcmp.eq.s32.totalorder %v2343_v37, 2 }
 0x82b   : > { %v1229_v59 = vadd.f32 %v1228_v57, %v1223_v56 }
 0x82e   : > { %v1232_v60 = vpop.permute.xlu1 %1231 }
 0x82f   : > { %v1234_v61 = vsel %vm3044_vm15, %v1232_v60, 0.0  ;;  %vm3051_vm15 = vcmp.eq.s32.totalorder %v2343_v37, 1 }
 0x830   : > { %v1235_v62 = vadd.f32 %v1234_v61, %v1229_v59 }
 0x832   : > { %v1241_v0 = vadd.f32 %v1240_v63, %v1235_v62 }
 0x833   : > { %v1244_v2 = vpop.permute.xlu1 %1243 }
 0x834   : > { %v1246_v4 = vsel %vm3046_vm0, %v1244_v2, 0.0  ;;  %vm3053_vm0 = vcmp.eq.s32.totalorder %v2343_v37, 3 }
 0x835   : > { %v1247_v6 = vadd.f32 %v1246_v4, %v1241_v0 }
 0x837   : > { %v1248_v5 = vadd.f32 %v2397_v41, %v1247_v6 }
 0x839   : > { %v1249_v8 = vsel %vm234_vm1, %v1248_v5, -inf }
 0x83a   : > { %1250 = vmax.xlane.f32.xlu1 %v1249_v8 }
 0x8c3   : > { %v1251_v10 = vpop.xlane.xlu1 %1250 }
 0x8c4   : > { %v1252_v12 = vsub.f32 %v1248_v5, %v1251_v10 }
 0x8c6   : > { %v1253_v14 = vmul.f32 1.442695, %v1252_v12 }
 0x8c8   : > { %2208 = vpow2.f32 %v1253_v14 }
 0x8d5   : > { %v2209_v15 = vpop.eup %2208 }
 0x8d6   : > { %v1255_v16 = vsel %vm234_vm1, %v2209_v15, 0.0 }
 0x8d7   : > { %1256 = vadd.xlane.f32.xlu0 %v1255_v16 }
 0x960   : > { %v1257_v17 = vpop.xlane.xlu0 %1256 }
 0x961   : > { %2210 = vrcp.f32 %v1257_v17 }
 0x96e   : > { %v2211_v7 = vpop.eup %2210 }
 0x96f   : > { %v2731_v18 = vmul.f32 %v2211_v7, %v2209_v15 }
 0x971   : > { %v1265_v41 = vsel %vm336_vm3, %v2731_v18, 0.0  ;;  %v1261_v21 = vsel %vm281_vm2, %v2731_v18, 0.0  ;;  %v1273_v34 = vsel %vm350_vm5, %v2731_v18, 0.0  ;;  %v1269_v35 = vsel %vm343_vm4, %v2731_v18, 0.0 }
 0x972   : > { %v1266_v52 = vsel %vm234_vm1, %v1265_v41, 0.0  ;;  %v1262_v33 = vsel %vm234_vm1, %v1261_v21, 0.0  ;;  %v1274_v36 = vsel %vm234_vm1, %v1273_v34, 0.0  ;;  %v1270_v38 = vsel %vm234_vm1, %v1269_v35, 0.0 }
 0x973   : > { %1267 = vadd.xlane.f32.xlu1 %v1266_v52  ;;  %1263 = vadd.xlane.f32.xlu0 %v1262_v33  ;;  %v1281_v42 = vsel %vm3047_vm7, %v2731_v18, 0.0  ;;  %v1277_v43 = vsel %vm357_vm6, %v2731_v18, 0.0  ;;  %v1289_v46 = vsel %vm3048_vm8, %v2731_v18, 0.0  ;;  %v1285_v47 = vsel %vm3049_vm10, %v2731_v18, 0.0 }
 0x974   : > { %v1282_v44 = vsel %vm234_vm1, %v1281_v42, 0.0  ;;  %v1278_v45 = vsel %vm234_vm1, %v1277_v43, 0.0  ;;  %v1290_v48 = vsel %vm234_vm1, %v1289_v46, 0.0  ;;  %v1286_v49 = vsel %vm234_vm1, %v1285_v47, 0.0 }
 0x975   : > { %v1297_v3 = vsel %vm3050_vm13, %v2731_v18, 0.0  ;;  %v1293_v50 = vsel %vm3051_vm15, %v2731_v18, 0.0  ;;  %v1305_v55 = vsel %vm3052_vm9, %v2731_v18, 0.0  ;;  %v1301_v56 = vsel %vm3053_vm0, %v2731_v18, 0.0 }
 0x976   : > { %v1298_v51 = vsel %vm234_vm1, %v1297_v3, 0.0  ;;  %v1294_v54 = vsel %vm234_vm1, %v1293_v50, 0.0  ;;  %v1306_v57 = vsel %vm234_vm1, %v1305_v55, 0.0  ;;  %v1302_v58 = vsel %vm234_vm1, %v1301_v56, 0.0 }
 0x977   : > { %1275 = vadd.xlane.f32.xlu1 %v1274_v36  ;;  %1271 = vadd.xlane.f32.xlu0 %v1270_v38  ;;  %vm3054_vm7 = vcmp.eq.s32.totalorder %v2343_v37, 6  ;;  %vm3055_vm8 = vcmp.eq.s32.totalorder %v2343_v37, 5  ;;  %vm3056_vm10 = vcmp.ge.s32.totalorder %v2343_v37, 7  ;;  %vm3057_vm13 = vcmask 7168  }
 0x978   : > { %v1313_v59 = vsel %vm3054_vm7, %v2731_v18, 0.0  ;;  %v1309_v60 = vsel %vm3055_vm8, %v2731_v18, 0.0  ;;  %v1317_v63 = vsel %vm3056_vm10, %v2731_v18, 0.0  ;;  %vm3058_vm15 = vcmask 15360  }
 0x979   : > { %v1314_v61 = vsel %vm234_vm1, %v1313_v59, 0.0  ;;  %v1310_v62 = vsel %vm234_vm1, %v1309_v60, 0.0  ;;  %v1318_v0 = vsel %vm234_vm1, %v1317_v63, 0.0  ;;  %vm3059_vm9 = vcmask 23552  }
 0x97a   : > { %vm3060_vm0 = vcmask 31744   ;;  %vm3061_vm7 = vcmask 39936   ;;  %vm3062_vm8 = vcmask 48128   ;;  %vm3063_vm10 = vcmask 56320  }
 0x97b   : > { %1283 = vadd.xlane.f32.xlu1 %v1282_v44  ;;  %1279 = vadd.xlane.f32.xlu0 %v1278_v45  ;;  %v1260_v56 = vpack.c.bf16 %v2731_v18, %v2731_v18 }
 0x97f   : > { %1291 = vadd.xlane.f32.xlu1 %v1290_v48  ;;  %1287 = vadd.xlane.f32.xlu0 %v1286_v49 }
 0x983   : > { %1299 = vadd.xlane.f32.xlu1 %v1298_v51  ;;  %1295 = vadd.xlane.f32.xlu0 %v1294_v54 }
 0x987   : > { %1307 = vadd.xlane.f32.xlu1 %v1306_v57  ;;  %1303 = vadd.xlane.f32.xlu0 %v1302_v58 }
 0x98b   : > { %1315 = vadd.xlane.f32.xlu1 %v1314_v61  ;;  %1311 = vadd.xlane.f32.xlu0 %v1310_v62 }
 0x98f   : > { %1319 = vadd.xlane.f32.xlu0 %v1318_v0 }
 0x99c   : > { %1465 = vrot.lane.b32.xlu1 %v2316_v13, %s2249_s14 }
 0x9a0   : > { %1516 = vrot.lane.b32.xlu1 %v2311_v11, %s2250_s16 }
 0x9a5   : > { %1408 = vrot.lane.b32.xlu0 %v2311_v11, %s2251_s17 }
 0x9fc   : > { %v1268_v2 = vpop.xlane.xlu1 %1267  ;;  %v1264_v4 = vpop.xlane.xlu0 %1263 }
 0x9fd   : > { %v1321_v6 = vsel %vm3057_vm13, %v1264_v4, %v1268_v2  ;;  %vm3064_vm13 = vcmask 72704  }
 0xa00   : > { %v1276_v5 = vpop.xlane.xlu1 %1275  ;;  %v1272_v8 = vpop.xlane.xlu0 %1271 }
 0xa01   : > { %v1322_v10 = vsel %vm3058_vm15, %v1321_v6, %v1272_v8  ;;  %vm3065_vm15 = vcmask 80896  }
 0xa02   : > { %v1323_v14 = vsel %vm3059_vm9, %v1322_v10, %v1276_v5  ;;  %vm3066_vm9 = vcmask 105472  }
 0xa04   : > { %v1284_v12 = vpop.xlane.xlu1 %1283  ;;  %v1280_v15 = vpop.xlane.xlu0 %1279 }
 0xa05   : > { %v1324_v13 = vsel %vm3060_vm0, %v1323_v14, %v1280_v15  ;;  %vm3067_vm0 = vcmask 113664  }
 0xa06   : > { %v1325_v17 = vsel %vm3061_vm7, %v1324_v13, %v1284_v12  ;;  %vm3068_vm7 = vcmask 121856  }
 0xa08   : > { %v1292_v16 = vpop.xlane.xlu1 %1291  ;;  %v1288_v7 = vpop.xlane.xlu0 %1287 }
 0xa09   : > { %v1326_v41 = vsel %vm3062_vm8, %v1325_v17, %v1288_v7  ;;  %vm3069_vm8 = vcmask 1043456  }
 0xa0a   : > { %v1327_v52 = vsel %vm3063_vm10, %v1326_v41, %v1292_v16  ;;  %vm3070_vm10 = vcmask 1046528  }
 0xa0c   : > { %v1300_v21 = vpop.xlane.xlu1 %1299  ;;  %v1296_v33 = vpop.xlane.xlu0 %1295 }
 0xa0d   : > { %v1328_v34 = vsel %vm234_vm1, %v1327_v52, %v1296_v33 }
 0xa0e   : > { %v1329_v36 = vsel %vm3064_vm13, %v1328_v34, %v1300_v21  ;;  %vm3072_vm13 = vcmp.eq.s32.totalorder %v2343_v37, 4294967295 }
 0xa10   : > { %v1308_v35 = vpop.xlane.xlu1 %1307  ;;  %v1304_v38 = vpop.xlane.xlu0 %1303 }
 0xa11   : > { %v1330_v42 = vsel %vm3065_vm15, %v1329_v36, %v1304_v38  ;;  %vm3073_vm15 = vcmp.eq.s32.totalorder %v2343_v37, 0 }
 0xa12   : > { %v1331_v44 = vsel %vm532_vm12, %v1330_v42, %v1308_v35 }
 0xa14   : > { %v1316_v43 = vpop.xlane.xlu1 %1315  ;;  %v1312_v45 = vpop.xlane.xlu0 %1311 }
 0xa15   : > { %v1332_v46 = vsel %vm534_vm11, %v1331_v44, %v1312_v45 }
 0xa16   : > { %v1333_v47 = vsel %vm3066_vm9, %v1332_v46, %v1316_v43  ;;  %vm3074_vm9 = vcmp.eq.s32.totalorder %v2343_v37, 1 }
 0xa18   : > { %v1320_v48 = vpop.xlane.xlu0 %1319  ;;  %v1466_v49 = vpop.permute.xlu1 %1465 }
 0xa19   : > { %v1334_v3 = vsel %vm3067_vm0, %v1333_v47, %v1320_v48  ;;  %vm3075_vm0 = vcmp.eq.s32.totalorder %v2343_v37, 2 }
 0xa1a   : > { %2065 = vmatmul.mubr.msk.f32.vlgmr.msra.gmra.mxu0 %vm3068_vm7, %v1334_v3  ;;  %vm3076_vm7 = vcmp.eq.s32.totalorder %v2343_v37, 3 }
 0xa1b   : > { %2074 = vmatpush3.bf16.xpose.msra.mxu0 %v2309_v9  ;;  %2075 = vmatprep.mubr.msk.bf16.mxu0 %vm3006_vm14, %v2225_v1 }
 0xa1c   : > { %v1409_v50 = vpop.permute.xlu0 %1408  ;;  %v1517_v51 = vpop.permute.xlu1 %1516  ;;  %2085 = vmatprep.subr.mxu0 %v2225_v1 }
 0xa1d   : > { %v1414_v54 = vsel %vm3069_vm8, %v1409_v50, 0  ;;  %v1519_v55 = vsel %vm234_vm1, %v1517_v51, 0  ;;  %vm3077_vm8 = vcmp.eq.s32.totalorder %v2343_v37, 4 }
 0xa1e   : > { %2068 = vmatpush3.bf16.msra.mxu1 %v1414_v54 }
 0xa1f   : > { %2079 = vmatprep.subr.bf16.mxu1 %v2225_v1 }
 0xa21   : > { %2070 = vmatmul.mubr.msk.bf16.vlgmr.msra.gmra.mxu1 %vm234_vm1, %v1260_v56  ;;  %v2216_v56 = vld [vmem:[%s2392_s26] ss:$0 sm:$0xff] }
 0xa22   : > { %2076 = vmatmul.mubr.msk.bf16.vlgmr.msra.gmra.mxu0 %vm234_vm1, %v1466_v49  ;;  %2080 = vmatpush3.bf16.xpose.msra.mxu1 %v1519_v55 }
 0xa23   : > { %2081 = vmatprep.mubr.msk.bf16.mxu1 %vm3006_vm14, %v2225_v1  ;;  %2086 = vmatpush3.msk.msra.mxu0 %vm3070_vm10, %v2467_v39  ;;  %vm3078_vm10 = vcmp.eq.s32.totalorder %v2343_v37, 5 }
 0xa24   : > { %2087 = vmatprep.subr.mxu0 %v2225_v1  ;;  %2089 = vmatprep.mubr.msk.f32.mxu0 %vm3006_vm14, %v2225_v1 }
 0xa25   : > { %2088 = vmatpush3.msra.mxu0 %v2472_v40  ;;  %2092 = vmatprep.subr.bf16.mxu1 %v2225_v1 }
 0xa29   : > { %2082 = vmatmul.mubr.msk.bf16.vlgmr.msra.gmra.mxu1 %vm234_vm1, %v1466_v49 }
 0xa2a   : > { %2094 = vmatprep.mubr.msk.bf16.mxu1 %vm3006_vm14, %v2225_v1  ;;  %vm3071_vm14 = vcmp.eq.s32.totalorder %v2343_v37, 4294967294 }
 0xada   : > { %v1404_v9 = vpop.f32.mrf.mxu0 }
 0xadc   : > { %v2066_v18 = vpop.f32.mrf.mxu0 }
 0xae1   : > { %v1450_v57 = vpop.f32.mrf.mxu1 }
 0xae2   : > { %v2834_v58 = vadd.f32 %v1450_v57, %v1404_v9  ;;  %v1504_v39 = vpop.f32.mrf.mxu0 }
 0xae3   : > { %1562 = vperm.xlu0 %2183, %v1504_v39   ;;  %1512 = vperm.xlu1 %2182, %v1504_v39   ;;  %v2071_v59 = vpop.f32.mrf.mxu1 }
 0xae4   : > { %v2077_v60 = vpop.f32.mrf.mxu0 }
 0xae5   : > { %v1453_v61 = vpop.f32.mrf.mxu1 }
 0xae6   : > { %v1507_v62 = vpop.f32.mrf.mxu0 }
 0xae7   : > { %2186 = vset.pattern.permute.xlu0 %v2231_v20  ;;  %2184 = vset.pattern.permute.xlu1 %v2230_v19  ;;  %v2072_v40 = vpop.f32.mrf.mxu1 }
 0xae8   : > { %1580 = vperm.xlu0 %2186, %v1504_v39   ;;  %1568 = vperm.xlu1 %2184, %v1504_v39   ;;  %v2078_v1 = vpop.f32.mrf.mxu0 }
 0xae9   : > { %v1555_v63 = vpop.f32.mrf.mxu1 }
 0xaeb   : > { %v2083_v0 = vpop.f32.mrf.mxu1 }
 0xaec   : > { %2189 = vset.pattern.permute.xlu0 %v2233_v23  ;;  %2185 = vset.pattern.permute.xlu1 %v2232_v22 }
 0xaed   : > { %1598 = vperm.xlu0 %2189, %v1504_v39   ;;  %1574 = vperm.xlu1 %2185, %v1504_v39   ;;  %v1558_v2 = vpop.f32.mrf.mxu1 }
 0xaef   : > { %v2084_v4 = vpop.f32.mrf.mxu1 }
 0xaf1   : > { %2192 = vset.pattern.permute.xlu0 %v2235_v25  ;;  %2187 = vset.pattern.permute.xlu1 %v2234_v24 }
 0xaf2   : > { %1616 = vperm.xlu0 %2192, %v1504_v39   ;;  %1586 = vperm.xlu1 %2187, %v1504_v39  }
 0xaf6   : > { %2195 = vset.pattern.permute.xlu0 %v2237_v27  ;;  %2188 = vset.pattern.permute.xlu1 %v2236_v26 }
 0xaf7   : > { %1634 = vperm.xlu0 %2195, %v1504_v39   ;;  %1592 = vperm.xlu1 %2188, %v1504_v39  }
 0xafb   : > { %2190 = vset.pattern.permute.xlu1 %v2238_v28  ;;  %2197 = vset.pattern.permute.xlu0 %v2242_v32 }
 0xafc   : > { %1604 = vperm.xlu1 %2190, %v1504_v39  }
 0xb00   : > { %2191 = vset.pattern.permute.xlu1 %v2239_v29 }
 0xb01   : > { %1610 = vperm.xlu1 %2191, %v1504_v39  }
 0xb05   : > { %2193 = vset.pattern.permute.xlu1 %v2240_v30 }
 0xb06   : > { %1622 = vperm.xlu1 %2193, %v1504_v39  }
 0xb0a   : > { %2194 = vset.pattern.permute.xlu1 %v2241_v31 }
 0xb0b   : > { %1628 = vperm.xlu1 %2194, %v1504_v39  }
 0xb0f   : > { %2196 = vset.pattern.permute.xlu1 %v2242_v32 }
 0xb10   : > { %1640 = vperm.xlu1 %2196, %v1504_v39  }
 0xb5e   : > { %v1513_v19 = vpop.permute.xlu1 %1512  ;;  %v1563_v22 = vpop.permute.xlu0 %1562 }
 0xb5f   : > { %v1515_v20 = vsel %vm281_vm2, %v1513_v19, 0.0  ;;  %v1565_v24 = vsel %vm336_vm3, %v1563_v22, 0.0 }
 0xb60   : > { %v1556_v23 = vadd.f32 %v1555_v63, %v1515_v20 }
 0xb62   : > { %v1566_v26 = vadd.f32 %v1565_v24, %v1556_v23 }
 0xb63   : > { %v1569_v25 = vpop.permute.xlu1 %1568  ;;  %v1581_v31 = vpop.permute.xlu0 %1580 }
 0xb64   : > { %v1571_v27 = vsel %vm343_vm4, %v1569_v25, 0.0  ;;  %v1583_v6 = vsel %vm357_vm6, %v1581_v31, 0.0 }
 0xb65   : > { %v1572_v28 = vadd.f32 %v1571_v27, %v1566_v26 }
 0xb68   : > { %v1575_v29 = vpop.permute.xlu1 %1574  ;;  %v1599_v13 = vpop.permute.xlu0 %1598 }
 0xb69   : > { %v1577_v30 = vsel %vm350_vm5, %v1575_v29, 0.0  ;;  %v1601_v17 = vsel %vm3073_vm15, %v1599_v13, 0.0 }
 0xb6a   : > { %v1578_v32 = vadd.f32 %v1577_v30, %v1572_v28 }
 0xb6c   : > { %v1584_v8 = vadd.f32 %v1583_v6, %v1578_v32 }
 0xb6d   : > { %v1587_v5 = vpop.permute.xlu1 %1586  ;;  %v1617_v35 = vpop.permute.xlu0 %1616 }
 0xb6e   : > { %v1589_v10 = vsel %vm3071_vm14, %v1587_v5, 0.0  ;;  %v1619_v38 = vsel %vm3076_vm7, %v1617_v35, 0.0  ;;  %vm3079_vm14 = vcmp.eq.s32.totalorder %v2343_v37, 6 }
 0xb6f   : > { %v1590_v12 = vadd.f32 %v1589_v10, %v1584_v8 }
 0xb72   : > { %v1593_v14 = vpop.permute.xlu1 %1592  ;;  %v1635_v45 = vpop.permute.xlu0 %1634 }
 0xb73   : > { %v1595_v15 = vsel %vm3072_vm13, %v1593_v14, 0.0  ;;  %v1637_v3 = vsel %vm3079_vm14, %v1635_v45, 0.0  ;;  %vm3080_vm13 = vcmp.ge.s32.totalorder %v2343_v37, 7 }
 0xb74   : > { %v1596_v16 = vadd.f32 %v1595_v15, %v1590_v12 }
 0xb76   : > { %v1602_v41 = vadd.f32 %v1601_v17, %v1596_v16 }
 0xb77   : > { %v1605_v7 = vpop.permute.xlu1 %1604 }
 0xb78   : > { %v1607_v21 = vsel %vm3074_vm9, %v1605_v7, 0.0 }
 0xb79   : > { %v1608_v52 = vadd.f32 %v1607_v21, %v1602_v41 }
 0xb7c   : > { %v1611_v33 = vpop.permute.xlu1 %1610 }
 0xb7d   : > { %v1613_v34 = vsel %vm3075_vm0, %v1611_v33, 0.0  ;;  %v1959_v33 = vpack.c.bf16 %v2681_v53, %v2681_v53 }
 0xb7e   : > { %v1614_v36 = vadd.f32 %v1613_v34, %v1608_v52  ;;  %v1960_v52 = vpack.c.bf16 %v2834_v58, %v2834_v58 }
 0xb80   : > { %v1620_v43 = vadd.f32 %v1619_v38, %v1614_v36 }
 0xb81   : > { %v1623_v42 = vpop.permute.xlu1 %1622 }
 0xb82   : > { %v1625_v44 = vsel %vm3077_vm8, %v1623_v42, 0.0 }
 0xb83   : > { %v1626_v46 = vadd.f32 %v1625_v44, %v1620_v43 }
 0xb86   : > { %v1629_v47 = vpop.permute.xlu1 %1628 }
 0xb87   : > { %v1631_v48 = vsel %vm3078_vm10, %v1629_v47, 0.0 }
 0xb88   : > { %v1632_v49 = vadd.f32 %v1631_v48, %v1626_v46 }
 0xb8a   : > { %v1638_v50 = vadd.f32 %v1637_v3, %v1632_v49 }
 0xb8b   : > { %v1641_v51 = vpop.permute.xlu1 %1640 }
 0xb8c   : > { %v1643_v54 = vsel %vm3080_vm13, %v1641_v51, 0.0 }
 0xb8d   : > { %v1644_v55 = vadd.f32 %v1643_v54, %v1638_v50 }
 0xb8f   : > { %v1645_v9 = vadd.f32 %v2216_v56, %v1644_v55 }
 0xb91   : > { %v1646_v18 = vsel %vm234_vm1, %v1645_v9, -inf }
 0xb92   : > { %1647 = vmax.xlane.f32.xlu1 %v1646_v18 }
 0xc1b   : > { %v1648_v57 = vpop.xlane.xlu1 %1647 }
 0xc1c   : > { %v1649_v39 = vsub.f32 %v1645_v9, %v1648_v57 }
 0xc1e   : > { %v1650_v59 = vmul.f32 1.442695, %v1649_v39 }
 0xc20   : > { %2212 = vpow2.f32 %v1650_v59 }
 0xc2d   : > { %v2213_v60 = vpop.eup %2212 }
 0xc2e   : > { %v1652_v61 = vsel %vm234_vm1, %v2213_v60, 0.0 }
 0xc2f   : > { %1653 = vadd.xlane.f32.xlu0 %v1652_v61 }
 0xcb8   : > { %v1654_v62 = vpop.xlane.xlu0 %1653 }
 0xcb9   : > { %2214 = vrcp.f32 %v1654_v62 }
 0xcc6   : > { %v2215_v40 = vpop.eup %2214 }
 0xcc7   : > { %v2883_v1 = vmul.f32 %v2215_v40, %v2213_v60 }
 0xcc9   : > { %v1662_v63 = vsel %vm336_vm3, %v2883_v1, 0.0  ;;  %v1658_v0 = vsel %vm281_vm2, %v2883_v1, 0.0  ;;  %v1670_v19 = vsel %vm350_vm5, %v2883_v1, 0.0  ;;  %v1666_v20 = vsel %vm343_vm4, %v2883_v1, 0.0  ;;  %vm3082_vm3 = vmmov %vm3073_vm15 }
 0xcca   : > { %v1663_v2 = vsel %vm234_vm1, %v1662_v63, 0.0  ;;  %v1659_v4 = vsel %vm234_vm1, %v1658_v0, 0.0  ;;  %v1671_v22 = vsel %vm234_vm1, %v1670_v19, 0.0  ;;  %v1667_v23 = vsel %vm234_vm1, %v1666_v20, 0.0  ;;  %vm3084_vm5 = vmmov %vm3075_vm0 }
 0xccb   : > { %1664 = vadd.xlane.f32.xlu1 %v1663_v2  ;;  %1660 = vadd.xlane.f32.xlu0 %v1659_v4  ;;  %vm3081_vm2 = vcmp.eq.s32.totalorder %v2343_v37, 4294967294  ;;  %v1674_v25 = vsel %vm357_vm6, %v2883_v1, 0.0  ;;  %v1686_v28 = vsel %vm3082_vm3, %v2883_v1, 0.0  ;;  %vm3083_vm4 = vcmp.eq.s32.totalorder %v2343_v37, 4294967295  ;;  %vm3085_vm6 = vmmov %vm3074_vm9 }
 0xccc   : > { %v1678_v24 = vsel %vm3081_vm2, %v2883_v1, 0.0  ;;  %v1675_v27 = vsel %vm234_vm1, %v1674_v25, 0.0  ;;  %v1682_v29 = vsel %vm3083_vm4, %v2883_v1, 0.0  ;;  %v1687_v30 = vsel %vm234_vm1, %v1686_v28, 0.0  ;;  %vm3086_vm15 = vmmov %vm3077_vm8 }
 0xccd   : > { %v1679_v26 = vsel %vm234_vm1, %v1678_v24, 0.0  ;;  %v1683_v31 = vsel %vm234_vm1, %v1682_v29, 0.0  ;;  %v1694_v32 = vsel %vm3084_vm5, %v2883_v1, 0.0  ;;  %v1690_v6 = vsel %vm3085_vm6, %v2883_v1, 0.0  ;;  %vm3087_vm9 = vmmov %vm3076_vm7 }
 0xcce   : > { %v1695_v5 = vsel %vm234_vm1, %v1694_v32, 0.0  ;;  %v1691_v8 = vsel %vm234_vm1, %v1690_v6, 0.0  ;;  %v1702_v10 = vsel %vm3086_vm15, %v2883_v1, 0.0  ;;  %v1698_v12 = vsel %vm3087_vm9, %v2883_v1, 0.0  ;;  %vm3088_vm0 = vmmov %vm3079_vm14 }
 0xccf   : > { %1672 = vadd.xlane.f32.xlu1 %v1671_v22  ;;  %1668 = vadd.xlane.f32.xlu0 %v1667_v23  ;;  %v1703_v14 = vsel %vm234_vm1, %v1702_v10, 0.0  ;;  %v1699_v15 = vsel %vm234_vm1, %v1698_v12, 0.0  ;;  %v1710_v13 = vsel %vm3088_vm0, %v2883_v1, 0.0  ;;  %vm3089_vm7 = vmmov %vm3078_vm10  ;;  %vm3091_vm10 = vcmask 7168  }
 0xcd0   : > { %v1706_v16 = vsel %vm3089_vm7, %v2883_v1, 0.0  ;;  %v1711_v17 = vsel %vm234_vm1, %v1710_v13, 0.0  ;;  %vm3090_vm8 = vmmov %vm3080_vm13  ;;  %vm3092_vm14 = vcmask 15360   ;;  %vm3093_vm13 = vcmask 23552  }
 0xcd1   : > { %v1707_v7 = vsel %vm234_vm1, %v1706_v16, 0.0  ;;  %v1714_v41 = vsel %vm3090_vm8, %v2883_v1, 0.0  ;;  %vm3094_vm2 = vcmask 31744   ;;  %vm3095_vm3 = vcmask 39936  }
 0xcd2   : > { %v1715_v21 = vsel %vm234_vm1, %v1714_v41, 0.0  ;;  %vm3096_vm4 = vcmask 48128   ;;  %vm3097_vm5 = vcmask 56320   ;;  %vm3098_vm6 = vcmask 72704  }
 0xcd3   : > { %1680 = vadd.xlane.f32.xlu1 %v1679_v26  ;;  %1676 = vadd.xlane.f32.xlu0 %v1675_v27  ;;  %vm3099_vm15 = vcmask 80896   ;;  %vm3100_vm9 = vcmask 105472   ;;  %vm3101_vm0 = vcmask 1043456   ;;  %vm3102_vm7 = vcmask 113664  }
 0xcd4   : > { %vm3103_vm8 = vcmask 121856   ;;  %v1657_v63 = vpack.c.bf16 %v2883_v1, %v2883_v1 }
 0xcd7   : > { %1688 = vadd.xlane.f32.xlu1 %v1687_v30  ;;  %1684 = vadd.xlane.f32.xlu0 %v1683_v31 }
 0xcdb   : > { %1696 = vadd.xlane.f32.xlu1 %v1695_v5  ;;  %1692 = vadd.xlane.f32.xlu0 %v1691_v8 }
 0xcdf   : > { %1704 = vadd.xlane.f32.xlu1 %v1703_v14  ;;  %1700 = vadd.xlane.f32.xlu0 %v1699_v15 }
 0xce3   : > { %1712 = vadd.xlane.f32.xlu1 %v1711_v17  ;;  %1708 = vadd.xlane.f32.xlu0 %v1707_v7 }
 0xce7   : > { %1716 = vadd.xlane.f32.xlu0 %v1715_v21 }
 0xcf4   : > { %1805 = vrot.lane.b32.xlu1 %v2311_v11, %s2252_s18 }
 0xcf8   : > { %1460 = vrot.lane.b32.xlu1 %v1960_v52, %s2253_s19 }
 0xcfd   : > { %1063 = vrot.lane.b32.xlu0 %v1959_v33, %s2254_s20 }
 0xd54   : > { %v1665_v34 = vpop.xlane.xlu1 %1664  ;;  %v1661_v35 = vpop.xlane.xlu0 %1660 }
 0xd55   : > { %v1718_v37 = vsel %vm3091_vm10, %v1661_v35, %v1665_v34  ;;  %vm1066_vm10 = vcmask 126016  }
 0xd58   : > { %v1673_v36 = vpop.xlane.xlu1 %1672  ;;  %v1669_v38 = vpop.xlane.xlu0 %1668 }
 0xd59   : > { %v1719_v42 = vsel %vm3092_vm14, %v1718_v37, %v1669_v38 }
 0xd5a   : > { %v1720_v11 = vsel %vm3093_vm13, %v1719_v42, %v1673_v36 }
 0xd5c   : > { %v1681_v43 = vpop.xlane.xlu1 %1680  ;;  %v1677_v44 = vpop.xlane.xlu0 %1676 }
 0xd5d   : > { %v1721_v58 = vsel %vm3094_vm2, %v1720_v11, %v1677_v44 }
 0xd5e   : > { %v1722_v46 = vsel %vm3095_vm3, %v1721_v58, %v1681_v43 }
 0xd60   : > { %v1689_v45 = vpop.xlane.xlu1 %1688  ;;  %v1685_v53 = vpop.xlane.xlu0 %1684 }
 0xd61   : > { %v1723_v47 = vsel %vm3096_vm4, %v1722_v46, %v1685_v53 }
 0xd62   : > { %v1724_v49 = vsel %vm3097_vm5, %v1723_v47, %v1689_v45 }
 0xd64   : > { %v1697_v48 = vpop.xlane.xlu1 %1696  ;;  %v1693_v3 = vpop.xlane.xlu0 %1692 }
 0xd65   : > { %v1725_v50 = vsel %vm234_vm1, %v1724_v49, %v1693_v3 }
 0xd66   : > { %v1726_v54 = vsel %vm3098_vm6, %v1725_v50, %v1697_v48 }
 0xd68   : > { %v1705_v51 = vpop.xlane.xlu1 %1704  ;;  %v1701_v55 = vpop.xlane.xlu0 %1700 }
 0xd69   : > { %v1727_v56 = vsel %vm3099_vm15, %v1726_v54, %v1701_v55 }
 0xd6a   : > { %v1728_v18 = vsel %vm532_vm12, %v1727_v56, %v1705_v51  ;;  %vm1463_vm12 = vcmask 191616  }
 0xd6c   : > { %v1713_v9 = vpop.xlane.xlu1 %1712  ;;  %v1709_v57 = vpop.xlane.xlu0 %1708 }
 0xd6d   : > { %v1729_v39 = vsel %vm534_vm11, %v1728_v18, %v1709_v57  ;;  %vm1860_vm11 = vcmask 257216  }
 0xd6e   : > { %v1730_v60 = vsel %vm3100_vm9, %v1729_v39, %v1713_v9 }
 0xd70   : > { %v1806_v59 = vpop.permute.xlu1 %1805  ;;  %v1717_v61 = vpop.xlane.xlu0 %1716 }
 0xd71   : > { %v1811_v62 = vsel %vm3101_vm0, %v1806_v59, 0  ;;  %v1731_v40 = vsel %vm3102_vm7, %v1730_v60, %v1717_v61 }
 0xd72   : > { %2090 = vmatmul.mubr.msk.f32.vlgmr.msra.gmra.mxu0 %vm3103_vm8, %v1731_v40  ;;  %2093 = vmatpush3.bf16.msra.mxu1 %v1811_v62 }
 0xd74   : > { %v1461_v0 = vpop.permute.xlu1 %1460  ;;  %v1064_v2 = vpop.permute.xlu0 %1063 }
 0xd75   : > { %1067 = vst.msk [vmem:[%s2526_s10] sm:$0xf] %vm1066_vm10, %v1064_v2  ;;  %2095 = vmatmul.mubr.msk.bf16.vlgmr.msra.gmra.mxu1 %vm234_vm1, %v1657_v63 }
 0xd76   : > { %1464 = vst.msk [vmem:[%s2526_s10] sm:$0xf] %vm1463_vm12, %v1461_v0 }
 0xe32   : > { %v1801_v4 = vpop.f32.mrf.mxu0 }
 0xe34   : > { %v2091_v19 = vpop.f32.mrf.mxu0 }
 0xe35   : > { %v1847_v20 = vpop.f32.mrf.mxu1 }
 0xe36   : > { %v1848_v22 = vadd.f32 %v1847_v20, %v1801_v4 }
 0xe37   : > { %v2096_v23 = vpop.f32.mrf.mxu1 }
 0xe38   : > { %v1961_v24 = vpack.c.bf16 %v1848_v22, %v1848_v22 }
 0xe39   : > { %v1850_v25 = vpop.f32.mrf.mxu1 }
 0xe3a   : > { %1857 = vrot.lane.b32.xlu1 %v1961_v24, %s2255_s21 }
 0xe3b   : > { %v2097_v26 = vpop.f32.mrf.mxu1 }
 0xeac   : > { %v1858_v1 = vpop.permute.xlu1 %1857 }
 0xead   : > { %1861 = vst.msk [vmem:[%s2526_s10] sm:$0xf] %vm1860_vm11, %v1858_v1 }
 0xeae PF: > { %s14_s15 = sadd.s32 1, %s2223_s15  }
 0xeaf   : > { %p11_p4 = scmp.ge.s32.totalorder %s14_s15, 4  }
 0xeb1   :  { %13 = sbr.rel (!%p11_p4) target bundleno = 1 (0x1), region = 69 }

</bundles_post_ra>
